<compile_context>
chip_gen: v7x
topology: tpu7x:2x2x1
jax: 0.10.0
libtpu: 0.0.40
codegen_flags: <defaults>
</compile_context>

<pallas_src>
import functools

import jax
import jax.numpy as jnp
from jax import lax
from jax.experimental import pallas as pl
from jax.experimental.pallas import tpu as pltpu

BIG = 1e9        # added to the squared norm of masked-out (invalid) source locations
SENTINEL = 1e30  # "removed / empty slot" cost; larger than any real (even masked) cost


def _local_topk(cost, vt, num_k):
    """Exact per-query-column top-`num_k` smallest costs and their matched value rows.

    cost: (TN, TQ) f32   row-shifted patch SSD of this candidate tile (mask folded in via +BIG)
    vt:   (Cv, TN) f32   lane-dense value rows of this candidate tile
    returns ([K x (1, TQ)] costs sorted ascending, [K x (Cv, TQ)] value rows)
    """
    tn, tq = cost.shape
    iota = lax.broadcasted_iota(jnp.int32, (tn, tq), 0)

    costs, wins = [], []
    c = cost
    for _ in range(num_k):
        m = jnp.min(c, axis=0, keepdims=True)                               # (1, TQ)
        midx = jnp.min(jnp.where(c == m, iota, tn), axis=0, keepdims=True)  # first tie wins
        win = iota == midx                                                  # (TN, TQ) one-hot
        c = jnp.where(win, SENTINEL, c)
        costs.append(m)
        wins.append(win.astype(jnp.float32))

    # Single MXU gather for all K winners: (Cv, TN) @ (TN, K*TQ) -> (Cv, K*TQ).
    win_cat = jnp.concatenate(wins, axis=1)
    vals_cat = lax.dot_general(vt, win_cat, (((1,), (0,)), ((), ())),
                               preferred_element_type=jnp.float32)
    vals = [vals_cat[:, k * tq:(k + 1) * tq] for k in range(num_k)]
    return costs, vals


def _softmax_combine(out_ref, costs, vals, num_k, inv_t):
    """softmax(-cost/T) over the K matches, weighted sum of their value rows; lane-dense store."""
    logits = [(-inv_t) * ck for ck in costs]              # K x (1, TQ)
    mx = logits[0]
    for l in logits[1:]:
        mx = jnp.maximum(mx, l)
    es = [jnp.exp(l - mx) for l in logits]
    den = es[0]
    for e in es[1:]:
        den = den + e
    inv_den = pl.reciprocal(den, approx=True)             # EUP slot, ~free
    acc = (es[0] * inv_den) * vals[0]
    for k in range(1, num_k):
        acc = acc + (es[k] * inv_den) * vals[k]           # (Cv, TQ)
    out_ref[0] = acc.astype(out_ref.dtype)                # lane-dense store


def _psal_fused_kernel(uq_ref, uc_ref, sqc_ref, v_ref, out_ref, *scratch,
                       num_k, inv_t, n_cand_tiles):
    """One (batch, query-tile, candidate-tile) grid step.

    uq_ref:  (1, TQ, D)  bf16  unfolded patches of the query tile (resident across j)
    uc_ref:  (1, TN, D)  bf16  unfolded patches of the current candidate tile (streamed)
    sqc_ref: (1, TN, 1)  f32   candidate squared patch norms (+BIG where masked)
    v_ref:   (1, Cv, TN) f32   value rows of the candidate tile (lane-dense)
    out_ref: (1, Cv, TQ) f32   reconstruction block (written at the last candidate tile)
    scratch (only when n_cand_tiles > 1):
      best_cost: (K, TQ)     f32 running top-K costs (row-shifted SSD)
      best_val:  (K, Cv, TQ) f32 value rows of the running top-K matches
    """
    uq = uq_ref[0]     # (TQ, D)
    uc = uc_ref[0]     # (TN, D)
    sqc = sqc_ref[0]   # (TN, 1)
    vt = v_ref[0]      # (Cv, TN)

    # Row-shifted patch SSD: ||p_t||^2 - 2<p_t, p_q>.  The per-query ||p_q||^2 term is constant
    # across candidates, so dropping it changes neither the top-K ranking nor the softmax weights.
    dots = lax.dot_general(uc, uq, (((1,), (1,)), ((), ())),
                           preferred_element_type=jnp.float32)        # (TN, TQ)  bf16-in MXU
    cost = sqc - 2.0 * dots                                           # mask folded in via +BIG

    tile_costs, tile_vals = _local_topk(cost, vt, num_k)

    if n_cand_tiles == 1:
        # Single candidate tile: no running state, no merge, no scratch.
        _softmax_combine(out_ref, tile_costs, tile_vals, num_k, inv_t)
        return

    best_cost, best_val = scratch
    j = pl.program_id(2)

    @pl.when(j == 0)
    def _init():
        best_cost[...] = jnp.full_like(best_cost, SENTINEL)
        best_val[...] = jnp.zeros_like(best_val)

    # --- merge with the running top-K: only 2K tiny (1,TQ)/(Cv,TQ) candidates per query ---
    cand_costs = [best_cost[k:k + 1] for k in range(num_k)] + tile_costs
    cand_vals = [best_val[k] for k in range(num_k)] + tile_vals

    new_costs, new_vals = [], []
    for _ in range(num_k):
        m = cand_costs[0]
        for cc in cand_costs[1:]:
            m = jnp.minimum(m, cc)
        picked = jnp.zeros_like(cand_vals[0])
        taken = jnp.zeros(m.shape, dtype=jnp.bool_)
        nxt = []
        for cc, vv in zip(cand_costs, cand_vals):
            is_win = jnp.logical_and(cc == m, jnp.logical_not(taken))
            picked = jnp.where(is_win, vv, picked)
            taken = jnp.logical_or(taken, is_win)
            nxt.append(jnp.where(is_win, SENTINEL, cc))
        cand_costs = nxt
        new_costs.append(m)
        new_vals.append(picked)

    for k in range(num_k):
        best_cost[k:k + 1] = new_costs[k]
        best_val[k] = new_vals[k]

    # --- finalize at the last candidate tile ---
    @pl.when(j == pl.num_programs(2) - 1)
    def _finalize():
        _softmax_combine(out_ref, new_costs, new_vals, num_k, inv_t)


def _unfold_patches(x, ps):
    # x: (B, C, H, W) -> (B, H*W, C*ps*ps); zero padding, patch centered at each pixel.
    b, c, h, w = x.shape
    p = ps // 2
    xp = jnp.pad(x, ((0, 0), (0, 0), (p, p), (p, p)))
    cols = []
    for di in range(ps):
        for dj in range(ps):
            cols.append(xp[:, :, di:di + h, dj:dj + w])
    u = jnp.stack(cols, axis=2)                     # (B, C, ps*ps, H, W)
    u = u.reshape(b, c * ps * ps, h * w)            # (B, D, HW)
    return jnp.transpose(u, (0, 2, 1))              # (B, HW, D)


def psal_attention_masked(x, mask, v=None, *, patch_size=3, num_k=4, T=1.0, tq=256, tn=256):
    """Forward pass of PSAttentionMasked (aggregation=False).

    x:    (B, C,  H, W) query/key feature map
    mask: (B, 1,  H, W) 1 = valid source location, 0 = masked out
    v:    (B, Cv, H, W) value map (defaults to x)
    returns (B, Cv, H, W) float32
    """
    if v is None:
        v = x
    b, c, h, w = x.shape
    cv = v.shape[1]
    hw = h * w
    d = c * patch_size * patch_size
    tq = min(tq, hw)
    tn = min(tn, hw)
    assert hw % tq == 0 and hw % tn == 0, "H*W must be divisible by the tile sizes"
    assert num_k <= tn
    n_cand_tiles = hw // tn

    u_bf16 = _unfold_patches(x.astype(jnp.float32), patch_size).astype(jnp.bfloat16)  # (B, HW, D)
    # Squared norms of the bf16-rounded patches so the cost matches the in-kernel bf16 dot.
    uf = u_bf16.astype(jnp.float32)
    sq = jnp.sum(uf * uf, axis=-1)                                     # (B, HW)    f32
    valid = mask.astype(jnp.float32).reshape(b, hw) > 0.5
    sqc_masked = jnp.where(valid, sq, sq + BIG)[..., None]             # (B, HW, 1) mask folded in
    v_flat = v.astype(jnp.float32).reshape(b, cv, hw)                  # (B, Cv, HW) lane-dense

    scratch_shapes = []
    if n_cand_tiles > 1:
        scratch_shapes = [pltpu.VMEM((num_k, tq), jnp.float32),        # running top-K costs
                          pltpu.VMEM((num_k, cv, tq), jnp.float32)]    # running top-K value rows

    out = pl.pallas_call(
        functools.partial(_psal_fused_kernel, num_k=num_k, inv_t=float(1.0 / T),
                          n_cand_tiles=n_cand_tiles),
        out_shape=jax.ShapeDtypeStruct((b, cv, hw), jnp.float32),
        grid=(b, hw // tq, n_cand_tiles),
        in_specs=[
            pl.BlockSpec((1, tq, d), lambda bi, i, j: (bi, i, 0)),    # query patches (resident in j)
            pl.BlockSpec((1, tn, d), lambda bi, i, j: (bi, j, 0)),    # candidate patches (streamed)
            pl.BlockSpec((1, tn, 1), lambda bi, i, j: (bi, j, 0)),    # candidate norms + mask
            pl.BlockSpec((1, cv, tn), lambda bi, i, j: (bi, 0, j)),   # candidate value rows
        ],
        out_specs=pl.BlockSpec((1, cv, tq), lambda bi, i, j: (bi, 0, i)),
        scratch_shapes=scratch_shapes,
        compiler_params=pltpu.CompilerParams(
            dimension_semantics=("parallel", "parallel", "arbitrary")),
    )(u_bf16, u_bf16, sqc_masked, v_flat)
    return out.reshape(b, cv, h, w)                                   # no transpose needed (NCHW)


if __name__ == "__main__":
    key = jax.random.PRNGKey(0)
    B, C, H, W = 2, 4, 16, 16
    kx, _ = jax.random.split(key)
    x = jax.random.normal(kx, (B, C, H, W), dtype=jnp.float32)
    # validity mask: 1 = usable source pixel, 0 = hole (excluded from matching)
    mask = jnp.ones((B, 1, H, W), dtype=jnp.float32)
    mask = mask.at[:, :, 4:12, 4:12].set(0.0)

    # Single-candidate-tile (fully fused, scratch-free) path.
    out = psal_attention_masked(x, mask, v=None, patch_size=3, num_k=4, T=1.0)
    out = jax.block_until_ready(out)
    assert out.shape == (B, C, H, W) and out.dtype == jnp.float32
    assert bool(jnp.all(jnp.isfinite(out)))

    # Streamed-candidate path (exercises the running top-K merge + VMEM scratch).
    out2 = psal_attention_masked(x, mask, v=None, patch_size=3, num_k=4, T=1.0, tq=128, tn=128)
    out2 = jax.block_until_ready(out2)
    assert out2.shape == (B, C, H, W) and out2.dtype == jnp.float32
    assert bool(jnp.all(jnp.isfinite(out2)))
    # Both tilings perform the same exhaustive masked top-K attention.
    assert bool(jnp.max(jnp.abs(out - out2)) < 2e-3)

    print("KERNEL_OK")
</pallas_src>

<mosaic_0001>
module attributes {stable_mosaic.version = 11 : i64} {
  func.func @_psal_fused_kernel(%arg0: i32, %arg1: i32, %arg2: i32, %arg3: memref<1x256x36xbf16, #tpu.memory_space<vmem>>, %arg4: memref<1x256x36xbf16, #tpu.memory_space<vmem>>, %arg5: memref<1x256x1xf32, #tpu.memory_space<vmem>>, %arg6: memref<1x4x256xf32, #tpu.memory_space<vmem>>, %arg7: memref<1x4x256xf32, #tpu.memory_space<vmem>>) attributes {dimension_semantics = [#tpu.dimension_semantics<parallel>, #tpu.dimension_semantics<parallel>, #tpu.dimension_semantics<arbitrary>], iteration_bounds = array<i64: 2, 1, 1>, scalar_prefetch = 0 : i64, scratch_operands = 0 : i64, tpu.core_type = #tpu.core_type<tc>, window_params = [{transform_indices = @transform_0, window_bounds = array<i64: 1, 256, 36>}, {transform_indices = @transform_1, window_bounds = array<i64: 1, 256, 36>}, {transform_indices = @transform_2, window_bounds = array<i64: 1, 256, 1>}, {transform_indices = @transform_3, window_bounds = array<i64: 1, 4, 256>}, {transform_indices = @transform_4, window_bounds = array<i64: 1, 4, 256>}]} {
    %c0 = arith.constant 0 : index
    %c0_0 = arith.constant 0 : index
    %c0_1 = arith.constant 0 : index
    %0 = vector.load %arg3[%c0, %c0_0, %c0_1] : memref<1x256x36xbf16, #tpu.memory_space<vmem>>, vector<1x256x36xbf16>
    %1 = vector.shape_cast %0 : vector<1x256x36xbf16> to vector<256x36xbf16>
    %c0_2 = arith.constant 0 : index
    %c0_3 = arith.constant 0 : index
    %c0_4 = arith.constant 0 : index
    %2 = vector.load %arg4[%c0_2, %c0_3, %c0_4] : memref<1x256x36xbf16, #tpu.memory_space<vmem>>, vector<1x256x36xbf16>
    %3 = vector.shape_cast %2 : vector<1x256x36xbf16> to vector<256x36xbf16>
    %c0_5 = arith.constant 0 : index
    %c0_6 = arith.constant 0 : index
    %c0_7 = arith.constant 0 : index
    %4 = vector.load %arg5[%c0_5, %c0_6, %c0_7] : memref<1x256x1xf32, #tpu.memory_space<vmem>>, vector<1x256x1xf32>
    %5 = vector.shape_cast %4 : vector<1x256x1xf32> to vector<256x1xf32>
    %c0_8 = arith.constant 0 : index
    %c0_9 = arith.constant 0 : index
    %c0_10 = arith.constant 0 : index
    %6 = vector.load %arg6[%c0_8, %c0_9, %c0_10] : memref<1x4x256xf32, #tpu.memory_space<vmem>>, vector<1x4x256xf32>
    %7 = vector.shape_cast %6 : vector<1x4x256xf32> to vector<4x256xf32>
    %cst = arith.constant dense<0.000000e+00> : vector<256x256xf32>
    %8 = tpu.matmul %3, %1, %cst {dimension_numbers = #tpu.dot_dimension_numbers<[1], [1], [0], [0], [0, 0, 1, 0], [], []>} : vector<256x36xbf16>, vector<256x36xbf16>, vector<256x256xf32> -> vector<256x256xf32>
    %cst_11 = arith.constant 2.000000e+00 : f32
    %9 = vector.broadcast %cst_11 : f32 to vector<256x256xf32>
    %10 = arith.mulf %9, %8 : vector<256x256xf32>
    %11 = vector.broadcast %5 : vector<256x1xf32> to vector<256x256xf32>
    %12 = arith.subf %11, %10 : vector<256x256xf32>
    %13 = tpu.iota {dimensions = array<i32: 0>} : vector<256x256xi32>
    %cst_12 = arith.constant dense<0x7F800000> : vector<256xf32>
    %14 = vector.multi_reduction <minimumf>, %12, %cst_12 [0] : vector<256x256xf32> to vector<256xf32>
    %15 = vector.shape_cast %14 : vector<256xf32> to vector<1x256xf32>
    %16 = vector.broadcast %15 : vector<1x256xf32> to vector<256x256xf32>
    %17 = arith.cmpf oeq, %12, %16 : vector<256x256xf32>
    %c256_i32 = arith.constant 256 : i32
    %18 = vector.broadcast %c256_i32 : i32 to vector<256x256xi32>
    %19 = arith.select %17, %13, %18 : vector<256x256xi1>, vector<256x256xi32>
    %cst_13 = arith.constant dense<2147483647> : vector<256xi32>
    %20 = vector.multi_reduction <minsi>, %19, %cst_13 [0] : vector<256x256xi32> to vector<256xi32>
    %21 = vector.shape_cast %20 : vector<256xi32> to vector<1x256xi32>
    %22 = vector.broadcast %21 : vector<1x256xi32> to vector<256x256xi32>
    %23 = arith.cmpi eq, %13, %22 : vector<256x256xi32>
    %cst_14 = arith.constant 1.000000e+30 : f32
    %24 = vector.broadcast %cst_14 : f32 to vector<256x256xf32>
    %25 = arith.select %23, %24, %12 : vector<256x256xi1>, vector<256x256xf32>
    %26 = arith.extui %23 : vector<256x256xi1> to vector<256x256xi32>
    %27 = arith.sitofp %26 : vector<256x256xi32> to vector<256x256xf32>
    %cst_15 = arith.constant dense<0x7F800000> : vector<256xf32>
    %28 = vector.multi_reduction <minimumf>, %25, %cst_15 [0] : vector<256x256xf32> to vector<256xf32>
    %29 = vector.shape_cast %28 : vector<256xf32> to vector<1x256xf32>
    %30 = vector.broadcast %29 : vector<1x256xf32> to vector<256x256xf32>
    %31 = arith.cmpf oeq, %25, %30 : vector<256x256xf32>
    %c256_i32_16 = arith.constant 256 : i32
    %32 = vector.broadcast %c256_i32_16 : i32 to vector<256x256xi32>
    %33 = arith.select %31, %13, %32 : vector<256x256xi1>, vector<256x256xi32>
    %cst_17 = arith.constant dense<2147483647> : vector<256xi32>
    %34 = vector.multi_reduction <minsi>, %33, %cst_17 [0] : vector<256x256xi32> to vector<256xi32>
    %35 = vector.shape_cast %34 : vector<256xi32> to vector<1x256xi32>
    %36 = vector.broadcast %35 : vector<1x256xi32> to vector<256x256xi32>
    %37 = arith.cmpi eq, %13, %36 : vector<256x256xi32>
    %cst_18 = arith.constant 1.000000e+30 : f32
    %38 = vector.broadcast %cst_18 : f32 to vector<256x256xf32>
    %39 = arith.select %37, %38, %25 : vector<256x256xi1>, vector<256x256xf32>
    %40 = arith.extui %37 : vector<256x256xi1> to vector<256x256xi32>
    %41 = arith.sitofp %40 : vector<256x256xi32> to vector<256x256xf32>
    %cst_19 = arith.constant dense<0x7F800000> : vector<256xf32>
    %42 = vector.multi_reduction <minimumf>, %39, %cst_19 [0] : vector<256x256xf32> to vector<256xf32>
    %43 = vector.shape_cast %42 : vector<256xf32> to vector<1x256xf32>
    %44 = vector.broadcast %43 : vector<1x256xf32> to vector<256x256xf32>
    %45 = arith.cmpf oeq, %39, %44 : vector<256x256xf32>
    %c256_i32_20 = arith.constant 256 : i32
    %46 = vector.broadcast %c256_i32_20 : i32 to vector<256x256xi32>
    %47 = arith.select %45, %13, %46 : vector<256x256xi1>, vector<256x256xi32>
    %cst_21 = arith.constant dense<2147483647> : vector<256xi32>
    %48 = vector.multi_reduction <minsi>, %47, %cst_21 [0] : vector<256x256xi32> to vector<256xi32>
    %49 = vector.shape_cast %48 : vector<256xi32> to vector<1x256xi32>
    %50 = vector.broadcast %49 : vector<1x256xi32> to vector<256x256xi32>
    %51 = arith.cmpi eq, %13, %50 : vector<256x256xi32>
    %cst_22 = arith.constant 1.000000e+30 : f32
    %52 = vector.broadcast %cst_22 : f32 to vector<256x256xf32>
    %53 = arith.select %51, %52, %39 : vector<256x256xi1>, vector<256x256xf32>
    %54 = arith.extui %51 : vector<256x256xi1> to vector<256x256xi32>
    %55 = arith.sitofp %54 : vector<256x256xi32> to vector<256x256xf32>
    %cst_23 = arith.constant dense<0x7F800000> : vector<256xf32>
    %56 = vector.multi_reduction <minimumf>, %53, %cst_23 [0] : vector<256x256xf32> to vector<256xf32>
    %57 = vector.shape_cast %56 : vector<256xf32> to vector<1x256xf32>
    %58 = vector.broadcast %57 : vector<1x256xf32> to vector<256x256xf32>
    %59 = arith.cmpf oeq, %53, %58 : vector<256x256xf32>
    %c256_i32_24 = arith.constant 256 : i32
    %60 = vector.broadcast %c256_i32_24 : i32 to vector<256x256xi32>
    %61 = arith.select %59, %13, %60 : vector<256x256xi1>, vector<256x256xi32>
    %cst_25 = arith.constant dense<2147483647> : vector<256xi32>
    %62 = vector.multi_reduction <minsi>, %61, %cst_25 [0] : vector<256x256xi32> to vector<256xi32>
    %63 = vector.shape_cast %62 : vector<256xi32> to vector<1x256xi32>
    %64 = vector.broadcast %63 : vector<1x256xi32> to vector<256x256xi32>
    %65 = arith.cmpi eq, %13, %64 : vector<256x256xi32>
    %66 = arith.extui %65 : vector<256x256xi1> to vector<256x256xi32>
    %67 = arith.sitofp %66 : vector<256x256xi32> to vector<256x256xf32>
    %68 = tpu.concatenate %27, %41, %55, %67 in 1 : vector<256x256xf32>, vector<256x256xf32>, vector<256x256xf32>, vector<256x256xf32> -> vector<256x1024xf32>
    %cst_26 = arith.constant dense<0.000000e+00> : vector<4x1024xf32>
    %69 = tpu.matmul %7, %68, %cst_26 {dimension_numbers = #tpu.dot_dimension_numbers<[1], [0], [0], [1], [0, 0, 1, 1], [], []>} : vector<4x256xf32>, vector<256x1024xf32>, vector<4x1024xf32> -> vector<4x1024xf32>
    %70 = vector.extract_strided_slice %69 {offsets = [0, 0], sizes = [4, 256], strides = [1, 1]} : vector<4x1024xf32> to vector<4x256xf32>
    %71 = vector.extract_strided_slice %69 {offsets = [0, 256], sizes = [4, 256], strides = [1, 1]} : vector<4x1024xf32> to vector<4x256xf32>
    %72 = vector.extract_strided_slice %69 {offsets = [0, 512], sizes = [4, 256], strides = [1, 1]} : vector<4x1024xf32> to vector<4x256xf32>
    %73 = vector.extract_strided_slice %69 {offsets = [0, 768], sizes = [4, 256], strides = [1, 1]} : vector<4x1024xf32> to vector<4x256xf32>
    %cst_27 = arith.constant -1.000000e+00 : f32
    %74 = vector.broadcast %cst_27 : f32 to vector<1x256xf32>
    %75 = arith.mulf %74, %15 : vector<1x256xf32>
    %cst_28 = arith.constant -1.000000e+00 : f32
    %76 = vector.broadcast %cst_28 : f32 to vector<1x256xf32>
    %77 = arith.mulf %76, %29 : vector<1x256xf32>
    %cst_29 = arith.constant -1.000000e+00 : f32
    %78 = vector.broadcast %cst_29 : f32 to vector<1x256xf32>
    %79 = arith.mulf %78, %43 : vector<1x256xf32>
    %cst_30 = arith.constant -1.000000e+00 : f32
    %80 = vector.broadcast %cst_30 : f32 to vector<1x256xf32>
    %81 = arith.mulf %80, %57 : vector<1x256xf32>
    %82 = arith.maximumf %75, %77 : vector<1x256xf32>
    %83 = arith.maximumf %82, %79 : vector<1x256xf32>
    %84 = arith.maximumf %83, %81 : vector<1x256xf32>
    %85 = arith.subf %75, %84 : vector<1x256xf32>
    %86 = math.exp %85 : vector<1x256xf32>
    %87 = arith.subf %77, %84 : vector<1x256xf32>
    %88 = math.exp %87 : vector<1x256xf32>
    %89 = arith.subf %79, %84 : vector<1x256xf32>
    %90 = math.exp %89 : vector<1x256xf32>
    %91 = arith.subf %81, %84 : vector<1x256xf32>
    %92 = math.exp %91 : vector<1x256xf32>
    %93 = arith.addf %86, %88 : vector<1x256xf32>
    %94 = arith.addf %93, %90 : vector<1x256xf32>
    %95 = arith.addf %94, %92 : vector<1x256xf32>
    %96 = tpu.reciprocal %95 {approx = true} : vector<1x256xf32> -> vector<1x256xf32>
    %97 = arith.mulf %86, %96 : vector<1x256xf32>
    %98 = vector.broadcast %97 : vector<1x256xf32> to vector<4x256xf32>
    %99 = arith.mulf %98, %70 : vector<4x256xf32>
    %100 = arith.mulf %88, %96 : vector<1x256xf32>
    %101 = vector.broadcast %100 : vector<1x256xf32> to vector<4x256xf32>
    %102 = arith.mulf %101, %71 : vector<4x256xf32>
    %103 = arith.addf %99, %102 : vector<4x256xf32>
    %104 = arith.mulf %90, %96 : vector<1x256xf32>
    %105 = vector.broadcast %104 : vector<1x256xf32> to vector<4x256xf32>
    %106 = arith.mulf %105, %72 : vector<4x256xf32>
    %107 = arith.addf %103, %106 : vector<4x256xf32>
    %108 = arith.mulf %92, %96 : vector<1x256xf32>
    %109 = vector.broadcast %108 : vector<1x256xf32> to vector<4x256xf32>
    %110 = arith.mulf %109, %73 : vector<4x256xf32>
    %111 = arith.addf %107, %110 : vector<4x256xf32>
    %c0_31 = arith.constant 0 : index
    %c0_32 = arith.constant 0 : index
    %c0_33 = arith.constant 0 : index
    %112 = vector.load %arg7[%c0_31, %c0_32, %c0_33] : memref<1x4x256xf32, #tpu.memory_space<vmem>>, vector<1x4x256xf32>
    %113 = vector.shape_cast %112 : vector<1x4x256xf32> to vector<4x256xf32>
    %114 = vector.shape_cast %111 : vector<4x256xf32> to vector<1x4x256xf32>
    tpu.vector_store %arg7[%c0_31, %c0_32, %c0_33], %114 {strides = array<i32>} : memref<1x4x256xf32, #tpu.memory_space<vmem>>, vector<1x4x256xf32>,
    return
  }
  func.func @transform_0(%arg0: i32, %arg1: i32, %arg2: i32) -> (i32, i32, i32) {
    %c0_i32 = arith.constant 0 : i32
    %c0_i32_0 = arith.constant 0 : i32
    return %arg0, %arg1, %c0_i32 : i32, i32, i32
  }
  func.func @transform_1(%arg0: i32, %arg1: i32, %arg2: i32) -> (i32, i32, i32) {
    %c0_i32 = arith.constant 0 : i32
    %c0_i32_0 = arith.constant 0 : i32
    return %arg0, %arg2, %c0_i32 : i32, i32, i32
  }
  func.func @transform_2(%arg0: i32, %arg1: i32, %arg2: i32) -> (i32, i32, i32) {
    %c0_i32 = arith.constant 0 : i32
    %c0_i32_0 = arith.constant 0 : i32
    return %arg0, %arg2, %c0_i32 : i32, i32, i32
  }
  func.func @transform_3(%arg0: i32, %arg1: i32, %arg2: i32) -> (i32, i32, i32) {
    %c0_i32 = arith.constant 0 : i32
    %c0_i32_0 = arith.constant 0 : i32
    return %arg0, %c0_i32, %arg2 : i32, i32, i32
  }
  func.func @transform_4(%arg0: i32, %arg1: i32, %arg2: i32) -> (i32, i32, i32) {
    %c0_i32 = arith.constant 0 : i32
    %c0_i32_0 = arith.constant 0 : i32
    return %arg0, %c0_i32, %arg1 : i32, i32, i32
  }
}

</mosaic_0001>

<bundles_post_ra>
// kernel: tpu_custom_call.1
= control target key start
LH: loop header
LB: loop body
LE: loop exit
PB: predicated region body
PF: predicated region fallthrough
CT: control target
= control target key end

     0   :  { %9 = vsyncpa [#allocation3], 0  ;;  %s9761_s0 = inlined_call_operand.vmem [shape: bf16[2,256,36], index: 0, kind: input, shape index: {}]   ;;  %s9762_s1 = inlined_call_operand.vmem [shape: bf16[2,256,36], index: 1, kind: input, shape index: {}]   ;;  %s9763_s2 = inlined_call_operand.vmem [shape: f32[2,256,1], index: 2, kind: input, shape index: {}]   ;;  %s9764_s3 = inlined_call_operand.vmem [shape: f32[2,4,256], index: 3, kind: input, shape index: {}]   ;;  %s9765_s4 = inlined_call_operand.hbm [shape: f32[2,4,256], index: 4, kind: output, shape index: {}]  }
   0x1   :  { %11 = vsyncpa [#allocation3 + $0x1], 0  ;;  %s5175_s15 = smov 0   ;;  %s5177_s16 = smov 0  }
   0x2   :  { %s5179_s17 = smov 0   ;;  %s5181_s18 = smov 0  }
   0x3   :  { %s5183_s19 = smov 0   ;;  %s5185_s20 = smov 0  }
   0x4 LB: > { %s4057_s21 = sadd.s32 4294967295, %s5145_s20   ;;  %s4058_s22 = sadd.s32 4294967294, %s5145_s20   ;;  %s5145_s20 = sphi %s5185_s20, %s17_s20   ;;  %s5141_s19 = sphi %s5183_s19, %s11152_s19   ;;  %s5137_s18 = sphi %s5181_s18, %s11151_s18   ;;  %s5133_s17 = sphi %s5179_s17, %s11150_s17   ;;  %s5129_s16 = sphi %s5177_s16, %s11149_s16   ;;  %s5125_s15 = sphi %s5175_s15, %s11148_s15  }
   0x5   : > { %s36_s23 = sadd.s32 1, %s5141_s19  ;;  %s157_s24 = sadd.s32 1, %s5133_s17 }
   0x6   : > { %p38_p0 = scmp.ge.s32.totalorder %s36_s23, 2  ;;  %p167_p1 = scmp.ne.s32.totalorder %s5133_s17, %s5129_s16 }
   0x7   : > { %p168_p2 = scmp.eq.s32.totalorder %s4057_s21, 1  ;;  %p173_p3 = scmp.ne.s32.totalorder %s5129_s16, %s5125_s15 }
   0x8   : > { %s11154_s23 = smov (%p38_p0, %s36_s23), 0  ;;  %p174_p5 = scmp.eq.s32.totalorder %s4058_s22, 1 }
   0x9   : > { %p5215_p4 = por %p168_p2, %p167_p1  ;;  %s152_s26 = ssub.s32 %s5141_s19, %s11154_s23 }
   0xa   : > { %p4061_p6 = scmp.ge.s32.totalorder %s5145_s20, 1  ;;  %p155_p7 = scmp.eq.s32.totalorder %s152_s26, 0 }
   0xb   : > { %p5222_p8 = por %p174_p5, %p173_p3  ;;  %p244_p9 = scmp.lt.s32.totalorder %s5145_s20, 3 }
   0xc   : > { %s5228_s28 = scalar_select %p155_p7, %s5133_s17, %s157_s24  }
   0xd   : > { %p245_p10 = pnand %p4061_p6, %p244_p9 }
   0xf   : > { %248 = sbr.rel (%p245_p10) target bundleno = 1237 (0x4d5), region = 36 }
  0x16   : > { %p302_p11 = scmp.lt.s32.totalorder %s5137_s18, 1  ;;  %vm600_vm0 = vcmask 293888   ;;  %v5147_v11 = vmov 0   ;;  %s4640_s5 = sshll.u32 %s5137_s18, 7 }
  0x17   : > { %5010 = vset.pattern.permute.xlu0 %v5147_v11  ;;  %5011 = vset.pattern.permute.xlu1 %v5147_v11 }
  0x18   : > { %s5232_s29 = scalar_select %p302_p11, %s5137_s18, 1 }
  0x19   : > { %s5149_s18 = smov [#allocation2]  }
  0x1a   : > { %s4636_s30 = sshll.u32 %s5232_s29, 7  ;;  %s4638_s11 = sshll.u32 %s5232_s29, 8 }
  0x1b   : > { %s5238_s7 = scalar_lea.vmem %s9761_s0, %s4636_s30  ;;  %s5254_s10 = scalar_lea.vmem %s9762_s1, %s4636_s30 }
  0x1c   : > { %v5012_v0 = vld [vmem:[%s5238_s7 + $0x40] sm:$0xff]   ;;  %v5014_v2 = vld [vmem:[%s5238_s7 + $0x48] sm:$0xff]   ;;  %v5016_v6 = vld [vmem:[%s5238_s7 + $0x50] sm:$0xff]   ;;  %s5269_s14 = scalar_lea.vmem %s9763_s2, %s4638_s11  ;;  %s4639_s21 = sshll.u32 %s5232_s29, 3 }
  0x1d   : > { %v5013_v1 = vld [vmem:[%s5238_s7] sm:$0xff]   ;;  %4945 = vmatprep.subr.msk.bf16.mxu0 %vm600_vm0, %v5012_v0  ;;  %v5015_v4 = vld [vmem:[%s5238_s7 + $0x8] sm:$0xff]   ;;  %v5017_v7 = vld [vmem:[%s5238_s7 + $0x10] sm:$0xff]   ;;  %s6721_s26 = scalar_lea.vmem %s9764_s3, %s4639_s21  ;;  %s298_s29 = sand.u32 1, %s5129_s16  }
  0x1e   : > { %v650_v3 = vsel %vm600_vm0, %v5013_v1, 0  ;;  %v653_v5 = vsel %vm600_vm0, %v5015_v4, 0  ;;  %v5257_v8 = vld [vmem:[%s5254_s10] sm:$0xff]   ;;  %v656_v9 = vsel %vm600_vm0, %v5017_v7, 0  ;;  %v5018_v10 = vld [vmem:[%s5238_s7 + $0x58] sm:$0xff]   ;;  %v409_v17 = vld [vmem:[%s5269_s14 + $0x10] sm:$0xff] }
  0x1f   : > { %4642 = vmatpush3.bf16.xpose.msra.mxu0 %v650_v3  ;;  %4657 = vmatprep.mubr.msk.bf16.mxu0 %vm600_vm0, %v5257_v8  ;;  %v5019_v12 = vld [vmem:[%s5238_s7 + $0x18] sm:$0xff]   ;;  %v5020_v14 = vld [vmem:[%s5238_s7 + $0x60] sm:$0xff]   ;;  %v408_v18 = vld [vmem:[%s5269_s14 + $0x8] sm:$0xff]  ;;  %s4062_s30 = sshll.u32 %s298_s29, 3  ;;  %s3908_s11 = scalar_lea.sflag [#allocation3], %s298_s29 }
  0x20   : > { %4946 = vmatprep.subr.msk.bf16.mxu0 %vm600_vm0, %v5014_v2  ;;  %v659_v13 = vsel %vm600_vm0, %v5019_v12, 0  ;;  %v407_v15 = vld [vmem:[%s5269_s14] sm:$0xff]  ;;  %966 = vperm.xlu1 %5011, %v409_v17   ;;  %v410_v19 = vld [vmem:[%s5269_s14 + $0x18] sm:$0xff]  ;;  %v5022_v21 = vld [vmem:[%s5238_s7 + $0x68] sm:$0xff]   ;;  %s300_s6 = scalar_lea.vmem [#allocation2], %s4062_s30  ;;  %s5071_s13 = sshll.u32 %s5149_s18, 4  ;;  %s5072_s13 = int_to_ptr.vmem [resolvable:$false] %s5071_s13 }
  0x21   : > { %v5021_v16 = vld [vmem:[%s5238_s7 + $0x20] sm:$0xff]   ;;  %956 = vperm.xlu0 %5010, %v407_v15   ;;  %v412_v22 = vld [vmem:[%s5269_s14 + $0x28] sm:$0xff]  ;;  %v413_v25 = vld [vmem:[%s5269_s14 + $0x30] sm:$0xff] }
  0x22   : > { %v662_v20 = vsel %vm600_vm0, %v5021_v16, 0  ;;  %v411_v23 = vld [vmem:[%s5269_s14 + $0x20] sm:$0xff]  ;;  %v5023_v24 = vld [vmem:[%s5238_s7 + $0x28] sm:$0xff]   ;;  %v414_v26 = vld [vmem:[%s5269_s14 + $0x38] sm:$0xff] }
  0x23   : > { %v665_v27 = vsel %vm600_vm0, %v5023_v24, 0  ;;  %v5024_v28 = vld [vmem:[%s5238_s7 + $0x70] sm:$0xff]   ;;  %v416_v29 = vld [vmem:[%s5269_s14 + $0x48] sm:$0xff]  ;;  %v415_v30 = vld [vmem:[%s5269_s14 + $0x40] sm:$0xff] }
  0x24   : > { %971 = vperm.xlu1 %5011, %v410_v19   ;;  %v5025_v31 = vld [vmem:[%s5238_s7 + $0x30] sm:$0xff]   ;;  %v418_v33 = vld [vmem:[%s5269_s14 + $0x58] sm:$0xff]  ;;  %v420_v36 = vld [vmem:[%s5269_s14 + $0x68] sm:$0xff] }
  0x25   : > { %961 = vperm.xlu0 %5010, %v408_v18   ;;  %v417_v32 = vld [vmem:[%s5269_s14 + $0x50] sm:$0xff]  ;;  %v668_v34 = vsel %vm600_vm0, %v5025_v31, 0  ;;  %v5026_v35 = vld [vmem:[%s5238_s7 + $0x78] sm:$0xff]   ;;  %v419_v37 = vld [vmem:[%s5269_s14 + $0x60] sm:$0xff] }
  0x26   : > { %v5027_v38 = vld [vmem:[%s5238_s7 + $0x38] sm:$0xff]   ;;  %v421_v39 = vld [vmem:[%s5269_s14 + $0x70] sm:$0xff]  ;;  %v424_v42 = vld [vmem:[%s5269_s14 + $0x88] sm:$0xff]  ;;  %s3924_s7 = sshll.u32 %s300_s6, 4  ;;  %s9716_s7 = int_to_ptr.vmem [resolvable:$true] %s3924_s7 }
  0x27   : > { %4644 = vmatpush3.bf16.xpose.msra.mxu0 %v653_v5  ;;  %v422_v40 = vld [vmem:[%s5269_s14 + $0x78] sm:$0xff]  ;;  %v671_v41 = vsel %vm600_vm0, %v5027_v38, 0  ;;  %v423_v43 = vld [vmem:[%s5269_s14 + $0x80] sm:$0xff]  ;;  %v425_v44 = vld [vmem:[%s5269_s14 + $0x90] sm:$0xff]  ;;  %s5067_s12 = scalar_lea.vmem %s9716_s7, 128  ;;  %p5074_p1 = scmp.lt.s32.totalorder %s9716_s7, %s5072_s13 }
  0x28   : > { %4947 = vmatprep.subr.msk.bf16.mxu0 %vm600_vm0, %v5016_v6  ;;  %981 = vperm.xlu1 %5011, %v412_v22   ;;  %v426_v45 = vld [vmem:[%s5269_s14 + $0x98] sm:$0xff]  ;;  %v5029_v46 = vld [vmem:[%s5254_s10 + $0x8] sm:$0xff]   ;;  %v427_v47 = vld [vmem:[%s5269_s14 + $0xa0] sm:$0xff]  ;;  %p5068_p12 = scmp.ne.s32.totalorder %s9716_s7, %s5067_s12 }
  0x29   : > { %976 = vperm.xlu0 %5010, %v411_v23   ;;  %v428_v48 = vld [vmem:[%s5269_s14 + $0xa8] sm:$0xff]  ;;  %v429_v49 = vld [vmem:[%s5269_s14 + $0xb0] sm:$0xff]  ;;  %v430_v50 = vld [vmem:[%s5269_s14 + $0xb8] sm:$0xff] }
  0x2a   : > { %v5030_v51 = vld [vmem:[%s5254_s10 + $0x10] sm:$0xff]   ;;  %v431_v52 = vld [vmem:[%s5269_s14 + $0xc0] sm:$0xff]  ;;  %v432_v53 = vld [vmem:[%s5269_s14 + $0xc8] sm:$0xff]  ;;  %p5069_p13 = pnand %p5068_p12, %p5215_p4 }
  0x2b   : > { %v433_v54 = vld [vmem:[%s5269_s14 + $0xd0] sm:$0xff]  ;;  %v434_v55 = vld [vmem:[%s5269_s14 + $0xd8] sm:$0xff]  ;;  %v435_v57 = vld [vmem:[%s5269_s14 + $0xe0] sm:$0xff] }
  0x2c   : > { %991 = vperm.xlu1 %5011, %v414_v26   ;;  %v5031_v56 = vld [vmem:[%s5254_s10 + $0x18] sm:$0xff]   ;;  %v436_v58 = vld [vmem:[%s5269_s14 + $0xe8] sm:$0xff]  ;;  %v437_v59 = vld [vmem:[%s5269_s14 + $0xf0] sm:$0xff]  ;;  %p5070_p0 = pneg %p5069_p13 }
  0x2d   : > { %986 = vperm.xlu0 %5010, %v413_v25   ;;  %v438_v60 = vld [vmem:[%s5269_s14 + $0xf8] sm:$0xff]  ;;  %v5032_v61 = vld [vmem:[%s5254_s10 + $0x20] sm:$0xff]   ;;  %v5033_v62 = vld [vmem:[%s5254_s10 + $0x28] sm:$0xff]   ;;  %s5073_s14 = scalar_lea.vmem %s5072_s13, 256 }
  0x2e   : > { %v5034_v63 = vld [vmem:[%s5254_s10 + $0x30] sm:$0xff]   ;;  %v5035_v0 = vld [vmem:[%s5254_s10 + $0x38] sm:$0xff]   ;;  %v5036_v1 = vld [vmem:[%s5254_s10 + $0x40] sm:$0xff]   ;;  %p5075_p2 = scmp.lt.s32.totalorder %s5073_s14, %s5067_s12 }
  0x2f   : > { %4646 = vmatpush3.bf16.xpose.msra.mxu0 %v656_v9  ;;  %v5037_v2 = vld [vmem:[%s5254_s10 + $0x48] sm:$0xff]   ;;  %v5038_v3 = vld [vmem:[%s5254_s10 + $0x50] sm:$0xff]   ;;  %v5039_v4 = vld [vmem:[%s5254_s10 + $0x58] sm:$0xff]  }
  0x30   : > { %4948 = vmatprep.subr.msk.bf16.mxu0 %vm600_vm0, %v5018_v10  ;;  %1001 = vperm.xlu1 %5011, %v416_v29   ;;  %v5040_v5 = vld [vmem:[%s5254_s10 + $0x60] sm:$0xff]   ;;  %v5041_v6 = vld [vmem:[%s5254_s10 + $0x68] sm:$0xff]   ;;  %v5042_v7 = vld [vmem:[%s5254_s10 + $0x70] sm:$0xff]   ;;  %p5076_p3 = por %p5075_p2, %p5074_p1 }
  0x31   : > { %996 = vperm.xlu0 %5010, %v415_v30  }
  0x32   : > { %p5077_p5 = pnand %p5076_p3, %p5070_p0 }
  0x34   : > { %1011 = vperm.xlu1 %5011, %v418_v33  }
  0x35   : > { %1006 = vperm.xlu0 %5010, %v417_v32  }
  0x37   : > { %4648 = vmatpush3.bf16.xpose.msra.mxu0 %v659_v13 }
  0x38   : > { %4949 = vmatprep.subr.msk.bf16.mxu0 %vm600_vm0, %v5020_v14  ;;  %1021 = vperm.xlu1 %5011, %v420_v36  }
  0x39   : > { %1016 = vperm.xlu0 %5010, %v419_v37  }
  0x3c   : > { %1031 = vperm.xlu1 %5011, %v422_v40  }
  0x3d   : > { %1026 = vperm.xlu0 %5010, %v421_v39  }
  0x3f   : > { %4650 = vmatpush3.bf16.xpose.msra.mxu0 %v662_v20 }
  0x40   : > { %4950 = vmatprep.subr.msk.bf16.mxu0 %vm600_vm0, %v5022_v21  ;;  %1041 = vperm.xlu1 %5011, %v424_v42  }
  0x41   : > { %1036 = vperm.xlu0 %5010, %v423_v43  }
  0x44   : > { %1051 = vperm.xlu1 %5011, %v426_v45  }
  0x45   : > { %1046 = vperm.xlu0 %5010, %v425_v44  }
  0x47   : > { %4652 = vmatpush3.bf16.xpose.msra.mxu0 %v665_v27 }
  0x48   : > { %4951 = vmatprep.subr.msk.bf16.mxu0 %vm600_vm0, %v5024_v28  ;;  %1061 = vperm.xlu1 %5011, %v428_v48  }
  0x49   : > { %1056 = vperm.xlu0 %5010, %v427_v47  }
  0x4c   : > { %1071 = vperm.xlu1 %5011, %v430_v50  }
  0x4d   : > { %1066 = vperm.xlu0 %5010, %v429_v49  }
  0x4f   : > { %4654 = vmatpush3.bf16.xpose.msra.mxu0 %v668_v34 }
  0x50   : > { %4952 = vmatprep.subr.msk.bf16.mxu0 %vm600_vm0, %v5026_v35  ;;  %1081 = vperm.xlu1 %5011, %v432_v53  }
  0x51   : > { %1076 = vperm.xlu0 %5010, %v431_v52  }
  0x54   : > { %1091 = vperm.xlu1 %5011, %v434_v55  }
  0x55   : > { %1086 = vperm.xlu0 %5010, %v433_v54  }
  0x57   : > { %4656 = vmatpush3.bf16.xpose.msra.mxu0 %v671_v41 }
  0x58   : > { %1101 = vperm.xlu1 %5011, %v436_v58  }
  0x59   : > { %1096 = vperm.xlu0 %5010, %v435_v57  }
  0x5c   : > { %1111 = vperm.xlu1 %5011, %v438_v60  }
  0x5d   : > { %1106 = vperm.xlu0 %5010, %v437_v59  }
  0x5e   : > { %4658 = vmatmul.mubr.msk.bf16.vlgmr.msra.gmra.mrb[0].mxu0 %vm600_vm0, %v5257_v8  ;;  %v5043_v8 = vld [vmem:[%s5254_s10 + $0x78] sm:$0xff]   ;;  %s9714_s10 = scalar_lea.hbm %s9765_s4, %s4640_s5 }
  0x5f   : > { %4659 = vmatprep.mubr.msk.bf16.mxu0 %vm600_vm0, %v5029_v46 }
  0x66   : > { %4660 = vmatmul.mubr.msk.bf16.gmra.mrb[4].mxu0 %vm600_vm0, %v5029_v46 }
  0x67   : > { %4661 = vmatprep.mubr.msk.bf16.mxu0 %vm600_vm0, %v5030_v51 }
  0x6e   : > { %4662 = vmatmul.mubr.msk.bf16.gmra.mrb[8].mxu0 %vm600_vm0, %v5030_v51 }
  0x6f   : > { %4663 = vmatprep.mubr.msk.bf16.mxu0 %vm600_vm0, %v5031_v56 }
  0x76   : > { %4664 = vmatmul.mubr.msk.bf16.gmra.mrb[12].mxu0 %vm600_vm0, %v5031_v56 }
  0x77   : > { %4665 = vmatprep.mubr.msk.bf16.mxu0 %vm600_vm0, %v5032_v61 }
  0x7e   : > { %4666 = vmatmul.mubr.msk.bf16.gmra.mrb[16].mxu0 %vm600_vm0, %v5032_v61 }
  0x7f   : > { %4667 = vmatprep.mubr.msk.bf16.mxu0 %vm600_vm0, %v5033_v62 }
  0x86   : > { %4668 = vmatmul.mubr.msk.bf16.gmra.mrb[20].mxu0 %vm600_vm0, %v5033_v62 }
  0x87   : > { %4669 = vmatprep.mubr.msk.bf16.mxu0 %vm600_vm0, %v5034_v63 }
  0x8e   : > { %4670 = vmatmul.mubr.msk.bf16.gmra.mrb[24].mxu0 %vm600_vm0, %v5034_v63 }
  0x8f   : > { %4671 = vmatprep.mubr.msk.bf16.mxu0 %vm600_vm0, %v5035_v0 }
  0x96   : > { %4672 = vmatmul.mubr.msk.bf16.gmra.mrb[28].mxu0 %vm600_vm0, %v5035_v0 }
  0x97   : > { %4673 = vmatprep.mubr.msk.bf16.mxu0 %vm600_vm0, %v5036_v1 }
  0x9e   : > { %4674 = vmatmul.mubr.msk.bf16.gmra.mrb[32].mxu0 %vm600_vm0, %v5036_v1 }
  0x9f   : > { %4675 = vmatprep.mubr.msk.bf16.mxu0 %vm600_vm0, %v5037_v2  ;;  %v967_v28 = vpop.permute.xlu1 %966 }
  0xa0   : > { %v957_v26 = vpop.permute.xlu0 %956 }
  0xa3   : > { %v972_v32 = vpop.permute.xlu1 %971 }
  0xa4   : > { %v962_v31 = vpop.permute.xlu0 %961 }
  0xa6   : > { %4676 = vmatmul.mubr.msk.bf16.gmra.mrb[36].mxu0 %vm600_vm0, %v5037_v2 }
  0xa7   : > { %4677 = vmatprep.mubr.msk.bf16.mxu0 %vm600_vm0, %v5038_v3  ;;  %v982_v38 = vpop.permute.xlu1 %981 }
  0xa8   : > { %v977_v37 = vpop.permute.xlu0 %976 }
  0xab   : > { %v5405_v44 = vpop.permute.xlu1 %991 }
  0xac   : > { %v5399_v41 = vpop.permute.xlu0 %986 }
  0xae   : > { %4678 = vmatmul.mubr.msk.bf16.gmra.mrb[40].mxu0 %vm600_vm0, %v5038_v3 }
  0xaf   : > { %4679 = vmatprep.mubr.msk.bf16.mxu0 %vm600_vm0, %v5039_v4  ;;  %v5413_v48 = vpop.permute.xlu1 %1001 }
  0xb0   : > { %v5407_v45 = vpop.permute.xlu0 %996 }
  0xb3   : > { %v5421_v52 = vpop.permute.xlu1 %1011 }
  0xb4   : > { %v5419_v51 = vpop.permute.xlu0 %1006 }
  0xb6   : > { %4680 = vmatmul.mubr.msk.bf16.gmra.mrb[44].mxu0 %vm600_vm0, %v5039_v4 }
  0xb7   : > { %4681 = vmatprep.mubr.msk.bf16.mxu0 %vm600_vm0, %v5040_v5  ;;  %v5433_v58 = vpop.permute.xlu1 %1021 }
  0xb8   : > { %v5431_v57 = vpop.permute.xlu0 %1016 }
  0xbb   : > { %v5445_v0 = vpop.permute.xlu1 %1031 }
  0xbc   : > { %v5439_v61 = vpop.permute.xlu0 %1026  ;;  %10314 = vst [vmem:[#allocation11_spill] sm:$0xff] %v5445_v0 }
  0xbe   : > { %4682 = vmatmul.mubr.msk.bf16.gmra.mrb[48].mxu0 %vm600_vm0, %v5040_v5 }
  0xbf   : > { %4683 = vmatprep.mubr.msk.bf16.mxu0 %vm600_vm0, %v5041_v6 }
  0xc6   : > { %4684 = vmatmul.mubr.msk.bf16.gmra.mrb[52].mxu0 %vm600_vm0, %v5041_v6 }
  0xc7   : > { %4685 = vmatprep.mubr.msk.bf16.mxu0 %vm600_vm0, %v5042_v7 }
  0xce   : > { %4686 = vmatmul.mubr.msk.bf16.gmra.mrb[56].mxu0 %vm600_vm0, %v5042_v7  ;;  %v5447_v7 = vpop.permute.xlu0 %1036 }
  0xcf   : > { %4687 = vmatprep.mubr.msk.bf16.mxu0 %vm600_vm0, %v5043_v8 }
  0xd6   : > { %4688 = vmatmul.mubr.msk.bf16.gmra.mrb[60].mxu0 %vm600_vm0, %v5043_v8 }
 0x131   : > { %v731_v9 = vpop.f32.mrb[0].mxu0 }
 0x132   : > { %v733_v10 = vpop.f32.mrb[1].mxu0  ;;  %v890_v3 = vmul.f32 2.0, %v731_v9 }
 0x133   : > { %v735_v11 = vpop.f32.mrb[2].mxu0  ;;  %v891_v4 = vmul.f32 2.0, %v733_v10 }
 0x134   : > { %v5367_v12 = vpop.f32.mrb[3].mxu0 }
 0x139   : > { %v741_v13 = vpop.f32.mrb[4].mxu0 }
 0x13a   : > { %v743_v14 = vpop.f32.mrb[5].mxu0  ;;  %v894_v1 = vmul.f32 2.0, %v741_v13  ;;  %v5456_v13 = vpop.permute.xlu1 %1041 }
 0x13b   : > { %v745_v15 = vpop.f32.mrb[6].mxu0  ;;  %v895_v2 = vmul.f32 2.0, %v743_v14 }
 0x13c   : > { %v747_v16 = vpop.f32.mrb[7].mxu0  ;;  %v896_v5 = vmul.f32 2.0, %v745_v15 }
 0x13d   : > { %v897_v6 = vmul.f32 2.0, %v747_v16  ;;  %v5460_v10 = vsub.f32 %v967_v28, %v895_v2  ;;  %v5467_v16 = vsub.f32 %v957_v26, %v891_v4  ;;  %v5487_v4 = vpop.permute.xlu0 %1046 }
 0x13f   : > { %10316 = vst [vmem:[#allocation13_spill] sm:$0xff] %v5460_v10  ;;  %10318 = vst [vmem:[#allocation15_spill] sm:$0xff] %v5467_v16 }
 0x141   : > { %v751_v17 = vpop.f32.mrb[8].mxu0 }
 0x142   : > { %v753_v18 = vpop.f32.mrb[9].mxu0 }
 0x143   : > { %v755_v19 = vpop.f32.mrb[10].mxu0 }
 0x144   : > { %v5369_v20 = vpop.f32.mrb[11].mxu0  ;;  %v900_v0 = vmul.f32 2.0, %v755_v19 }
 0x145   : > { %v901_v14 = vmul.f32 2.0, %v5369_v20 }
 0x149   : > { %v5371_v21 = vpop.f32.mrb[12].mxu0 }
 0x14a   : > { %v5373_v22 = vpop.f32.mrb[13].mxu0 }
 0x14b   : > { %v5375_v23 = vpop.f32.mrb[14].mxu0 }
 0x14c   : > { %v5377_v24 = vpop.f32.mrb[15].mxu0 }
 0x151   : > { %v5379_v25 = vpop.f32.mrb[16].mxu0 }
 0x152   : > { %v5381_v27 = vpop.f32.mrb[17].mxu0 }
 0x153   : > { %v5383_v29 = vpop.f32.mrb[18].mxu0 }
 0x154   : > { %v5385_v30 = vpop.f32.mrb[19].mxu0 }
 0x159   : > { %v5387_v33 = vpop.f32.mrb[20].mxu0 }
 0x15a   : > { %v5389_v34 = vpop.f32.mrb[21].mxu0 }
 0x15b   : > { %v5391_v35 = vpop.f32.mrb[22].mxu0 }
 0x15c   : > { %v5393_v36 = vpop.f32.mrb[23].mxu0 }
 0x161   : > { %v5395_v39 = vpop.f32.mrb[24].mxu0 }
 0x162   : > { %v5397_v40 = vpop.f32.mrb[25].mxu0 }
 0x163   : > { %v5401_v42 = vpop.f32.mrb[26].mxu0 }
 0x164   : > { %v5403_v43 = vpop.f32.mrb[27].mxu0 }
 0x169   : > { %v5409_v46 = vpop.f32.mrb[28].mxu0 }
 0x16a   : > { %v5411_v47 = vpop.f32.mrb[29].mxu0 }
 0x16b   : > { %v5415_v49 = vpop.f32.mrb[30].mxu0 }
 0x16c   : > { %v5417_v50 = vpop.f32.mrb[31].mxu0 }
 0x171   : > { %v5423_v53 = vpop.f32.mrb[32].mxu0 }
 0x172   : > { %v5425_v54 = vpop.f32.mrb[33].mxu0 }
 0x173   : > { %v5427_v55 = vpop.f32.mrb[34].mxu0 }
 0x174   : > { %10308 = vst [vmem:[#allocation5_spill] sm:$0xff] %v5427_v55  ;;  %v5429_v56 = vpop.f32.mrb[35].mxu0 }
 0x175   : > { %10309 = vst [vmem:[#allocation6_spill] sm:$0xff] %v5429_v56  ;;  %v899_v56 = vmul.f32 2.0, %v753_v18 }
 0x179   : > { %v5435_v59 = vpop.f32.mrb[36].mxu0 }
 0x17a   : > { %10310 = vst [vmem:[#allocation7_spill] sm:$0xff] %v5435_v59  ;;  %v5437_v60 = vpop.f32.mrb[37].mxu0  ;;  %v892_v59 = vmul.f32 2.0, %v735_v11  ;;  %v5465_v11 = vsub.f32 %v957_v26, %v890_v3  ;;  %v5484_v3 = vsub.f32 %v982_v38, %v900_v0  ;;  %v903_v26 = vmul.f32 2.0, %v5373_v22 }
 0x17b   : > { %10311 = vst [vmem:[#allocation8_spill] sm:$0xff] %v5437_v60  ;;  %v5441_v62 = vpop.f32.mrb[38].mxu0  ;;  %v898_v60 = vmul.f32 2.0, %v751_v17  ;;  %v5469_v17 = vsub.f32 %v972_v32, %v896_v5  ;;  %v907_v22 = vmul.f32 2.0, %v5381_v27  ;;  %v908_v5 = vmul.f32 2.0, %v5383_v29 }
 0x17c   : > { %10312 = vst [vmem:[#allocation9_spill] sm:$0xff] %v5441_v62  ;;  %v5443_v63 = vpop.f32.mrb[39].mxu0  ;;  %v893_v62 = vmul.f32 2.0, %v5367_v12  ;;  %10317 = vst [vmem:[#allocation14_spill] sm:$0xff] %v5465_v11  ;;  %v5471_v12 = vsub.f32 %v972_v32, %v897_v6  ;;  %v5473_v18 = vsub.f32 %v962_v31, %v892_v59  ;;  %v1248_v32 = vmin.f32 %v5467_v16, %v5460_v10 }
 0x17d   : > { %10313 = vst [vmem:[#allocation10_spill] sm:$0xff] %v5443_v63  ;;  %v5454_v63 = vsub.f32 %v967_v28, %v894_v1  ;;  %10319 = vst [vmem:[#allocation16_spill] sm:$0xff] %v5469_v17  ;;  %v5475_v19 = vsub.f32 %v977_v37, %v898_v60  ;;  %v5477_v1 = vsub.f32 %v977_v37, %v899_v56  ;;  %v902_v28 = vmul.f32 2.0, %v5371_v21 }
 0x17e   : > { %10320 = vst [vmem:[#allocation17_spill] sm:$0xff] %v5471_v12  ;;  %10321 = vst [vmem:[#allocation18_spill] sm:$0xff] %v5473_v18  ;;  %v5480_v2 = vsub.f32 %v962_v31, %v893_v62  ;;  %v5491_v59 = vsub.f32 %v982_v38, %v901_v14  ;;  %v904_v37 = vmul.f32 2.0, %v5375_v23  ;;  %v905_v21 = vmul.f32 2.0, %v5377_v24  ;;  %v5501_v62 = vpop.permute.xlu1 %1051 }
 0x17f   : > { %10315 = vst [vmem:[#allocation12_spill] sm:$0xff] %v5454_v63  ;;  %10322 = vst [vmem:[#allocation19_spill] sm:$0xff] %v5475_v19  ;;  %v1211_v20 = vmin.f32 %v5465_v11, %v5454_v63  ;;  %v1212_v31 = vmin.f32 %v5473_v18, %v5469_v17  ;;  %v906_v60 = vmul.f32 2.0, %v5379_v25  ;;  %v1250_v23 = vmin.f32 %v1248_v32, %v5477_v1 }
 0x180   : > { %10323 = vst [vmem:[#allocation20_spill] sm:$0xff] %v5477_v1  ;;  %10324 = vst [vmem:[#allocation21_spill] sm:$0xff] %v5480_v2  ;;  %v1249_v56 = vmin.f32 %v5480_v2, %v5471_v12  ;;  %v5508_v24 = vsub.f32 %v5399_v41, %v902_v28  ;;  %v5515_v25 = vsub.f32 %v5399_v41, %v903_v26  ;;  %v909_v27 = vmul.f32 2.0, %v5385_v30 }
 0x181   : > { %v5449_v8 = vpop.f32.mrb[40].mxu0  ;;  %10325 = vst [vmem:[#allocation22_spill] sm:$0xff] %v5484_v3  ;;  %10326 = vst [vmem:[#allocation23_spill] sm:$0xff] %v5491_v59  ;;  %v1213_v38 = vmin.f32 %v1211_v20, %v5475_v19  ;;  %v1214_v14 = vmin.f32 %v1212_v31, %v5484_v3  ;;  %v910_v12 = vmul.f32 2.0, %v5387_v33  ;;  %v5523_v28 = vsub.f32 %v5405_v44, %v904_v37 }
 0x182   : > { %v5451_v55 = vpop.f32.mrb[41].mxu0  ;;  %10327 = vst [vmem:[#allocation24_spill] sm:$0xff] %v5515_v25  ;;  %v1251_v20 = vmin.f32 %v1249_v56, %v5491_v59  ;;  %v5526_v29 = vsub.f32 %v5405_v44, %v905_v21  ;;  %v911_v32 = vmul.f32 2.0, %v5389_v34  ;;  %v5532_v41 = vsub.f32 %v5407_v45, %v906_v60  ;;  %v5539_v56 = vpop.permute.xlu0 %1056 }
 0x183   : > { %v5458_v9 = vpop.f32.mrb[42].mxu0  ;;  %v5535_v30 = vsub.f32 %v5407_v45, %v907_v22  ;;  %v912_v33 = vmul.f32 2.0, %v5391_v35  ;;  %v913_v26 = vmul.f32 2.0, %v5393_v36  ;;  %v1215_v37 = vmin.f32 %v1213_v38, %v5508_v24  ;;  %v5554_v36 = vpop.permute.xlu1 %1061 }
 0x184   : > { %v5463_v15 = vpop.f32.mrb[43].mxu0  ;;  %10328 = vst [vmem:[#allocation25_spill] sm:$0xff] %v5526_v29  ;;  %v5543_v44 = vsub.f32 %v5413_v48, %v908_v5  ;;  %v914_v34 = vmul.f32 2.0, %v5395_v39  ;;  %v915_v21 = vmul.f32 2.0, %v5397_v40  ;;  %v1252_v60 = vmin.f32 %v1250_v23, %v5515_v25  ;;  %v10341_v25 = vld [vmem:[#allocation11_spill] sm:$0xff] }
 0x185   : > { %10329 = vst [vmem:[#allocation26_spill] sm:$0xff] %v5535_v30  ;;  %v5549_v45 = vsub.f32 %v5413_v48, %v909_v27  ;;  %v5552_v35 = vsub.f32 %v5419_v51, %v910_v12  ;;  %v916_v22 = vmul.f32 2.0, %v5401_v42  ;;  %v1216_v38 = vmin.f32 %v1214_v14, %v5523_v28 }
 0x186   : > { %v1253_v5 = vmin.f32 %v1251_v20, %v5526_v29  ;;  %v5560_v39 = vsub.f32 %v5419_v51, %v911_v32  ;;  %v917_v40 = vmul.f32 2.0, %v5403_v43  ;;  %v1217_v23 = vmin.f32 %v1215_v37, %v5532_v41  ;;  %v10340_v29 = vld [vmem:[#allocation7_spill] sm:$0xff] }
 0x187   : > { %10330 = vst [vmem:[#allocation27_spill] sm:$0xff] %v5549_v45  ;;  %v1254_v48 = vmin.f32 %v1252_v60, %v5535_v30  ;;  %v5566_v12 = vsub.f32 %v5421_v52, %v912_v33  ;;  %v5569_v27 = vsub.f32 %v5421_v52, %v913_v26  ;;  %v1218_v14 = vmin.f32 %v1216_v38, %v5543_v44  ;;  %v5585_v52 = vpop.permute.xlu0 %1066 }
 0x188   : > { %10331 = vst [vmem:[#allocation28_spill] sm:$0xff] %v5560_v39  ;;  %v5575_v20 = vsub.f32 %v5431_v57, %v914_v34  ;;  %v5578_v51 = vsub.f32 %v5431_v57, %v915_v21  ;;  %v918_v43 = vmul.f32 2.0, %v5409_v46  ;;  %v1255_v33 = vmin.f32 %v1253_v5, %v5549_v45  ;;  %v5603_v45 = vpop.permute.xlu1 %1071 }
 0x189   : > { %v5503_v0 = vpop.f32.mrb[44].mxu0  ;;  %10332 = vst [vmem:[#allocation29_spill] sm:$0xff] %v5569_v27  ;;  %v1219_v37 = vmin.f32 %v1217_v23, %v5552_v35  ;;  %v5588_v26 = vsub.f32 %v5433_v58, %v916_v22  ;;  %v919_v60 = vmul.f32 2.0, %v5411_v47  ;;  %v1256_v57 = vmin.f32 %v1254_v48, %v5560_v39 }
 0x18a   : > { %v5511_v6 = vpop.f32.mrb[45].mxu0  ;;  %10333 = vst [vmem:[#allocation30_spill] sm:$0xff] %v5578_v51  ;;  %v5595_v21 = vsub.f32 %v5433_v58, %v917_v40  ;;  %v920_v46 = vmul.f32 2.0, %v5415_v49  ;;  %v921_v38 = vmul.f32 2.0, %v5417_v50  ;;  %v1220_v23 = vmin.f32 %v1218_v14, %v5566_v12  ;;  %v10337_v50 = vld [vmem:[#allocation5_spill] sm:$0xff] }
 0x18b   : > { %v5519_v10 = vpop.f32.mrb[46].mxu0  ;;  %10334 = vst [vmem:[#allocation31_spill] sm:$0xff] %v5588_v26  ;;  %v1257_v22 = vmin.f32 %v1255_v33, %v5569_v27  ;;  %v922_v47 = vmul.f32 2.0, %v5423_v53  ;;  %v923_v30 = vmul.f32 2.0, %v5425_v54  ;;  %v1221_v48 = vmin.f32 %v1219_v37, %v5575_v20  ;;  %v10339_v33 = vld [vmem:[#allocation6_spill] sm:$0xff] }
 0x18c   : > { %v5529_v31 = vpop.f32.mrb[47].mxu0  ;;  %10335 = vst [vmem:[#allocation32_spill] sm:$0xff] %v5595_v21  ;;  %v1258_v58 = vmin.f32 %v1256_v57, %v5578_v51  ;;  %v5610_v49 = vsub.f32 %v5439_v61, %v918_v43  ;;  %v924_v40 = vmul.f32 2.0, %v10337_v50  ;;  %v1222_v39 = vmin.f32 %v1220_v23, %v5588_v26  ;;  %v10344_v43 = vld [vmem:[#allocation8_spill] sm:$0xff]  ;;  %v1077_v50 = vpop.permute.xlu0 %1076 }
 0x18d   : > { %v5615_v14 = vsub.f32 %v5439_v61, %v919_v60  ;;  %v925_v27 = vmul.f32 2.0, %v10339_v33  ;;  %v926_v53 = vmul.f32 2.0, %v10340_v29  ;;  %v1259_v54 = vmin.f32 %v1257_v22, %v5595_v21  ;;  %v10347_v60 = vld [vmem:[#allocation9_spill] sm:$0xff]  ;;  %v10348_v29 = vld [vmem:[#allocation10_spill] sm:$0xff] }
 0x18e   : > { %10336 = vst [vmem:[#allocation33_spill] sm:$0xff] %v5610_v49  ;;  %v5621_v37 = vsub.f32 %v10341_v25, %v920_v46  ;;  %v5624_v57 = vsub.f32 %v10341_v25, %v921_v38  ;;  %v927_v51 = vmul.f32 2.0, %v10344_v43  ;;  %v5628_v23 = vsub.f32 %v5447_v7, %v922_v47  ;;  %v1082_v47 = vpop.permute.xlu1 %1081 }
 0x18f   : > { %10338 = vst [vmem:[#allocation5_spill] sm:$0xff] %v5615_v14  ;;  %v5631_v61 = vsub.f32 %v5447_v7, %v923_v30  ;;  %v928_v33 = vmul.f32 2.0, %v10347_v60  ;;  %v929_v59 = vmul.f32 2.0, %v10348_v29  ;;  %v1223_v46 = vmin.f32 %v1221_v48, %v5610_v49 }
 0x190   : > { %10342 = vst [vmem:[#allocation6_spill] sm:$0xff] %v5621_v37  ;;  %10343 = vst [vmem:[#allocation7_spill] sm:$0xff] %v5624_v57  ;;  %v5637_v21 = vsub.f32 %v5456_v13, %v924_v40  ;;  %v930_v25 = vmul.f32 2.0, %v5449_v8  ;;  %v931_v38 = vmul.f32 2.0, %v5451_v55  ;;  %v1260_v1 = vmin.f32 %v1258_v58, %v5615_v14 }
 0x191   : > { %v5571_v42 = vpop.f32.mrb[48].mxu0  ;;  %10345 = vst [vmem:[#allocation11_spill] sm:$0xff] %v5628_v23  ;;  %10346 = vst [vmem:[#allocation8_spill] sm:$0xff] %v5631_v61  ;;  %v5643_v7 = vsub.f32 %v5456_v13, %v925_v27  ;;  %v5646_v30 = vsub.f32 %v5487_v4, %v926_v53  ;;  %v932_v60 = vmul.f32 2.0, %v5458_v9  ;;  %v1224_v40 = vmin.f32 %v1222_v39, %v5621_v37 }
 0x192   : > { %v5581_v32 = vpop.f32.mrb[49].mxu0  ;;  %10349 = vst [vmem:[#allocation9_spill] sm:$0xff] %v5637_v21  ;;  %v1261_v29 = vmin.f32 %v1259_v54, %v5624_v57  ;;  %v5652_v8 = vsub.f32 %v5487_v4, %v927_v51  ;;  %v933_v55 = vmul.f32 2.0, %v5463_v15  ;;  %v1225_v58 = vmin.f32 %v1223_v46, %v5628_v23  ;;  %v1087_v51 = vpop.permute.xlu0 %1086 }
 0x193   : > { %v5591_v34 = vpop.f32.mrb[50].mxu0  ;;  %10350 = vst [vmem:[#allocation10_spill] sm:$0xff] %v5643_v7  ;;  %10351 = vst [vmem:[#allocation34_spill] sm:$0xff] %v5646_v30  ;;  %v1262_v13 = vmin.f32 %v1260_v1, %v5631_v61  ;;  %v5658_v27 = vsub.f32 %v5501_v62, %v928_v33  ;;  %v5661_v9 = vsub.f32 %v5501_v62, %v929_v59  ;;  %v934_v15 = vmul.f32 2.0, %v5503_v0  ;;  %v1092_v0 = vpop.permute.xlu1 %1091 }
 0x194   : > { %v5599_v5 = vpop.f32.mrb[51].mxu0  ;;  %10352 = vst [vmem:[#allocation35_spill] sm:$0xff] %v5652_v8  ;;  %v1226_v39 = vmin.f32 %v1224_v40, %v5637_v21  ;;  %v5665_v53 = vsub.f32 %v5539_v56, %v930_v25  ;;  %v5668_v4 = vsub.f32 %v5539_v56, %v931_v38  ;;  %v1263_v54 = vmin.f32 %v1261_v29, %v5643_v7 }
 0x195   : > { %10353 = vst [vmem:[#allocation36_spill] sm:$0xff] %v5658_v27  ;;  %10354 = vst [vmem:[#allocation37_spill] sm:$0xff] %v5661_v9  ;;  %v1227_v1 = vmin.f32 %v1225_v58, %v5646_v30  ;;  %v5674_v33 = vsub.f32 %v5554_v36, %v932_v60  ;;  %v935_v59 = vmul.f32 2.0, %v5511_v6  ;;  %v1264_v62 = vmin.f32 %v1262_v13, %v5652_v8 }
 0x196   : > { %10355 = vst [vmem:[#allocation38_spill] sm:$0xff] %v5665_v53  ;;  %10356 = vst [vmem:[#allocation39_spill] sm:$0xff] %v5668_v4  ;;  %v5679_v46 = vsub.f32 %v5554_v36, %v933_v55  ;;  %v936_v56 = vmul.f32 2.0, %v5519_v10  ;;  %v937_v25 = vmul.f32 2.0, %v5529_v31  ;;  %v1228_v38 = vmin.f32 %v1226_v39, %v5658_v27 }
 0x197   : > { %10357 = vst [vmem:[#allocation40_spill] sm:$0xff] %v5674_v33  ;;  %v1265_v40 = vmin.f32 %v1263_v54, %v5661_v9  ;;  %v938_v29 = vmul.f32 2.0, %v5571_v42  ;;  %v939_v60 = vmul.f32 2.0, %v5581_v32  ;;  %v1229_v6 = vmin.f32 %v1227_v1, %v5665_v53 }
 0x198   : > { %10358 = vst [vmem:[#allocation41_spill] sm:$0xff] %v5679_v46  ;;  %v1266_v13 = vmin.f32 %v1264_v62, %v5668_v4  ;;  %v5690_v36 = vsub.f32 %v5585_v52, %v934_v15  ;;  %v940_v10 = vmul.f32 2.0, %v5591_v34  ;;  %v1230_v55 = vmin.f32 %v1228_v38, %v5674_v33  ;;  %v1097_v4 = vpop.permute.xlu0 %1096 }
 0x199   : > { %v861_v22 = vpop.f32.mrb[52].mxu0  ;;  %v5695_v39 = vsub.f32 %v5585_v52, %v935_v59  ;;  %v941_v42 = vmul.f32 2.0, %v5599_v5  ;;  %v1267_v9 = vmin.f32 %v1265_v40, %v5679_v46  ;;  %v5700_v1 = vsub.f32 %v5603_v45, %v936_v56  ;;  %v1102_v56 = vpop.permute.xlu1 %1101 }
 0x19a   : > { %v863_v43 = vpop.f32.mrb[53].mxu0  ;;  %10359 = vst [vmem:[#allocation42_spill] sm:$0xff] %v5690_v36  ;;  %v942_v54 = vmul.f32 2.0, %v861_v22  ;;  %v5703_v15 = vsub.f32 %v5603_v45, %v937_v25  ;;  %v5705_v8 = vsub.f32 %v1077_v50, %v938_v29  ;;  %v5707_v38 = vsub.f32 %v1077_v50, %v939_v60 }
 0x19b   : > { %v865_v48 = vpop.f32.mrb[54].mxu0  ;;  %10360 = vst [vmem:[#allocation43_spill] sm:$0xff] %v5695_v39  ;;  %10361 = vst [vmem:[#allocation44_spill] sm:$0xff] %v5700_v1  ;;  %v943_v52 = vmul.f32 2.0, %v863_v43  ;;  %v1231_v5 = vmin.f32 %v1229_v6, %v5690_v36  ;;  %v5710_v22 = vsub.f32 %v1082_v47, %v940_v10  ;;  %v1268_v7 = vmin.f32 %v1266_v13, %v5695_v39 }
 0x19c   : > { %v867_v2 = vpop.f32.mrb[55].mxu0  ;;  %10362 = vst [vmem:[#allocation45_spill] sm:$0xff] %v5703_v15  ;;  %v944_v62 = vmul.f32 2.0, %v865_v48  ;;  %10363 = vst [vmem:[#allocation46_spill] sm:$0xff] %v5705_v8  ;;  %v5713_v45 = vsub.f32 %v1082_v47, %v941_v42  ;;  %v5715_v48 = vsub.f32 %v1087_v51, %v942_v54  ;;  %v1232_v29 = vmin.f32 %v1230_v55, %v5700_v1 }
 0x19d   : > { %10364 = vst [vmem:[#allocation47_spill] sm:$0xff] %v5707_v38  ;;  %v945_v59 = vmul.f32 2.0, %v867_v2  ;;  %10365 = vst [vmem:[#allocation48_spill] sm:$0xff] %v5710_v22  ;;  %v1269_v50 = vmin.f32 %v1267_v9, %v5703_v15  ;;  %v1233_v60 = vmin.f32 %v1231_v5, %v5705_v8  ;;  %v5723_v6 = vsub.f32 %v1087_v51, %v943_v52 }
 0x19e   : > { %10366 = vst [vmem:[#allocation49_spill] sm:$0xff] %v5713_v45  ;;  %10367 = vst [vmem:[#allocation50_spill] sm:$0xff] %v5715_v48  ;;  %v5719_v43 = vsub.f32 %v1092_v0, %v944_v62  ;;  %v1234_v13 = vmin.f32 %v1232_v29, %v5710_v22 }
 0x19f   : > { %10369 = vst [vmem:[#allocation52_spill] sm:$0xff] %v5723_v6  ;;  %v5725_v10 = vsub.f32 %v1092_v0, %v945_v59  ;;  %v1235_v62 = vmin.f32 %v1233_v60, %v5715_v48 }
 0x1a0   : > { %10368 = vst [vmem:[#allocation51_spill] sm:$0xff] %v5719_v43  ;;  %v1236_v0 = vmin.f32 %v1234_v13, %v5719_v43 }
 0x1a1   : > { %v871_v58 = vpop.f32.mrb[56].mxu0  ;;  %10370 = vst [vmem:[#allocation53_spill] sm:$0xff] %v5725_v10 }
 0x1a2   : > { %v873_v31 = vpop.f32.mrb[57].mxu0  ;;  %v946_v40 = vmul.f32 2.0, %v871_v58  ;;  %v1270_v58 = vmin.f32 %v1268_v7, %v5707_v38 }
 0x1a3   : > { %v875_v32 = vpop.f32.mrb[58].mxu0  ;;  %v947_v2 = vmul.f32 2.0, %v873_v31  ;;  %v1271_v31 = vmin.f32 %v1269_v50, %v5713_v45 }
 0x1a4   : > { %v877_v34 = vpop.f32.mrb[59].mxu0  ;;  %v948_v46 = vmul.f32 2.0, %v875_v32  ;;  %v5728_v42 = vsub.f32 %v1097_v4, %v946_v40  ;;  %v1107_v32 = vpop.permute.xlu0 %1106  ;;  %v1272_v29 = vmin.f32 %v1270_v58, %v5723_v6 }
 0x1a5   : > { %v949_v25 = vmul.f32 2.0, %v877_v34  ;;  %v5737_v52 = vsub.f32 %v1097_v4, %v947_v2  ;;  %v1112_v40 = vpop.permute.xlu1 %1111 }
 0x1a6   : > { %10371 = vst [vmem:[#allocation54_spill] sm:$0xff] %v5728_v42  ;;  %v5730_v54 = vsub.f32 %v1102_v56, %v948_v46  ;;  %v1237_v60 = vmin.f32 %v1235_v62, %v5728_v42 }
 0x1a7   : > { %v5734_v34 = vsub.f32 %v1102_v56, %v949_v25  ;;  %10374 = vst [vmem:[#allocation57_spill] sm:$0xff] %v5737_v52  ;;  %v1274_v13 = vmin.f32 %v1272_v29, %v5737_v52 }
 0x1a8   : > { %10372 = vst [vmem:[#allocation55_spill] sm:$0xff] %v5730_v54  ;;  %v1238_v56 = vmin.f32 %v1236_v0, %v5730_v54 }
 0x1a9   : > { %v881_v47 = vpop.f32.mrb[60].mxu0  ;;  %10373 = vst [vmem:[#allocation56_spill] sm:$0xff] %v5734_v34 }
 0x1aa   : > { %v950_v55 = vmul.f32 2.0, %v881_v47  ;;  %v883_v9 = vpop.f32.mrb[61].mxu0  ;;  %v1273_v47 = vmin.f32 %v1271_v31, %v5725_v10 }
 0x1ab   : > { %v951_v7 = vmul.f32 2.0, %v883_v9  ;;  %v885_v51 = vpop.f32.mrb[62].mxu0 }
 0x1ac   : > { %v5739_v59 = vsub.f32 %v1107_v32, %v950_v55  ;;  %v952_v5 = vmul.f32 2.0, %v885_v51  ;;  %v887_v46 = vpop.f32.mrb[63].mxu0  ;;  %v1275_v4 = vmin.f32 %v1273_v47, %v5734_v34 }
 0x1ad   : > { %v953_v50 = vmul.f32 2.0, %v887_v46  ;;  %v5745_v25 = vsub.f32 %v1107_v32, %v951_v7  ;;  %v1178_v46 = vlaneseq }
 0x1ae   : > { %10375 = vst [vmem:[#allocation58_spill] sm:$0xff] %v5739_v59  ;;  %v5747_v9 = vsub.f32 %v1112_v40, %v952_v5  ;;  %v1239_v55 = vmin.f32 %v1237_v60, %v5739_v59 }
 0x1af   : > { %10376 = vst [vmem:[#allocation59_spill] sm:$0xff] %v5745_v25  ;;  %v5750_v2 = vsub.f32 %v1112_v40, %v953_v50  ;;  %v1276_v62 = vmin.f32 %v1274_v13, %v5745_v25  ;;  %v5757_v40 = vshrl.u32 %v1178_v46, 7 }
 0x1b0   : > { %10377 = vst [vmem:[#allocation60_spill] sm:$0xff] %v5747_v9  ;;  %v1240_v58 = vmin.f32 %v1238_v56, %v5747_v9 }
 0x1b1   : > { %10378 = vst [vmem:[#allocation61_spill] sm:$0xff] %v5750_v2  ;;  %v1277_v31 = vmin.f32 %v1275_v4, %v5750_v2  ;;  %10379 = vst [vmem:[#allocation62_spill] sm:$0xff] %v5757_v40  ;;  %v5760_v60 = vadd.s32 8, %v5757_v40  ;;  %v5763_v4 = vadd.s32 16, %v5757_v40  ;;  %v5766_v13 = vadd.s32 24, %v5757_v40 }
 0x1b2   : > { %v1241_v51 = vmin.f32 %v1239_v55, %v1240_v58  ;;  %v5769_v55 = vadd.s32 32, %v5757_v40  ;;  %v5772_v58 = vadd.s32 40, %v5757_v40  ;;  %v5796_v46 = vadd.s32 104, %v5757_v40 }
 0x1b3   : > { %v1278_v32 = vmin.f32 %v1276_v62, %v1277_v31  ;;  %10380 = vst [vmem:[#allocation63_spill] sm:$0xff] %v5760_v60  ;;  %10381 = vst [vmem:[#allocation64_spill] sm:$0xff] %v5763_v4  ;;  %v5775_v31 = vadd.s32 48, %v5757_v40  ;;  %v5781_v62 = vadd.s32 64, %v5757_v40  ;;  %v5799_v2 = vadd.s32 112, %v5757_v40 }
 0x1b4   : > { %v1242_v0 = vrot.slane %v1241_v51, 4  ;;  %10382 = vst [vmem:[#allocation65_spill] sm:$0xff] %v5766_v13  ;;  %10383 = vst [vmem:[#allocation66_spill] sm:$0xff] %v5769_v55  ;;  %v5807_v25 = vadd.s32 128, %v5757_v40  ;;  %v5810_v34 = vadd.s32 136, %v5757_v40  ;;  %v5813_v52 = vadd.s32 144, %v5757_v40 }
 0x1b5   : > { %v1279_v5 = vrot.slane %v1278_v32, 4  ;;  %10384 = vst [vmem:[#allocation67_spill] sm:$0xff] %v5772_v58  ;;  %10386 = vst [vmem:[#allocation69_spill] sm:$0xff] %v5796_v46  ;;  %v5816_v6 = vadd.s32 152, %v5757_v40  ;;  %v5819_v45 = vadd.s32 160, %v5757_v40  ;;  %v5822_v38 = vadd.s32 168, %v5757_v40 }
 0x1b6   : > { %v1243_v7 = vmin.f32 %v1241_v51, %v1242_v0  ;;  %v5784_v0 = vadd.s32 72, %v5757_v40  ;;  %10388 = vst [vmem:[#allocation71_spill] sm:$0xff] %v5807_v25  ;;  %10389 = vst [vmem:[#allocation72_spill] sm:$0xff] %v5810_v34  ;;  %v5828_v15 = vadd.s32 184, %v5757_v40  ;;  %v5831_v39 = vadd.s32 192, %v5757_v40 }
 0x1b7   : > { %v1280_v47 = vmin.f32 %v1278_v32, %v1279_v5  ;;  %v5787_v32 = vadd.s32 80, %v5757_v40  ;;  %v5793_v5 = vadd.s32 96, %v5757_v40  ;;  %10390 = vst [vmem:[#allocation73_spill] sm:$0xff] %v5813_v52  ;;  %10391 = vst [vmem:[#allocation74_spill] sm:$0xff] %v5816_v6  ;;  %v5834_v61 = vadd.s32 200, %v5757_v40 }
 0x1b8   : > { %v1244_v10 = vrot.slane %v1243_v7, 2  ;;  %10392 = vst [vmem:[#allocation75_spill] sm:$0xff] %v5819_v45  ;;  %10393 = vst [vmem:[#allocation76_spill] sm:$0xff] %v5822_v38  ;;  %v5837_v57 = vadd.s32 208, %v5757_v40  ;;  %v5848_v14 = vadd.s32 216, %v5757_v40  ;;  %v5851_v16 = vadd.s32 224, %v5757_v40 }
 0x1b9   : > { %v1281_v29 = vrot.slane %v1280_v47, 2  ;;  %10395 = vst [vmem:[#allocation78_spill] sm:$0xff] %v5828_v15  ;;  %10396 = vst [vmem:[#allocation79_spill] sm:$0xff] %v5831_v39 }
 0x1ba   : > { %v1245_v50 = vmin.f32 %v1243_v7, %v1244_v10  ;;  %v5778_v10 = vadd.s32 56, %v5757_v40  ;;  %v5790_v7 = vadd.s32 88, %v5757_v40  ;;  %10397 = vst [vmem:[#allocation80_spill] sm:$0xff] %v5834_v61  ;;  %10398 = vst [vmem:[#allocation81_spill] sm:$0xff] %v5837_v57  ;;  %v5854_v57 = vadd.s32 232, %v5757_v40 }
 0x1bb   : > { %v1282_v51 = vmin.f32 %v1280_v47, %v1281_v29  ;;  %v5802_v47 = vadd.s32 120, %v5757_v40  ;;  %10399 = vst [vmem:[#allocation82_spill] sm:$0xff] %v5848_v14  ;;  %10400 = vst [vmem:[#allocation83_spill] sm:$0xff] %v5851_v16 }
 0x1bc   : > { %v1246_v56 = vrot.slane %v1245_v50, 1  ;;  %10385 = vst [vmem:[#allocation68_spill] sm:$0xff] %v5778_v10  ;;  %10401 = vst [vmem:[#allocation84_spill] sm:$0xff] %v5854_v57 }
 0x1be   : > { %v5804_v29 = vmin.f32 %v1245_v50, %v1246_v56  ;;  %v5825_v50 = vadd.s32 176, %v5757_v40  ;;  %v1283_v56 = vrot.slane %v1282_v51, 1 }
 0x1c0   : > { %10387 = vst [vmem:[#allocation70_spill] sm:$0xff] %v5804_v29  ;;  %10394 = vst [vmem:[#allocation77_spill] sm:$0xff] %v5825_v50  ;;  %vm1285_vm1 = vcmp.eq.f32.partialorder %v5465_v11, %v5804_v29  ;;  %vm1287_vm2 = vcmp.eq.f32.partialorder %v5473_v18, %v5804_v29  ;;  %vm1289_vm3 = vcmp.eq.f32.partialorder %v5454_v63, %v5804_v29  ;;  %v5857_v11 = vadd.s32 240, %v5757_v40 }
 0x1c1   : > { %vm1291_vm4 = vcmp.eq.f32.partialorder %v5469_v17, %v5804_v29  ;;  %v5860_v18 = vadd.s32 248, %v5757_v40  ;;  %vm1293_vm5 = vcmp.eq.f32.partialorder %v5475_v19, %v5804_v29  ;;  %vm1295_vm6 = vcmp.eq.f32.partialorder %v5484_v3, %v5804_v29 }
 0x1c2   : > { %10402 = vst [vmem:[#allocation85_spill] sm:$0xff] %v5857_v11  ;;  %v5866_v17 = vmin.f32 %v1282_v51, %v1283_v56  ;;  %v1349_v63 = vsel %vm1285_vm1, %v5757_v40, 256  ;;  %v1351_v16 = vsel %vm1287_vm2, %v5760_v60, 256  ;;  %v1353_v57 = vsel %vm1289_vm3, %v5763_v4, 256 }
 0x1c3   : > { %10403 = vst [vmem:[#allocation86_spill] sm:$0xff] %v5860_v18  ;;  %v1355_v14 = vsel %vm1291_vm4, %v5766_v13, 256  ;;  %vm1297_vm7 = vcmp.eq.f32.partialorder %v5508_v24, %v5804_v29  ;;  %vm1299_vm8 = vcmp.eq.f32.partialorder %v5523_v28, %v5804_v29  ;;  %vm1301_vm9 = vcmp.eq.f32.partialorder %v5532_v41, %v5804_v29 }
 0x1c4   : > { %10404 = vst [vmem:[#allocation87_spill] sm:$0xff] %v5866_v17  ;;  %vm1303_vm10 = vcmp.eq.f32.partialorder %v5543_v44, %v5804_v29  ;;  %vm1305_vm11 = vcmp.eq.f32.partialorder %v5552_v35, %v5804_v29  ;;  %vm1307_vm12 = vcmp.eq.f32.partialorder %v5566_v12, %v5804_v29  ;;  %vm1309_vm13 = vcmp.eq.f32.partialorder %v5575_v20, %v5804_v29 }
 0x1c5   : > { %vm1311_vm14 = vcmp.eq.f32.partialorder %v5588_v26, %v5804_v29  ;;  %vm1413_vm1 = vcmp.lt.s32.totalorder %v1349_v63, %v1353_v57  ;;  %vm1415_vm2 = vcmp.lt.s32.totalorder %v1351_v16, %v1355_v14  ;;  %v1357_v51 = vsel %vm1293_vm5, %v5769_v55, 256  ;;  %v10433_v26 = vld [vmem:[#allocation8_spill] sm:$0xff] }
 0x1c6   : > { %v1359_v56 = vsel %vm1295_vm6, %v5772_v58, 256  ;;  %v1414_v13 = vsel %vm1413_vm1, %v1349_v63, %v1353_v57  ;;  %v1416_v4 = vsel %vm1415_vm2, %v1351_v16, %v1355_v14  ;;  %vm1317_vm3 = vcmp.eq.f32.partialorder %v5628_v23, %v5804_v29  ;;  %v10430_v23 = vld [vmem:[#allocation32_spill] sm:$0xff] }
 0x1c7   : > { %vm1417_vm0 = vcmp.lt.s32.totalorder %v1414_v13, %v1357_v51  ;;  %vm1419_vm15 = vcmp.lt.s32.totalorder %v1416_v4, %v1359_v56  ;;  %v1361_v19 = vsel %vm1297_vm7, %v5775_v31, 256  ;;  %v1363_v3 = vsel %vm1299_vm8, %v5778_v10, 256 }
 0x1c8   : > { %v1418_v63 = vsel %vm1417_vm0, %v1414_v13, %v1357_v51  ;;  %v1420_v16 = vsel %vm1419_vm15, %v1416_v4, %v1359_v56  ;;  %vm1321_vm5 = vcmp.eq.f32.partialorder %v5646_v30, %v5804_v29  ;;  %vm1323_vm6 = vcmp.eq.f32.partialorder %v5658_v27, %v5804_v29  ;;  %v10416_v30 = vld [vmem:[#allocation21_spill] sm:$0xff] }
 0x1c9   : > { %vm1421_vm1 = vcmp.lt.s32.totalorder %v1418_v63, %v1361_v19  ;;  %vm1423_vm2 = vcmp.lt.s32.totalorder %v1420_v16, %v1363_v3  ;;  %vm1325_vm4 = vcmp.eq.f32.partialorder %v5665_v53, %v5804_v29  ;;  %v1365_v14 = vsel %vm1301_vm9, %v5781_v62, 256 }
 0x1ca   : > { %v1367_v57 = vsel %vm1303_vm10, %v5784_v0, 256  ;;  %v1422_v4 = vsel %vm1421_vm1, %v1418_v63, %v1361_v19  ;;  %v1424_v13 = vsel %vm1423_vm2, %v1420_v16, %v1363_v3  ;;  %vm1327_vm7 = vcmp.eq.f32.partialorder %v5674_v33, %v5804_v29  ;;  %v10409_v33 = vld [vmem:[#allocation81_spill] sm:$0xff] }
 0x1cb   : > { %vm1329_vm8 = vcmp.eq.f32.partialorder %v5690_v36, %v5804_v29  ;;  %vm1425_vm15 = vcmp.lt.s32.totalorder %v1422_v4, %v1365_v14  ;;  %vm1427_vm0 = vcmp.lt.s32.totalorder %v1424_v13, %v1367_v57  ;;  %v1369_v51 = vsel %vm1305_vm11, %v5787_v32, 256 }
 0x1cc   : > { %v1371_v56 = vsel %vm1307_vm12, %v5790_v7, 256  ;;  %v1426_v19 = vsel %vm1425_vm15, %v1422_v4, %v1365_v14  ;;  %v1428_v3 = vsel %vm1427_vm0, %v1424_v13, %v1367_v57  ;;  %vm1331_vm9 = vcmp.eq.f32.partialorder %v5700_v1, %v5804_v29  ;;  %v10412_v1 = vld [vmem:[#allocation83_spill] sm:$0xff] }
 0x1cd   : > { %vm1429_vm1 = vcmp.lt.s32.totalorder %v1426_v19, %v1369_v51  ;;  %vm1431_vm2 = vcmp.lt.s32.totalorder %v1428_v3, %v1371_v56  ;;  %v1373_v63 = vsel %vm1309_vm13, %v5793_v5, 256  ;;  %v1375_v16 = vsel %vm1311_vm14, %v5796_v46, 256 }
 0x1ce   : > { %v1430_v14 = vsel %vm1429_vm1, %v1426_v19, %v1369_v51  ;;  %v1432_v57 = vsel %vm1431_vm2, %v1428_v3, %v1371_v56  ;;  %vm1335_vm11 = vcmp.eq.f32.partialorder %v5710_v22, %v5804_v29  ;;  %vm10405_vm10 = vcmp.eq.f32.partialorder %v5610_v49, %v5804_v29  ;;  %v10414_v22 = vld [vmem:[#allocation84_spill] sm:$0xff]  ;;  %v10432_v49 = vld [vmem:[#allocation7_spill] sm:$0xff] }
 0x1cf   : > { %vm1433_vm15 = vcmp.lt.s32.totalorder %v1430_v14, %v1373_v63  ;;  %vm1435_vm0 = vcmp.lt.s32.totalorder %v1432_v57, %v1375_v16  ;;  %v1377_v4 = vsel %vm10405_vm10, %v5799_v2, 256  ;;  %vm10406_vm13 = vcmp.eq.f32.partialorder %v5621_v37, %v5804_v29 }
 0x1d0   : > { %v1379_v13 = vsel %vm10406_vm13, %v5802_v47, 256  ;;  %v1434_v51 = vsel %vm1433_vm15, %v1430_v14, %v1373_v63  ;;  %v1436_v56 = vsel %vm1435_vm0, %v1432_v57, %v1375_v16  ;;  %vm1339_vm14 = vcmp.eq.f32.partialorder %v5719_v43, %v5804_v29 }
 0x1d1   : > { %vm1437_vm2 = vcmp.lt.s32.totalorder %v1434_v51, %v1377_v4  ;;  %vm1439_vm12 = vcmp.lt.s32.totalorder %v1436_v56, %v1379_v13  ;;  %v1381_v19 = vsel %vm1317_vm3, %v5807_v25, 256  ;;  %vm10407_vm10 = vcmp.eq.f32.partialorder %v5637_v21, %v5804_v29  ;;  %v10425_v21 = vld [vmem:[#allocation65_spill] sm:$0xff] }
 0x1d2   : > { %v1383_v3 = vsel %vm10407_vm10, %v5810_v34, 256  ;;  %v1438_v63 = vsel %vm1437_vm2, %v1434_v51, %v1377_v4  ;;  %v1440_v16 = vsel %vm1439_vm12, %v1436_v56, %v1379_v13  ;;  %vm1343_vm15 = vcmp.eq.f32.partialorder %v5730_v54, %v5804_v29 }
 0x1d3   : > { %vm1345_vm0 = vcmp.eq.f32.partialorder %v5739_v59, %v5804_v29  ;;  %vm1441_vm13 = vcmp.lt.s32.totalorder %v1438_v63, %v1381_v19  ;;  %vm1443_vm1 = vcmp.lt.s32.totalorder %v1440_v16, %v1383_v3  ;;  %v1385_v14 = vsel %vm1321_vm5, %v5813_v52, 256  ;;  %v10417_v59 = vld [vmem:[#allocation13_spill] sm:$0xff] }
 0x1d4   : > { %v1387_v57 = vsel %vm1323_vm6, %v5816_v6, 256  ;;  %v1442_v4 = vsel %vm1441_vm13, %v1438_v63, %v1381_v19  ;;  %v1444_v13 = vsel %vm1443_vm1, %v1440_v16, %v1383_v3  ;;  %vm1347_vm3 = vcmp.eq.f32.partialorder %v5747_v9, %v5804_v29 }
 0x1d5   : > { %v1389_v51 = vsel %vm1325_vm4, %v5819_v45, 256  ;;  %vm1445_vm12 = vcmp.lt.s32.totalorder %v1442_v4, %v1385_v14  ;;  %vm1447_vm2 = vcmp.lt.s32.totalorder %v1444_v13, %v1387_v57  ;;  %v1391_v56 = vsel %vm1327_vm7, %v5822_v38, 256 }
 0x1d6   : > { %v1393_v19 = vsel %vm1329_vm8, %v5825_v50, 256  ;;  %v1446_v3 = vsel %vm1445_vm12, %v1442_v4, %v1385_v14  ;;  %v1448_v63 = vsel %vm1447_vm2, %v1444_v13, %v1387_v57  ;;  %v1395_v16 = vsel %vm1331_vm9, %v5828_v15, 256  ;;  %v10411_v13 = vld [vmem:[#allocation82_spill] sm:$0xff] }
 0x1d7   : > { %vm10408_vm4 = vcmp.eq.f32.partialorder %v5705_v8, %v5804_v29  ;;  %vm1449_vm5 = vcmp.lt.s32.totalorder %v1446_v3, %v1389_v51  ;;  %vm1451_vm6 = vcmp.lt.s32.totalorder %v1448_v63, %v1391_v56  ;;  %v1399_v36 = vsel %vm1335_vm11, %v5834_v61, 256 }
 0x1d8   : > { %v1397_v53 = vsel %vm10408_vm4, %v5831_v39, 256  ;;  %vm10410_vm7 = vcmp.eq.f32.partialorder %v5715_v48, %v5804_v29  ;;  %v1450_v57 = vsel %vm1449_vm5, %v1446_v3, %v1389_v51  ;;  %v1452_v4 = vsel %vm1451_vm6, %v1448_v63, %v1391_v56 }
 0x1d9   : > { %v1401_v14 = vsel %vm10410_vm7, %v10409_v33, 256  ;;  %v1403_v8 = vsel %vm1339_vm14, %v10411_v13, 256  ;;  %vm10413_vm8 = vcmp.eq.f32.partialorder %v5728_v42, %v5804_v29  ;;  %vm1453_vm9 = vcmp.lt.s32.totalorder %v1450_v57, %v1393_v19  ;;  %v10415_v42 = vld [vmem:[#allocation15_spill] sm:$0xff] }
 0x1da   : > { %v1405_v27 = vsel %vm10413_vm8, %v10412_v1, 256  ;;  %vm1455_vm1 = vcmp.lt.s32.totalorder %v1452_v4, %v1395_v16  ;;  %v1407_v48 = vsel %vm1343_vm15, %v10414_v22, 256  ;;  %v1409_v51 = vsel %vm1345_vm0, %v5857_v11, 256  ;;  %v10420_v29 = vld [vmem:[#allocation23_spill] sm:$0xff] }
 0x1db   : > { %v1454_v56 = vsel %vm1453_vm9, %v1450_v57, %v1393_v19  ;;  %v1456_v3 = vsel %vm1455_vm1, %v1452_v4, %v1395_v16  ;;  %v1411_v63 = vsel %vm1347_vm3, %v5860_v18, 256  ;;  %vm1286_vm10 = vcmp.eq.f32.partialorder %v10415_v42, %v5866_v17  ;;  %v10418_v19 = vld [vmem:[#allocation17_spill] sm:$0xff]  ;;  %v10419_v16 = vld [vmem:[#allocation20_spill] sm:$0xff] }
 0x1dc   : > { %vm1457_vm11 = vcmp.lt.s32.totalorder %v1454_v56, %v1397_v53  ;;  %vm1459_vm14 = vcmp.lt.s32.totalorder %v1456_v3, %v1399_v36  ;;  %vm1288_vm15 = vcmp.eq.f32.partialorder %v10416_v30, %v5866_v17  ;;  %vm1290_vm0 = vcmp.eq.f32.partialorder %v10417_v59, %v5866_v17  ;;  %v10427_v30 = vld [vmem:[#allocation28_spill] sm:$0xff]  ;;  %v10428_v42 = vld [vmem:[#allocation29_spill] sm:$0xff]  ;;  %v10429_v59 = vld [vmem:[#allocation30_spill] sm:$0xff] }
 0x1dd   : > { %v1458_v43 = vsel %vm1457_vm11, %v1454_v56, %v1397_v53  ;;  %v1460_v54 = vsel %vm1459_vm14, %v1456_v3, %v1399_v36  ;;  %vm1292_vm2 = vcmp.eq.f32.partialorder %v10418_v19, %v5866_v17  ;;  %vm1294_vm3 = vcmp.eq.f32.partialorder %v10419_v16, %v5866_v17  ;;  %v10421_v53 = vld [vmem:[#allocation24_spill] sm:$0xff]  ;;  %v10422_v36 = vld [vmem:[#allocation25_spill] sm:$0xff]  ;;  %v10423_v56 = vld [vmem:[#allocation26_spill] sm:$0xff] }
 0x1de   : > { %vm1461_vm13 = vcmp.lt.s32.totalorder %v1458_v43, %v1401_v14  ;;  %vm1463_vm12 = vcmp.lt.s32.totalorder %v1460_v54, %v1403_v8  ;;  %vm1296_vm4 = vcmp.eq.f32.partialorder %v10420_v29, %v5866_v17  ;;  %vm1298_vm5 = vcmp.eq.f32.partialorder %v10421_v53, %v5866_v17  ;;  %v10431_v19 = vld [vmem:[#allocation5_spill] sm:$0xff] }
 0x1df   : > { %v1462_v57 = vsel %vm1461_vm13, %v1458_v43, %v1401_v14  ;;  %v1464_v4 = vsel %vm1463_vm12, %v1460_v54, %v1403_v8  ;;  %vm1300_vm8 = vcmp.eq.f32.partialorder %v10422_v36, %v5866_v17  ;;  %vm1302_vm9 = vcmp.eq.f32.partialorder %v10423_v56, %v5866_v17  ;;  %v10424_v54 = vld [vmem:[#allocation64_spill] sm:$0xff] }
 0x1e0   : > { %vm1465_vm6 = vcmp.lt.s32.totalorder %v1462_v57, %v1405_v27  ;;  %vm1467_vm7 = vcmp.lt.s32.totalorder %v1464_v4, %v1407_v48  ;;  %v1350_v8 = vsel %vm1286_vm10, %v5757_v40, 256  ;;  %v1352_v43 = vsel %vm1288_vm15, %v5760_v60, 256 }
 0x1e1   : > { %v1466_v3 = vsel %vm1465_vm6, %v1462_v57, %v1405_v27  ;;  %v1468_v9 = vsel %vm1467_vm7, %v1464_v4, %v1407_v48  ;;  %v1354_v14 = vsel %vm1290_vm0, %v10424_v54, 256  ;;  %v1356_v27 = vsel %vm1292_vm2, %v10425_v21, 256  ;;  %v10426_v4 = vld [vmem:[#allocation27_spill] sm:$0xff] }
 0x1e2   : > { %vm1469_vm1 = vcmp.lt.s32.totalorder %v1466_v3, %v1409_v51  ;;  %vm1471_vm11 = vcmp.lt.s32.totalorder %v1468_v9, %v1411_v63  ;;  %vm1304_vm14 = vcmp.eq.f32.partialorder %v10426_v4, %v5866_v17  ;;  %vm1306_vm10 = vcmp.eq.f32.partialorder %v10427_v30, %v5866_v17 }
 0x1e3   : > { %v1470_v48 = vsel %vm1469_vm1, %v1466_v3, %v1409_v51  ;;  %v1472_v57 = vsel %vm1471_vm11, %v1468_v9, %v1411_v63  ;;  %vm1308_vm13 = vcmp.eq.f32.partialorder %v10428_v42, %v5866_v17  ;;  %vm1310_vm0 = vcmp.eq.f32.partialorder %v10429_v59, %v5866_v17 }
 0x1e4   : > { %vm1473_vm15 = vcmp.lt.s32.totalorder %v1470_v48, %v1472_v57  ;;  %v1358_v9 = vsel %vm1294_vm3, %v5769_v55, 256  ;;  %vm1484_vm6 = vcmp.lt.s32.totalorder %v1350_v8, %v1354_v14  ;;  %vm1486_vm7 = vcmp.lt.s32.totalorder %v1352_v43, %v1356_v27 }
 0x1e5   : > { %v1474_v51 = vsel %vm1473_vm15, %v1470_v48, %v1472_v57  ;;  %v1360_v63 = vsel %vm1296_vm4, %v5772_v58, 256  ;;  %v1485_v3 = vsel %vm1484_vm6, %v1350_v8, %v1354_v14  ;;  %v1487_v37 = vsel %vm1486_vm7, %v1352_v43, %v1356_v27  ;;  %v10434_v27 = vld [vmem:[#allocation10_spill] sm:$0xff] }
 0x1e6   : > { %vm1316_vm1 = vcmp.eq.f32.partialorder %v10432_v49, %v5866_v17  ;;  %vm1318_vm11 = vcmp.eq.f32.partialorder %v10433_v26, %v5866_v17  ;;  %vm1488_vm2 = vcmp.lt.s32.totalorder %v1485_v3, %v1358_v9  ;;  %vm1490_vm12 = vcmp.lt.s32.totalorder %v1487_v37, %v1360_v63 }
 0x1e7   : > { %v1362_v48 = vsel %vm1298_vm5, %v5775_v31, 256  ;;  %v1364_v57 = vsel %vm1300_vm8, %v5778_v10, 256  ;;  %v1489_v8 = vsel %vm1488_vm2, %v1485_v3, %v1358_v9  ;;  %v1491_v43 = vsel %vm1490_vm12, %v1487_v37, %v1360_v63  ;;  %v10435_v37 = vld [vmem:[#allocation35_spill] sm:$0xff]  ;;  %v10436_v9 = vld [vmem:[#allocation37_spill] sm:$0xff] }
 0x1e8   : > { %v1475_v14 = vrot.slane %v1474_v51, 4  ;;  %vm1320_vm3 = vcmp.eq.f32.partialorder %v10434_v27, %v5866_v17  ;;  %vm1492_vm4 = vcmp.lt.s32.totalorder %v1489_v8, %v1362_v48  ;;  %vm1494_vm15 = vcmp.lt.s32.totalorder %v1491_v43, %v1364_v57 }
 0x1e9   : > { %v1366_v29 = vsel %vm1302_vm9, %v5781_v62, 256  ;;  %v1368_v53 = vsel %vm1304_vm14, %v5784_v0, 256  ;;  %v1493_v36 = vsel %vm1492_vm4, %v1489_v8, %v1362_v48  ;;  %v1495_v16 = vsel %vm1494_vm15, %v1491_v43, %v1364_v57  ;;  %v10437_v8 = vld [vmem:[#allocation39_spill] sm:$0xff] }
 0x1ea   : > { %vm1322_vm5 = vcmp.eq.f32.partialorder %v10435_v37, %v5866_v17  ;;  %vm1324_vm8 = vcmp.eq.f32.partialorder %v10436_v9, %v5866_v17  ;;  %vm1496_vm12 = vcmp.lt.s32.totalorder %v1493_v36, %v1366_v29  ;;  %vm1498_vm2 = vcmp.lt.s32.totalorder %v1495_v16, %v1368_v53 }
 0x1eb   : > { %v1370_v63 = vsel %vm1306_vm10, %v5787_v32, 256  ;;  %v1372_v3 = vsel %vm1308_vm13, %v5790_v7, 256  ;;  %v1497_v48 = vsel %vm1496_vm12, %v1493_v36, %v1366_v29  ;;  %v1499_v57 = vsel %vm1498_vm2, %v1495_v16, %v1368_v53  ;;  %v10439_v29 = vld [vmem:[#allocation41_spill] sm:$0xff] }
 0x1ec   : > { %vm1476_vm9 = vcmp.lt.s32.totalorder %v1474_v51, %v1475_v14  ;;  %vm1326_vm14 = vcmp.eq.f32.partialorder %v10437_v8, %v5866_v17  ;;  %vm1500_vm6 = vcmp.lt.s32.totalorder %v1497_v48, %v1370_v63  ;;  %vm1502_vm7 = vcmp.lt.s32.totalorder %v1499_v57, %v1372_v3 }
 0x1ed   : > { %v1374_v43 = vsel %vm1310_vm0, %v5793_v5, 256  ;;  %vm10438_vm10 = vcmp.eq.f32.partialorder %v10430_v23, %v5866_v17  ;;  %v1501_v42 = vsel %vm1500_vm6, %v1497_v48, %v1370_v63  ;;  %v1503_v4 = vsel %vm1502_vm7, %v1499_v57, %v1372_v3  ;;  %v10441_v63 = vld [vmem:[#allocation43_spill] sm:$0xff]  ;;  %v10442_v3 = vld [vmem:[#allocation45_spill] sm:$0xff] }
 0x1ee   : > { %v1376_v30 = vsel %vm10438_vm10, %v5796_v46, 256  ;;  %vm1328_vm13 = vcmp.eq.f32.partialorder %v10439_v29, %v5866_v17  ;;  %vm10440_vm4 = vcmp.eq.f32.partialorder %v10431_v19, %v5866_v17  ;;  %vm1504_vm15 = vcmp.lt.s32.totalorder %v1501_v42, %v1374_v43  ;;  %v10443_v48 = vld [vmem:[#allocation47_spill] sm:$0xff] }
 0x1ef   : > { %v1378_v16 = vsel %vm10440_vm4, %v5799_v2, 256  ;;  %vm1506_vm12 = vcmp.lt.s32.totalorder %v1503_v4, %v1376_v30  ;;  %v1477_v53 = vsel %vm1476_vm9, %v1474_v51, %v1475_v14  ;;  %v1380_v36 = vsel %vm1316_vm1, %v5802_v47, 256 }
 0x1f0   : > { %v1505_v23 = vsel %vm1504_vm15, %v1501_v42, %v1374_v43  ;;  %v1507_v59 = vsel %vm1506_vm12, %v1503_v4, %v1376_v30  ;;  %vm1330_vm0 = vcmp.eq.f32.partialorder %v10441_v63, %v5866_v17  ;;  %vm1332_vm2 = vcmp.eq.f32.partialorder %v10442_v3, %v5866_v17 }
 0x1f1   : > { %vm1508_vm6 = vcmp.lt.s32.totalorder %v1505_v23, %v1378_v16  ;;  %vm1510_vm7 = vcmp.lt.s32.totalorder %v1507_v59, %v1380_v36  ;;  %v1382_v51 = vsel %vm1318_vm11, %v5807_v25, 256  ;;  %v1384_v14 = vsel %vm1320_vm3, %v5810_v34, 256 }
 0x1f2   : > { %v1509_v42 = vsel %vm1508_vm6, %v1505_v23, %v1378_v16  ;;  %v1511_v30 = vsel %vm1510_vm7, %v1507_v59, %v1380_v36  ;;  %v1478_v4 = vrot.slane %v1477_v53, 2  ;;  %vm1334_vm1 = vcmp.eq.f32.partialorder %v10443_v48, %v5866_v17  ;;  %v10444_v23 = vld [vmem:[#allocation49_spill] sm:$0xff]  ;;  %v10445_v59 = vld [vmem:[#allocation52_spill] sm:$0xff] }
 0x1f3   : > { %vm1512_vm9 = vcmp.lt.s32.totalorder %v1509_v42, %v1382_v51  ;;  %vm1514_vm10 = vcmp.lt.s32.totalorder %v1511_v30, %v1384_v14  ;;  %v1386_v57 = vsel %vm1322_vm5, %v5813_v52, 256  ;;  %v1388_v43 = vsel %vm1324_vm8, %v5816_v6, 256  ;;  %v10510_v48 = vld [vmem:[#allocation17_spill] sm:$0xff] }
 0x1f4   : > { %v1513_v27 = vsel %vm1512_vm9, %v1509_v42, %v1382_v51  ;;  %v1515_v26 = vsel %vm1514_vm10, %v1511_v30, %v1384_v14  ;;  %vm1336_vm11 = vcmp.eq.f32.partialorder %v10444_v23, %v5866_v17  ;;  %vm1338_vm3 = vcmp.eq.f32.partialorder %v10445_v59, %v5866_v17  ;;  %v10446_v42 = vld [vmem:[#allocation53_spill] sm:$0xff] }
 0x1f5   : > { %vm1516_vm4 = vcmp.lt.s32.totalorder %v1513_v27, %v1386_v57  ;;  %vm1518_vm15 = vcmp.lt.s32.totalorder %v1515_v26, %v1388_v43  ;;  %v1390_v16 = vsel %vm1326_vm14, %v5819_v45, 256  ;;  %v1392_v36 = vsel %vm1328_vm13, %v5822_v38, 256 }
 0x1f6   : > { %v1517_v51 = vsel %vm1516_vm4, %v1513_v27, %v1386_v57  ;;  %v1519_v14 = vsel %vm1518_vm15, %v1515_v26, %v1388_v43  ;;  %vm1479_vm5 = vcmp.lt.s32.totalorder %v1477_v53, %v1478_v4  ;;  %vm1340_vm8 = vcmp.eq.f32.partialorder %v10446_v42, %v5866_v17  ;;  %v10447_v26 = vld [vmem:[#allocation57_spill] sm:$0xff] }
 0x1f7   : > { %vm1520_vm12 = vcmp.lt.s32.totalorder %v1517_v51, %v1390_v16  ;;  %vm1522_vm6 = vcmp.lt.s32.totalorder %v1519_v14, %v1392_v36  ;;  %v1394_v30 = vsel %vm1330_vm0, %v5825_v50, 256  ;;  %v1396_v8 = vsel %vm1332_vm2, %v5828_v15, 256 }
 0x1f8   : > { %v1521_v29 = vsel %vm1520_vm12, %v1517_v51, %v1390_v16  ;;  %v1523_v9 = vsel %vm1522_vm6, %v1519_v14, %v1392_v36  ;;  %vm1342_vm14 = vcmp.eq.f32.partialorder %v10447_v26, %v5866_v17  ;;  %v1398_v27 = vsel %vm1334_vm1, %v5831_v39, 256  ;;  %v10448_v16 = vld [vmem:[#allocation56_spill] sm:$0xff]  ;;  %v10449_v36 = vld [vmem:[#allocation59_spill] sm:$0xff]  ;;  %v10450_v51 = vld [vmem:[#allocation61_spill] sm:$0xff] }
 0x1f9   : > { %vm1524_vm13 = vcmp.lt.s32.totalorder %v1521_v29, %v1394_v30  ;;  %vm1526_vm7 = vcmp.lt.s32.totalorder %v1523_v9, %v1396_v8  ;;  %v1480_v57 = vsel %vm1479_vm5, %v1477_v53, %v1478_v4  ;;  %v1400_v43 = vsel %vm1336_vm11, %v5834_v61, 256 }
 0x1fa   : > { %v1525_v3 = vsel %vm1524_vm13, %v1521_v29, %v1394_v30  ;;  %v1527_v63 = vsel %vm1526_vm7, %v1523_v9, %v1396_v8  ;;  %vm1344_vm0 = vcmp.eq.f32.partialorder %v10448_v16, %v5866_v17  ;;  %vm1346_vm2 = vcmp.eq.f32.partialorder %v10449_v36, %v5866_v17  ;;  %v10506_v36 = vld [vmem:[#allocation21_spill] sm:$0xff] }
 0x1fb   : > { %vm1528_vm9 = vcmp.lt.s32.totalorder %v1525_v3, %v1398_v27  ;;  %vm1530_vm10 = vcmp.lt.s32.totalorder %v1527_v63, %v1400_v43  ;;  %v1402_v53 = vsel %vm1338_vm3, %v10409_v33, 256  ;;  %v1404_v4 = vsel %vm1340_vm8, %v10411_v13, 256 }
 0x1fc   : > { %v1529_v29 = vsel %vm1528_vm9, %v1525_v3, %v1398_v27  ;;  %v1531_v9 = vsel %vm1530_vm10, %v1527_v63, %v1400_v43  ;;  %v1481_v8 = vrot.slane %v1480_v57, 1  ;;  %vm1348_vm1 = vcmp.eq.f32.partialorder %v10450_v51, %v5866_v17  ;;  %v10483_v17 = vld [vmem:[#allocation11_spill] sm:$0xff] }
 0x1fd   : > { %vm1532_vm11 = vcmp.lt.s32.totalorder %v1529_v29, %v1402_v53  ;;  %vm1534_vm4 = vcmp.lt.s32.totalorder %v1531_v9, %v1404_v4  ;;  %v1406_v14 = vsel %vm1342_vm14, %v10412_v1, 256  ;;  %v1408_v30 = vsel %vm1344_vm0, %v10414_v22, 256 }
 0x1fe   : > { %v1533_v16 = vsel %vm1532_vm11, %v1529_v29, %v1402_v53  ;;  %v1535_v59 = vsel %vm1534_vm4, %v1531_v9, %v1404_v4  ;;  %v1410_v63 = vsel %vm1346_vm2, %v5857_v11, 256  ;;  %v1412_v3 = vsel %vm1348_vm1, %v5860_v18, 256 }
 0x1ff   : > { %vm1536_vm3 = vcmp.lt.s32.totalorder %v1533_v16, %v1406_v14  ;;  %vm1538_vm15 = vcmp.lt.s32.totalorder %v1535_v59, %v1408_v30  ;;  %vm1482_vm5 = vcmp.lt.s32.totalorder %v1480_v57, %v1481_v8 }
 0x200   : > { %v1537_v27 = vsel %vm1536_vm3, %v1533_v16, %v1406_v14  ;;  %v1539_v43 = vsel %vm1538_vm15, %v1535_v59, %v1408_v30  ;;  %v6222_v42 = vsel %vm1482_vm5, %v1480_v57, %v1481_v8  ;;  %v10451_v16 = vld [vmem:[#allocation14_spill] sm:$0xff]  ;;  %v10453_v8 = vld [vmem:[#allocation12_spill] sm:$0xff] }
 0x201   : > { %vm1540_vm8 = vcmp.lt.s32.totalorder %v1537_v27, %v1410_v63  ;;  %vm1542_vm12 = vcmp.lt.s32.totalorder %v1539_v43, %v1412_v3  ;;  %vm1555_vm13 = vcmp.eq.s32.totalorder %v5757_v40, %v6222_v42  ;;  %vm1557_vm7 = vcmp.eq.s32.totalorder %v5760_v60, %v6222_v42  ;;  %v10455_v30 = vld [vmem:[#allocation18_spill] sm:$0xff] }
 0x202   : > { %v1541_v51 = vsel %vm1540_vm8, %v1537_v27, %v1410_v63  ;;  %v1543_v26 = vsel %vm1542_vm12, %v1539_v43, %v1412_v3  ;;  %vm9888_vm0 = vcmp.eq.s32.totalorder %v10424_v54, %v6222_v42  ;;  %vm1561_vm2 = vcmp.eq.s32.totalorder %v10425_v21, %v6222_v42  ;;  %v10457_v3 = vld [vmem:[#allocation16_spill] sm:$0xff] }
 0x203   : > { %vm1544_vm6 = vcmp.lt.s32.totalorder %v1541_v51, %v1543_v26  ;;  %vm1563_vm9 = vcmp.eq.s32.totalorder %v5769_v55, %v6222_v42  ;;  %vm1565_vm10 = vcmp.eq.s32.totalorder %v5772_v58, %v6222_v42  ;;  %vm9889_vm1 = vcmp.eq.s32.totalorder %v5775_v31, %v6222_v42 }
 0x204   : > { %v1545_v53 = vsel %vm1544_vm6, %v1541_v51, %v1543_v26  ;;  %vm9891_vm11 = vcmp.eq.s32.totalorder %v5778_v10, %v6222_v42  ;;  %vm9890_vm4 = vcmp.eq.s32.totalorder %v5781_v62, %v6222_v42  ;;  %v6264_v9 = vsel %vm1555_vm13, 1e+30, %v10451_v16 }
 0x205   : > { %v1546_v4 = vrot.slane %v1545_v53, 4  ;;  %10452 = vst [vmem:[#allocation26_spill] sm:$0xff] %v6264_v9  ;;  %v6270_v51 = vsel %vm9888_vm0, 1e+30, %v10453_v8  ;;  %vm9903_vm8 = vcmp.eq.s32.totalorder %v5819_v45, %v6222_v42  ;;  %v6294_v63 = vsel %vm1557_vm7, 1e+30, %v10455_v30 }
 0x206   : > { %10454 = vst [vmem:[#allocation5_spill] sm:$0xff] %v6270_v51  ;;  %10456 = vst [vmem:[#allocation7_spill] sm:$0xff] %v6294_v63  ;;  %v6300_v27 = vsel %vm1561_vm2, 1e+30, %v10457_v3  ;;  %v1811_v43 = vmin.f32 %v6264_v9, %v6270_v51  ;;  %v6345_v16 = vsel %vm9891_vm11, 1e+30, %v5523_v28  ;;  %vm10472_vm11 = vcmp.eq.s32.totalorder %v5793_v5, %v6222_v42 }
 0x207   : > { %vm1547_vm14 = vcmp.lt.s32.totalorder %v1545_v53, %v1546_v4  ;;  %10458 = vst [vmem:[#allocation35_spill] sm:$0xff] %v6300_v27  ;;  %10464 = vst [vmem:[#allocation16_spill] sm:$0xff] %v6345_v16  ;;  %v6351_v8 = vsel %vm9890_vm4, 1e+30, %v5532_v41  ;;  %v1812_v30 = vmin.f32 %v6294_v63, %v6300_v27  ;;  %vm10468_vm4 = vcmp.eq.s32.totalorder %v5787_v32, %v6222_v42 }
 0x208   : > { %v1548_v29 = vsel %vm1547_vm14, %v1545_v53, %v1546_v4  ;;  %v10459_v53 = vld [vmem:[#allocation19_spill] sm:$0xff]  ;;  %v6371_v28 = vsel %vm10468_vm4, 1e+30, %v5552_v35  ;;  %vm10481_vm3 = vcmp.eq.s32.totalorder %v5802_v47, %v6222_v42  ;;  %v10503_v9 = vmov 1.0|1.0  }
 0x209   : > { %v1549_v59 = vrot.slane %v1548_v29, 2  ;;  %v6324_v4 = vsel %vm1563_vm9, 1e+30, %v10459_v53  ;;  %10465 = vst [vmem:[#allocation19_spill] sm:$0xff] %v6351_v8  ;;  %10469 = vst [vmem:[#allocation88_spill] sm:$0xff] %v6371_v28  ;;  %v10474_v35 = vld [vmem:[#allocation31_spill] sm:$0xff] }
 0x20a   : > { %10460 = vst [vmem:[#allocation14_spill] sm:$0xff] %v6324_v4  ;;  %v1813_v3 = vmin.f32 %v1811_v43, %v6324_v4  ;;  %v10480_v53 = vld [vmem:[#allocation6_spill] sm:$0xff]  ;;  %v10486_v4 = vld [vmem:[#allocation9_spill] sm:$0xff] }
 0x20b   : > { %vm1550_vm5 = vcmp.lt.s32.totalorder %v1548_v29, %v1549_v59 }
 0x20c   : > { %v1551_v26 = vsel %vm1550_vm5, %v1548_v29, %v1549_v59  ;;  %vm9961_vm5 = vcmp.eq.s32.totalorder %v5813_v52, %v6222_v42  ;;  %v10461_v29 = vld [vmem:[#allocation22_spill] sm:$0xff] }
 0x20d   : > { %v1552_v57 = vrot.slane %v1551_v26, 1  ;;  %v6330_v59 = vsel %vm1565_vm10, 1e+30, %v10461_v29  ;;  %v6416_v29 = vsel %vm10481_vm3, 1e+30, %v10480_v53  ;;  %v10491_v53 = vld [vmem:[#allocation36_spill] sm:$0xff]  ;;  %vm10492_vm3 = vcmp.eq.s32.totalorder %v5816_v6, %v6222_v42 }
 0x20e   : > { %10462 = vst [vmem:[#allocation12_spill] sm:$0xff] %v6330_v59  ;;  %10482 = vst [vmem:[#allocation6_spill] sm:$0xff] %v6416_v29  ;;  %v6440_v51 = vsel %vm10492_vm3, 1e+30, %v10491_v53  ;;  %vm10498_vm3 = vcmp.eq.s32.totalorder %v5822_v38, %v6222_v42 }
 0x20f   : > { %vm1553_vm14 = vcmp.lt.s32.totalorder %v1551_v26, %v1552_v57  ;;  %10493 = vst [vmem:[#allocation36_spill] sm:$0xff] %v6440_v51 }
 0x210   : > { %v6286_v14 = vsel %vm1553_vm14, %v1551_v26, %v1552_v57  ;;  %v6336_v26 = vsel %vm9889_vm1, 1e+30, %v5508_v24  ;;  %v9895_v57 = vmov 1.0|1.0   ;;  %vm10466_vm1 = vcmp.eq.s32.totalorder %v5784_v0, %v6222_v42 }
 0x211   : > { %vm1556_vm14 = vcmp.eq.s32.totalorder %v5757_v40, %v6286_v14  ;;  %vm1558_vm15 = vcmp.eq.s32.totalorder %v5760_v60, %v6286_v14  ;;  %vm1560_vm12 = vcmp.eq.s32.totalorder %v10424_v54, %v6286_v14  ;;  %vm1562_vm0 = vcmp.eq.s32.totalorder %v10425_v21, %v6286_v14  ;;  %10463 = vst [vmem:[#allocation18_spill] sm:$0xff] %v6336_v26  ;;  %v10512_v60 = vld [vmem:[#allocation44_spill] sm:$0xff] }
 0x212   : > { %vm4689_vm6 = vmpackc.low %vm1558_vm15, %vm1556_vm14  ;;  %v6357_v24 = vsel %vm10466_vm1, 1e+30, %v5543_v44  ;;  %vm10470_vm1 = vcmp.eq.s32.totalorder %v5790_v7, %v6222_v42  ;;  %v6383_v44 = vsel %vm10472_vm11, 1e+30, %v5575_v20  ;;  %vm1566_vm4 = vcmp.eq.s32.totalorder %v5772_v58, %v6286_v14  ;;  %v10477_v20 = vld [vmem:[#allocation33_spill] sm:$0xff]  ;;  %v10520_v21 = vld [vmem:[#allocation48_spill] sm:$0xff] }
 0x213   : > { %4690 = vmatprep.subr.msk.bf16.mxu1 %vm4689_vm6, %v9895_v57  ;;  %10467 = vst [vmem:[#allocation22_spill] sm:$0xff] %v6357_v24  ;;  %vm4691_vm6 = vmpackc.low %vm1557_vm7, %vm1555_vm13  ;;  %v6377_v41 = vsel %vm10470_vm1, 1e+30, %v5566_v12  ;;  %vm1564_vm7 = vcmp.eq.s32.totalorder %v5769_v55, %v6286_v14  ;;  %vm10475_vm11 = vcmp.eq.s32.totalorder %v5796_v46, %v6222_v42  ;;  %vm9960_vm1 = vcmp.eq.s32.totalorder %v10412_v1, %v6222_v42  ;;  %v10530_v58 = vld [vmem:[#allocation25_spill] sm:$0xff] }
 0x214   : > { %10471 = vst [vmem:[#allocation89_spill] sm:$0xff] %v6377_v41  ;;  %10473 = vst [vmem:[#allocation90_spill] sm:$0xff] %v6383_v44  ;;  %4692 = vmatpush1.bf16.msk.msra.mxu1 %vm4691_vm6, %v9895_v57  ;;  %v6401_v12 = vsel %vm10475_vm11, 1e+30, %v10474_v35  ;;  %vm10478_vm6 = vcmp.eq.s32.totalorder %v5799_v2, %v6222_v42  ;;  %vm10484_vm11 = vcmp.eq.s32.totalorder %v5807_v25, %v6222_v42 }
 0x215   : > { %vm4693_vm13 = vmpackc.low %vm1562_vm0, %vm1560_vm12  ;;  %10476 = vst [vmem:[#allocation31_spill] sm:$0xff] %v6401_v12  ;;  %v6407_v43 = vsel %vm10478_vm6, 1e+30, %v10477_v20  ;;  %v6422_v35 = vsel %vm10484_vm11, 1e+30, %v10483_v17  ;;  %vm10487_vm6 = vcmp.eq.s32.totalorder %v5810_v34, %v6222_v42  ;;  %v10494_v17 = vld [vmem:[#allocation38_spill] sm:$0xff] }
 0x216   : > { %10479 = vst [vmem:[#allocation33_spill] sm:$0xff] %v6407_v43  ;;  %4694 = vmatprep.subr.msk.bf16.mxu1 %vm4693_vm13, %v9895_v57  ;;  %10485 = vst [vmem:[#allocation11_spill] sm:$0xff] %v6422_v35  ;;  %v6428_v20 = vsel %vm10487_vm6, 1e+30, %v10486_v4  ;;  %v10489_v57 = vld [vmem:[#allocation34_spill] sm:$0xff]  ;;  %v1814_v4 = vmin.f32 %v1812_v30, %v6330_v59  ;;  %vm10496_vm13 = vcmp.eq.s32.totalorder %v10424_v54, %v6222_v42 }
 0x217   : > { %10488 = vst [vmem:[#allocation9_spill] sm:$0xff] %v6428_v20  ;;  %v6434_v27 = vsel %vm9961_vm5, 1e+30, %v10489_v57  ;;  %v6446_v63 = vsel %vm9903_vm8, 1e+30, %v10494_v17  ;;  %vm4695_vm11 = vmpackc.low %vm1561_vm2, %vm10496_vm13  ;;  %vm1568_vm6 = vcmp.eq.s32.totalorder %v5775_v31, %v6286_v14  ;;  %v10497_v57 = vld [vmem:[#allocation40_spill] sm:$0xff]  ;;  %vm10501_vm8 = vcmp.eq.s32.totalorder %v5825_v50, %v6222_v42 }
 0x218   : > { %10490 = vst [vmem:[#allocation34_spill] sm:$0xff] %v6434_v27  ;;  %10495 = vst [vmem:[#allocation38_spill] sm:$0xff] %v6446_v63  ;;  %v6461_v53 = vsel %vm10498_vm3, 1e+30, %v10497_v57  ;;  %v10500_v17 = vld [vmem:[#allocation42_spill] sm:$0xff]  ;;  %v1815_v59 = vmin.f32 %v1813_v3, %v6336_v26  ;;  %4696 = vmatpush1.bf16.msk.msra.mxu1 %vm4695_vm11, %v10503_v9  ;;  %vm1570_vm13 = vcmp.eq.s32.totalorder %v5778_v10, %v6286_v14  ;;  %v10504_v57 = vld [vmem:[#allocation15_spill] sm:$0xff] }
 0x219   : > { %10499 = vst [vmem:[#allocation40_spill] sm:$0xff] %v6461_v53  ;;  %v6467_v30 = vsel %vm10501_vm8, 1e+30, %v10500_v17  ;;  %vm4697_vm2 = vmpackc.low %vm1566_vm4, %vm1564_vm7  ;;  %v6483_v17 = vsel %vm1556_vm14, 1e+30, %v10504_v57  ;;  %v10508_v26 = vld [vmem:[#allocation13_spill] sm:$0xff]  ;;  %vm10516_vm8 = vcmp.eq.s32.totalorder %v5831_v39, %v6222_v42  ;;  %vm1572_vm14 = vcmp.eq.s32.totalorder %v5781_v62, %v6286_v14 }
 0x21a   : > { %10502 = vst [vmem:[#allocation42_spill] sm:$0xff] %v6467_v30  ;;  %10505 = vst [vmem:[#allocation15_spill] sm:$0xff] %v6483_v17  ;;  %v6489_v3 = vsel %vm1558_vm15, 1e+30, %v10506_v36  ;;  %v6495_v23 = vsel %vm1560_vm12, 1e+30, %v10508_v26  ;;  %4698 = vmatprep.subr.msk.bf16.mxu1 %vm4697_vm2, %v10503_v9  ;;  %vm10513_vm15 = vcmp.eq.s32.totalorder %v5828_v15, %v6222_v42  ;;  %vm10533_vm11 = vcmp.eq.s32.totalorder %v10411_v13, %v6222_v42 }
 0x21b   : > { %10507 = vst [vmem:[#allocation21_spill] sm:$0xff] %v6489_v3  ;;  %10509 = vst [vmem:[#allocation13_spill] sm:$0xff] %v6495_v23  ;;  %v6502_v57 = vsel %vm1562_vm0, 1e+30, %v10510_v48  ;;  %v1848_v40 = vmin.f32 %v6483_v17, %v6495_v23  ;;  %v6510_v36 = vsel %vm10513_vm15, 1e+30, %v10512_v60  ;;  %vm10521_vm0 = vcmp.eq.s32.totalorder %v5834_v61, %v6222_v42 }
 0x21c   : > { %10511 = vst [vmem:[#allocation17_spill] sm:$0xff] %v6502_v57  ;;  %10514 = vst [vmem:[#allocation44_spill] sm:$0xff] %v6510_v36  ;;  %v10515_v54 = vld [vmem:[#allocation46_spill] sm:$0xff]  ;;  %v10518_v30 = vld [vmem:[#allocation20_spill] sm:$0xff]  ;;  %v1849_v23 = vmin.f32 %v6489_v3, %v6502_v57  ;;  %v6530_v60 = vsel %vm10521_vm0, 1e+30, %v10520_v21  ;;  %v1816_v17 = vmin.f32 %v1814_v4, %v6345_v16  ;;  %v1817_v4 = vmin.f32 %v1815_v59, %v6351_v8 }
 0x21d   : > { %v6516_v26 = vsel %vm10516_vm8, 1e+30, %v10515_v54  ;;  %v6522_v48 = vsel %vm1564_vm7, 1e+30, %v10518_v30  ;;  %10522 = vst [vmem:[#allocation48_spill] sm:$0xff] %v6530_v60  ;;  %vm4699_vm12 = vmpackc.low %vm1565_vm10, %vm1563_vm9  ;;  %v10523_v54 = vld [vmem:[#allocation23_spill] sm:$0xff]  ;;  %vm1574_vm10 = vcmp.eq.s32.totalorder %v5784_v0, %v6286_v14  ;;  %vm10528_vm7 = vcmp.eq.s32.totalorder %v10409_v33, %v6222_v42 }
 0x21e   : > { %10517 = vst [vmem:[#allocation46_spill] sm:$0xff] %v6516_v26  ;;  %10519 = vst [vmem:[#allocation20_spill] sm:$0xff] %v6522_v48  ;;  %v6545_v30 = vsel %vm1566_vm4, 1e+30, %v10523_v54  ;;  %v1850_v21 = vmin.f32 %v1848_v40, %v6522_v48  ;;  %4700 = vmatpush1.bf16.msk.msra.mxu1 %vm4699_vm12, %v10503_v9  ;;  %v10525_v57 = vld [vmem:[#allocation24_spill] sm:$0xff]  ;;  %v10527_v59 = vld [vmem:[#allocation50_spill] sm:$0xff]  ;;  %vm1576_vm4 = vcmp.eq.s32.totalorder %v5787_v32, %v6286_v14 }
 0x21f   : > { %10524 = vst [vmem:[#allocation23_spill] sm:$0xff] %v6545_v30  ;;  %vm4701_vm9 = vmpackc.low %vm1570_vm13, %vm1568_vm6  ;;  %v6562_v54 = vsel %vm1568_vm6, 1e+30, %v10525_v57  ;;  %v1851_v40 = vmin.f32 %v1849_v23, %v6545_v30  ;;  %v6569_v48 = vsel %vm10528_vm7, 1e+30, %v10527_v59  ;;  %v10532_v23 = vld [vmem:[#allocation51_spill] sm:$0xff]  ;;  %vm1578_vm6 = vcmp.eq.s32.totalorder %v5790_v7, %v6286_v14 }
 0x220   : > { %10526 = vst [vmem:[#allocation24_spill] sm:$0xff] %v6562_v54  ;;  %10529 = vst [vmem:[#allocation50_spill] sm:$0xff] %v6569_v48  ;;  %4702 = vmatprep.subr.msk.bf16.mxu1 %vm4701_vm9, %v10503_v9  ;;  %v6578_v55 = vsel %vm1570_vm13, 1e+30, %v10530_v58  ;;  %v1852_v57 = vmin.f32 %v1850_v21, %v6562_v54  ;;  %v6585_v30 = vsel %vm10533_vm11, 1e+30, %v10532_v23  ;;  %v1818_v8 = vmin.f32 %v1816_v17, %v6357_v24 }
 0x221   : > { %10531 = vst [vmem:[#allocation25_spill] sm:$0xff] %v6578_v55  ;;  %10534 = vst [vmem:[#allocation51_spill] sm:$0xff] %v6585_v30  ;;  %v6593_v59 = vsel %vm1572_vm14, 1e+30, %v10423_v56  ;;  %v1853_v58 = vmin.f32 %v1851_v40, %v6578_v55  ;;  %vm10536_vm3 = vcmp.eq.s32.totalorder %v5775_v31, %v6222_v42  ;;  %vm10537_vm2 = vcmp.eq.s32.totalorder %v5778_v10, %v6222_v42  ;;  %v10538_v21 = vld [vmem:[#allocation27_spill] sm:$0xff]  ;;  %v10540_v23 = vld [vmem:[#allocation28_spill] sm:$0xff] }
 0x222   : > { %10535 = vst [vmem:[#allocation91_spill] sm:$0xff] %v6593_v59  ;;  %vm4703_vm13 = vmpackc.low %vm10537_vm2, %vm10536_vm3  ;;  %vm1580_vm15 = vcmp.eq.s32.totalorder %v5793_v5, %v6286_v14  ;;  %v6609_v56 = vsel %vm1574_vm10, 1e+30, %v10538_v21  ;;  %v1854_v40 = vmin.f32 %v1852_v57, %v6593_v59  ;;  %v1819_v17 = vmin.f32 %v1817_v4, %v6371_v28  ;;  %v10542_v57 = vld [vmem:[#allocation54_spill] sm:$0xff]  ;;  %v10544_v55 = vld [vmem:[#allocation29_spill] sm:$0xff] }
 0x223   : > { %10539 = vst [vmem:[#allocation27_spill] sm:$0xff] %v6609_v56  ;;  %4704 = vmatpush1.bf16.msk.msra.mxu1 %vm4703_vm13, %v10503_v9  ;;  %vm4705_vm8 = vmpackc.low %vm1574_vm10, %vm1572_vm14  ;;  %vm1582_vm0 = vcmp.eq.s32.totalorder %v5796_v46, %v6286_v14  ;;  %v6626_v21 = vsel %vm1576_vm4, 1e+30, %v10540_v23  ;;  %v1855_v4 = vmin.f32 %v1853_v58, %v6609_v56  ;;  %v6633_v59 = vsel %vm9960_vm1, 1e+30, %v10542_v57  ;;  %v10546_v57 = vld [vmem:[#allocation30_spill] sm:$0xff] }
 0x224   : > { %10541 = vst [vmem:[#allocation28_spill] sm:$0xff] %v6626_v21  ;;  %10543 = vst [vmem:[#allocation54_spill] sm:$0xff] %v6633_v59  ;;  %4706 = vmatprep.subr.msk.bf16.mxu1 %vm4705_vm8, %v10503_v9  ;;  %vm1584_vm12 = vcmp.eq.s32.totalorder %v5799_v2, %v6286_v14  ;;  %vm1586_vm14 = vcmp.eq.s32.totalorder %v5802_v47, %v6286_v14  ;;  %v6644_v23 = vsel %vm1578_vm6, 1e+30, %v10544_v55  ;;  %v6653_v56 = vsel %vm1580_vm15, 1e+30, %v10546_v57 }
 0x225   : > { %10545 = vst [vmem:[#allocation29_spill] sm:$0xff] %v6644_v23  ;;  %v1856_v58 = vmin.f32 %v1854_v40, %v6626_v21  ;;  %vm1588_vm9 = vcmp.eq.s32.totalorder %v5807_v25, %v6286_v14  ;;  %10547 = vst [vmem:[#allocation30_spill] sm:$0xff] %v6653_v56  ;;  %v1857_v54 = vmin.f32 %v1855_v4, %v6644_v23  ;;  %v10550_v55 = vld [vmem:[#allocation32_spill] sm:$0xff]  ;;  %v6686_v57 = vsel %vm1584_vm12, 1e+30, %v10431_v19  ;;  %v10574_v21 = vld [vmem:[#allocation42_spill] sm:$0xff] }
 0x226   : > { %v1820_v10 = vmin.f32 %v1818_v8, %v6377_v41  ;;  %vm10548_vm10 = vcmp.eq.s32.totalorder %v5781_v62, %v6222_v42  ;;  %vm10549_vm7 = vcmp.eq.s32.totalorder %v5784_v0, %v6222_v42  ;;  %vm1590_vm3 = vcmp.eq.s32.totalorder %v5810_v34, %v6286_v14  ;;  %vm4709_vm2 = vmpackc.low %vm1578_vm6, %vm1576_vm4  ;;  %10552 = vst [vmem:[#allocation92_spill] sm:$0xff] %v6686_v57 }
 0x227   : > { %vm4707_vm11 = vmpackc.low %vm10549_vm7, %vm10548_vm10  ;;  %v6669_v40 = vsel %vm1582_vm0, 1e+30, %v10550_v55  ;;  %v1858_v4 = vmin.f32 %v1856_v58, %v6653_v56  ;;  %v1821_v8 = vmin.f32 %v1819_v17, %v6383_v44  ;;  %vm1592_vm13 = vcmp.eq.s32.totalorder %v5813_v52, %v6286_v14 }
 0x228   : > { %10551 = vst [vmem:[#allocation32_spill] sm:$0xff] %v6669_v40  ;;  %4708 = vmatpush1.bf16.msk.msra.mxu1 %vm4707_vm11, %v10503_v9  ;;  %v1859_v17 = vmin.f32 %v1857_v54, %v6669_v40  ;;  %v1822_v58 = vmin.f32 %v1820_v10, %v6401_v12  ;;  %vm1594_vm8 = vcmp.eq.s32.totalorder %v5816_v6, %v6286_v14  ;;  %v6697_v55 = vsel %vm1586_vm14, 1e+30, %v10432_v49  ;;  %v10554_v10 = vld [vmem:[#allocation8_spill] sm:$0xff]  ;;  %v10558_v49 = vld [vmem:[#allocation10_spill] sm:$0xff] }
 0x229   : > { %4710 = vmatprep.subr.msk.bf16.mxu1 %vm4709_vm2, %v10503_v9  ;;  %10553 = vst [vmem:[#allocation93_spill] sm:$0xff] %v6697_v55  ;;  %v1860_v56 = vmin.f32 %v1858_v4, %v6686_v57  ;;  %v1823_v19 = vmin.f32 %v1821_v8, %v6407_v43  ;;  %vm9962_vm4 = vcmp.eq.s32.totalorder %v5819_v45, %v6286_v14  ;;  %v6708_v54 = vsel %vm1588_vm9, 1e+30, %v10554_v10  ;;  %vm4713_vm2 = vmpackc.low %vm1582_vm0, %vm1580_vm15 }
 0x22a   : > { %10555 = vst [vmem:[#allocation8_spill] sm:$0xff] %v6708_v54  ;;  %v1861_v40 = vmin.f32 %v1859_v17, %v6697_v55  ;;  %v1824_v23 = vmin.f32 %v1822_v58, %v6416_v29  ;;  %vm10556_vm6 = vcmp.eq.s32.totalorder %v5787_v32, %v6222_v42  ;;  %vm10557_vm10 = vcmp.eq.s32.totalorder %v5790_v7, %v6222_v42  ;;  %v6741_v58 = vld [vmem:[%s6721_s26] sm:$0xff] }
 0x22b   : > { %vm4711_vm7 = vmpackc.low %vm10557_vm10, %vm10556_vm6  ;;  %vm1598_vm11 = vcmp.eq.s32.totalorder %v5822_v38, %v6286_v14  ;;  %v6729_v4 = vsel %vm1590_vm3, 1e+30, %v10558_v49  ;;  %v1862_v8 = vmin.f32 %v1860_v56, %v6708_v54  ;;  %v1825_v17 = vmin.f32 %v1823_v19, %v6422_v35  ;;  %v10562_v54 = vld [vmem:[#allocation37_spill] sm:$0xff] }
 0x22c   : > { %10559 = vst [vmem:[#allocation10_spill] sm:$0xff] %v6729_v4  ;;  %4712 = vmatpush1.bf16.msk.msra.mxu1 %vm4711_vm7, %v10503_v9  ;;  %v6747_v10 = vsel %vm1592_vm13, 1e+30, %v10435_v37  ;;  %v1863_v56 = vmin.f32 %v1861_v40, %v6729_v4  ;;  %vm1613_vm6 = vcmp.eq.s32.totalorder %v10414_v22, %v6222_v42  ;;  %v1826_v19 = vmin.f32 %v1824_v23, %v6428_v20  ;;  %v10564_v4 = vld [vmem:[#allocation39_spill] sm:$0xff] }
 0x22d   : > { %10560 = vst [vmem:[#allocation94_spill] sm:$0xff] %v6747_v10  ;;  %4714 = vmatprep.subr.msk.bf16.mxu1 %vm4713_vm2, %v10503_v9  ;;  %v6756_v49 = vcombine.high %v6741_v58, %v6741_v58  ;;  %vm9976_vm15 = vcmp.eq.s32.totalorder %v5825_v50, %v6286_v14  ;;  %v6764_v37 = vsel %vm1594_vm8, 1e+30, %v10562_v54  ;;  %v1864_v40 = vmin.f32 %v1862_v8, %v6747_v10 }
 0x22e   : > { %10563 = vst [vmem:[#allocation37_spill] sm:$0xff] %v6764_v37  ;;  %vm1615_vm0 = vcmp.eq.s32.totalorder %v5857_v11, %v6222_v42  ;;  %v1827_v23 = vmin.f32 %v1825_v17, %v6434_v27  ;;  %vm9975_vm10 = vcmp.eq.s32.totalorder %v5828_v15, %v6286_v14  ;;  %v6776_v55 = vsel %vm9962_vm4, 1e+30, %v10564_v4  ;;  %v10568_v4 = vld [vmem:[#allocation41_spill] sm:$0xff] }
 0x22f   : > { %10561 = vst [vmem:[#allocation95_spill] sm:$0xff] %v6756_v49  ;;  %10565 = vst [vmem:[#allocation39_spill] sm:$0xff] %v6776_v55  ;;  %v1865_v57 = vmin.f32 %v1863_v56, %v6764_v37  ;;  %vm9998_vm7 = vcmp.eq.s32.totalorder %v5860_v18, %v6222_v42  ;;  %v1828_v54 = vmin.f32 %v1826_v19, %v6440_v51  ;;  %3614 = vmatprep.mubr.f32.mxu1 %v6756_v49  ;;  %v10570_v19 = vld [vmem:[#allocation43_spill] sm:$0xff] }
 0x230   : > { %vm10566_vm2 = vcmp.eq.s32.totalorder %v5793_v5, %v6222_v42  ;;  %vm10567_vm1 = vcmp.eq.s32.totalorder %v5796_v46, %v6222_v42  ;;  %3756 = vmatprep.mubr.f32.mxu0 %v6756_v49  ;;  %vm1604_vm4 = vcmp.eq.s32.totalorder %v5831_v39, %v6286_v14  ;;  %v6796_v8 = vsel %vm1598_vm11, 1e+30, %v10568_v4 }
 0x231   : > { %vm4715_vm5 = vmpackc.low %vm10567_vm1, %vm10566_vm2  ;;  %10569 = vst [vmem:[#allocation41_spill] sm:$0xff] %v6796_v8  ;;  %v1866_v17 = vmin.f32 %v1864_v40, %v6776_v55  ;;  %v1829_v56 = vmin.f32 %v1827_v23, %v6446_v63  ;;  %vm1606_vm2 = vcmp.eq.s32.totalorder %v5834_v61, %v6286_v14  ;;  %v6813_v4 = vsel %vm9976_vm15, 1e+30, %v10570_v19  ;;  %v10572_v55 = vld [vmem:[#allocation45_spill] sm:$0xff] }
 0x232   : > { %4716 = vmatpush1.bf16.msk.msra.mxu1 %vm4715_vm5, %v10503_v9  ;;  %vm4717_vm1 = vmpackc.low %vm1586_vm14, %vm1584_vm12  ;;  %10571 = vst [vmem:[#allocation43_spill] sm:$0xff] %v6813_v4  ;;  %v1867_v40 = vmin.f32 %v1865_v57, %v6796_v8  ;;  %v1830_v23 = vmin.f32 %v1828_v54, %v6461_v53  ;;  %vm1608_vm5 = vcmp.eq.s32.totalorder %v10409_v33, %v6286_v14  ;;  %v6824_v37 = vsel %vm9975_vm10, 1e+30, %v10572_v55  ;;  %v10575_v57 = vld [vmem:[#allocation47_spill] sm:$0xff]  ;;  %v10579_v55 = vld [vmem:[#allocation49_spill] sm:$0xff] }
 0x233   : > { %4718 = vmatprep.subr.msk.bf16.mxu1 %vm4717_vm1, %v10503_v9  ;;  %10573 = vst [vmem:[#allocation45_spill] sm:$0xff] %v6824_v37  ;;  %v1868_v10 = vmin.f32 %v1866_v17, %v6813_v4  ;;  %v1831_v19 = vmin.f32 %v1829_v56, %v10574_v21  ;;  %vm9985_vm12 = vcmp.eq.s32.totalorder %v10411_v13, %v6286_v14  ;;  %v6834_v54 = vsel %vm1604_vm4, 1e+30, %v10575_v57 }
 0x234   : > { %10576 = vst [vmem:[#allocation47_spill] sm:$0xff] %v6834_v54  ;;  %v1869_v8 = vmin.f32 %v1867_v40, %v6824_v37  ;;  %v1832_v49 = vmin.f32 %v1830_v23, %v6510_v36  ;;  %vm10577_vm14 = vcmp.eq.s32.totalorder %v5799_v2, %v6222_v42  ;;  %vm10578_vm1 = vcmp.eq.s32.totalorder %v5802_v47, %v6222_v42  ;;  %v10581_v23 = vld [vmem:[#allocation52_spill] sm:$0xff] }
 0x235   : > { %vm4719_vm10 = vmpackc.low %vm10578_vm1, %vm10577_vm14  ;;  %vm1612_vm15 = vcmp.eq.s32.totalorder %v10412_v1, %v6286_v14  ;;  %v6850_v17 = vsel %vm1606_vm2, 1e+30, %v10579_v55  ;;  %v1870_v56 = vmin.f32 %v1868_v10, %v6834_v54  ;;  %v1833_v40 = vmin.f32 %v1831_v19, %v6516_v26  ;;  %v10583_v55 = vld [vmem:[#allocation53_spill] sm:$0xff] }
 0x236   : > { %10580 = vst [vmem:[#allocation49_spill] sm:$0xff] %v6850_v17  ;;  %4720 = vmatpush1.bf16.msk.msra.mxu1 %vm4719_vm10, %v10503_v9  ;;  %vm4721_vm14 = vmpackc.low %vm1590_vm3, %vm1588_vm9  ;;  %vm1614_vm1 = vcmp.eq.s32.totalorder %v10414_v22, %v6286_v14  ;;  %v6867_v57 = vsel %vm1608_vm5, 1e+30, %v10581_v23  ;;  %v1871_v10 = vmin.f32 %v1869_v8, %v6850_v17  ;;  %v1834_v19 = vmin.f32 %v1832_v49, %v6530_v60  ;;  %v10585_v8 = vld [vmem:[#allocation57_spill] sm:$0xff] }
 0x237   : > { %10582 = vst [vmem:[#allocation52_spill] sm:$0xff] %v6867_v57  ;;  %4722 = vmatprep.subr.msk.bf16.mxu1 %vm4721_vm14, %v10503_v9  ;;  %vm1616_vm10 = vcmp.eq.s32.totalorder %v5857_v11, %v6286_v14  ;;  %v6878_v54 = vsel %vm9985_vm12, 1e+30, %v10583_v55  ;;  %v1872_v37 = vmin.f32 %v1870_v56, %v6867_v57  ;;  %v1835_v23 = vmin.f32 %v1833_v40, %v6569_v48  ;;  %v10589_v56 = vld [vmem:[#allocation56_spill] sm:$0xff]  ;;  %v10597_v57 = vld [vmem:[#allocation61_spill] sm:$0xff] }
 0x238   : > { %10584 = vst [vmem:[#allocation53_spill] sm:$0xff] %v6878_v54  ;;  %vm1618_vm9 = vcmp.eq.s32.totalorder %v5860_v18, %v6286_v14  ;;  %v6888_v49 = vsel %vm1612_vm15, 1e+30, %v10585_v8  ;;  %v1873_v17 = vmin.f32 %v1871_v10, %v6878_v54  ;;  %v1836_v4 = vmin.f32 %v1834_v19, %v6585_v30  ;;  %v10591_v8 = vld [vmem:[#allocation55_spill] sm:$0xff] }
 0x239   : > { %10586 = vst [vmem:[#allocation57_spill] sm:$0xff] %v6888_v49  ;;  %vm10587_vm3 = vcmp.eq.s32.totalorder %v5807_v25, %v6222_v42  ;;  %vm10588_vm14 = vcmp.eq.s32.totalorder %v5810_v34, %v6222_v42  ;;  %v6902_v40 = vsel %vm1614_vm1, 1e+30, %v10589_v56  ;;  %v1874_v55 = vmin.f32 %v1872_v37, %v6888_v49  ;;  %v10593_v56 = vld [vmem:[#allocation59_spill] sm:$0xff]  ;;  %v10595_v49 = vld [vmem:[#allocation58_spill] sm:$0xff]  ;;  %v10599_v25 = vld [vmem:[#allocation60_spill] sm:$0xff] }
 0x23a   : > { %vm4723_vm12 = vmpackc.low %vm10588_vm14, %vm10587_vm3  ;;  %10590 = vst [vmem:[#allocation56_spill] sm:$0xff] %v6902_v40  ;;  %v6909_v10 = vsel %vm1613_vm6, 1e+30, %v10591_v8  ;;  %v1837_v19 = vmin.f32 %v1835_v23, %v6633_v59  ;;  %v6923_v37 = vsel %vm1616_vm10, 1e+30, %v10593_v56  ;;  %v1875_v8 = vmin.f32 %v1873_v17, %v6902_v40 }
 0x23b   : > { %10592 = vst [vmem:[#allocation55_spill] sm:$0xff] %v6909_v10  ;;  %4724 = vmatpush1.bf16.msk.msra.mxu1 %vm4723_vm12, %v10503_v9  ;;  %vm4725_vm3 = vmpackc.low %vm1594_vm8, %vm1592_vm13  ;;  %v6930_v23 = vsel %vm1615_vm0, 1e+30, %v10595_v49  ;;  %v1838_v54 = vmin.f32 %v1836_v4, %v6909_v10  ;;  %v6938_v34 = vsel %vm1618_vm9, 1e+30, %v10597_v57  ;;  %v1876_v56 = vmin.f32 %v1874_v55, %v6923_v37 }
 0x23c   : > { %10594 = vst [vmem:[#allocation59_spill] sm:$0xff] %v6923_v37  ;;  %10596 = vst [vmem:[#allocation58_spill] sm:$0xff] %v6930_v23  ;;  %4726 = vmatprep.subr.msk.bf16.mxu1 %vm4725_vm3, %v10503_v9  ;;  %v6945_v17 = vsel %vm9998_vm7, 1e+30, %v10599_v25  ;;  %v1839_v49 = vmin.f32 %v1837_v19, %v6930_v23  ;;  %v1877_v4 = vmin.f32 %v1875_v8, %v6938_v34  ;;  %v10628_v37 = vld [vmem:[#allocation18_spill] sm:$0xff] }
 0x23d   : > { %10598 = vst [vmem:[#allocation61_spill] sm:$0xff] %v6938_v34  ;;  %10600 = vst [vmem:[#allocation60_spill] sm:$0xff] %v6945_v17  ;;  %v1840_v40 = vmin.f32 %v1838_v54, %v6945_v17  ;;  %vm10601_vm13 = vcmp.eq.s32.totalorder %v5813_v52, %v6222_v42  ;;  %vm10602_vm8 = vcmp.eq.s32.totalorder %v5816_v6, %v6222_v42  ;;  %v10627_v34 = vld [vmem:[#allocation12_spill] sm:$0xff] }
 0x23e   : > { %vm4727_vm12 = vmpackc.low %vm10602_vm8, %vm10601_vm13  ;;  %vm10603_vm14 = vcmp.eq.s32.totalorder %v5819_v45, %v6286_v14  ;;  %v1878_v25 = vmin.f32 %v1876_v56, %v1877_v4  ;;  %vm10604_vm7 = vcmp.eq.s32.totalorder %v5819_v45, %v6222_v42  ;;  %vm10605_vm13 = vcmp.eq.s32.totalorder %v5822_v38, %v6222_v42 }
 0x23f   : > { %4728 = vmatpush1.bf16.msk.msra.mxu1 %vm4727_vm12, %v10503_v9  ;;  %vm4729_vm3 = vmpackc.low %vm1598_vm11, %vm10603_vm14  ;;  %v1841_v57 = vmin.f32 %v1839_v49, %v1840_v40  ;;  %vm10606_vm12 = vcmp.eq.s32.totalorder %v5825_v50, %v6286_v14  ;;  %vm10607_vm11 = vcmp.eq.s32.totalorder %v5828_v15, %v6286_v14 }
 0x240   : > { %4730 = vmatprep.subr.msk.bf16.mxu1 %vm4729_vm3, %v10503_v9  ;;  %v1879_v54 = vrot.slane %v1878_v25, 4  ;;  %vm4731_vm8 = vmpackc.low %vm10605_vm13, %vm10604_vm7  ;;  %vm10608_vm3 = vcmp.eq.s32.totalorder %v5825_v50, %v6222_v42  ;;  %vm10609_vm7 = vcmp.eq.s32.totalorder %v5828_v15, %v6222_v42 }
 0x241   : > { %v1842_v55 = vrot.slane %v1841_v57, 4  ;;  %vm4733_vm14 = vmpackc.low %vm10607_vm11, %vm10606_vm12  ;;  %vm10610_vm12 = vcmp.eq.s32.totalorder %v5831_v39, %v6222_v42  ;;  %vm10611_vm11 = vcmp.eq.s32.totalorder %v5834_v61, %v6222_v42 }
 0x242   : > { %v1880_v40 = vmin.f32 %v1878_v25, %v1879_v54  ;;  %vm4735_vm13 = vmpackc.low %vm10609_vm7, %vm10608_vm3 }
 0x243   : > { %4732 = vmatpush1.bf16.msk.msra.mxu1 %vm4731_vm8, %v10503_v9  ;;  %v1843_v19 = vmin.f32 %v1841_v57, %v1842_v55  ;;  %vm4737_vm8 = vmpackc.low %vm1606_vm2, %vm1604_vm4  ;;  %vm10612_vm4 = vcmp.eq.s32.totalorder %v10411_v13, %v6286_v14 }
 0x244   : > { %4734 = vmatprep.subr.msk.bf16.mxu1 %vm4733_vm14, %v10503_v9  ;;  %v1881_v8 = vrot.slane %v1880_v40, 2  ;;  %vm4739_vm14 = vmpackc.low %vm10611_vm11, %vm10610_vm12  ;;  %vm10619_vm12 = vcmp.eq.s32.totalorder %v10411_v13, %v6222_v42 }
 0x245   : > { %v1844_v56 = vrot.slane %v1843_v19, 2  ;;  %vm4741_vm2 = vmpackc.low %vm10612_vm4, %vm1608_vm5  ;;  %vm10618_vm5 = vcmp.eq.s32.totalorder %v10409_v33, %v6222_v42 }
 0x246   : > { %v1882_v49 = vmin.f32 %v1880_v40, %v1881_v8  ;;  %v10615_v40 = vld [vmem:[#allocation15_spill] sm:$0xff]  ;;  %vm4743_vm11 = vmpackc.low %vm10619_vm12, %vm10618_vm5 }
 0x247   : > { %4736 = vmatpush1.bf16.msk.msra.mxu1 %vm4735_vm13, %v10503_v9  ;;  %v1845_v4 = vmin.f32 %v1843_v19, %v1844_v56  ;;  %v10616_v19 = vld [vmem:[#allocation26_spill] sm:$0xff]  ;;  %v10617_v8 = vld [vmem:[#allocation7_spill] sm:$0xff] }
 0x248   : > { %4738 = vmatprep.subr.msk.bf16.mxu1 %vm4737_vm8, %v10503_v9  ;;  %v1883_v25 = vrot.slane %v1882_v49, 1  ;;  %v10620_v56 = vld [vmem:[#allocation62_spill] sm:$0xff] }
 0x249   : > { %v1846_v57 = vrot.slane %v1845_v4, 1 }
 0x24a   : > { %v7005_v54 = vmin.f32 %v1882_v49, %v1883_v25 }
 0x24b   : > { %4740 = vmatpush1.bf16.msk.msra.mxu1 %vm4739_vm14, %v10503_v9  ;;  %v7007_v55 = vmin.f32 %v1845_v4, %v1846_v57  ;;  %v10622_v4 = vld [vmem:[#allocation63_spill] sm:$0xff]  ;;  %v10624_v57 = vld [vmem:[#allocation5_spill] sm:$0xff] }
 0x24c   : > { %10613 = vst [vmem:[#allocation96_spill] sm:$0xff] %v7005_v54  ;;  %4742 = vmatprep.subr.msk.bf16.mxu1 %vm4741_vm2, %v10503_v9  ;;  %vm1886_vm3 = vcmp.eq.f32.partialorder %v10615_v40, %v7005_v54  ;;  %vm1888_vm7 = vcmp.eq.f32.partialorder %v6489_v3, %v7005_v54  ;;  %v10625_v3 = vld [vmem:[#allocation35_spill] sm:$0xff]  ;;  %vm4745_vm2 = vmpackc.low %vm1614_vm1, %vm1612_vm15  ;;  %v10626_v40 = vld [vmem:[#allocation14_spill] sm:$0xff]  ;;  %vm10630_vm15 = vcmp.eq.s32.totalorder %v10412_v1, %v6222_v42 }
 0x24d   : > { %10614 = vst [vmem:[#allocation97_spill] sm:$0xff] %v7007_v55  ;;  %vm1885_vm13 = vcmp.eq.f32.partialorder %v10616_v19, %v7007_v55  ;;  %vm1887_vm8 = vcmp.eq.f32.partialorder %v10617_v8, %v7007_v55  ;;  %v7025_v49 = vsel %vm1886_vm3, %v10620_v56, 256  ;;  %v7028_v25 = vsel %vm1888_vm7, %v10622_v4, 256  ;;  %vm4747_vm1 = vmpackc.low %vm1613_vm6, %vm10630_vm15  ;;  %v10632_v54 = vld [vmem:[#allocation64_spill] sm:$0xff] }
 0x24e   : > { %10621 = vst [vmem:[#allocation98_spill] sm:$0xff] %v7025_v49  ;;  %10623 = vst [vmem:[#allocation99_spill] sm:$0xff] %v7028_v25  ;;  %vm1889_vm14 = vcmp.eq.f32.partialorder %v10624_v57, %v7007_v55  ;;  %vm1891_vm4 = vcmp.eq.f32.partialorder %v10625_v3, %v7007_v55  ;;  %vm1893_vm3 = vcmp.eq.f32.partialorder %v10626_v40, %v7007_v55  ;;  %v10629_v25 = vld [vmem:[#allocation19_spill] sm:$0xff]  ;;  %v1949_v14 = vsel %vm1885_vm13, %v10620_v56, 256  ;;  %v10648_v3 = vld [vmem:[#allocation72_spill] sm:$0xff] }
 0x24f   : > { %4744 = vmatpush1.bf16.msk.msra.mxu1 %vm4743_vm11, %v10503_v9  ;;  %vm1915_vm11 = vcmp.eq.f32.partialorder %v6416_v29, %v7007_v55  ;;  %vm1917_vm7 = vcmp.eq.f32.partialorder %v6422_v35, %v7007_v55  ;;  %vm4749_vm6 = vmpackc.low %vm1618_vm9, %vm1616_vm10  ;;  %vm1925_vm15 = vcmp.eq.f32.partialorder %v6446_v63, %v7007_v55  ;;  %vm1939_vm5 = vcmp.eq.f32.partialorder %v6585_v30, %v7007_v55  ;;  %v10635_v56 = vld [vmem:[#allocation67_spill] sm:$0xff]  ;;  %v10660_v30 = vld [vmem:[#allocation86_spill] sm:$0xff] }
 0x250   : > { %4746 = vmatprep.subr.msk.bf16.mxu1 %vm4745_vm2, %v10503_v9  ;;  %vm1941_vm12 = vcmp.eq.f32.partialorder %v6633_v59, %v7007_v55  ;;  %vm1943_vm2 = vcmp.eq.f32.partialorder %v6909_v10, %v7007_v55  ;;  %vm10631_vm9 = vcmp.eq.s32.totalorder %v5860_v18, %v6222_v42  ;;  %v1951_v49 = vsel %vm1887_vm8, %v10622_v4, 256  ;;  %v10634_v18 = vld [vmem:[#allocation66_spill] sm:$0xff]  ;;  %v10638_v4 = vld [vmem:[#allocation68_spill] sm:$0xff]  ;;  %v10652_v35 = vld [vmem:[#allocation95_spill] sm:$0xff] }
 0x251   : > { %vm4751_vm10 = vmpackc.low %vm10631_vm9, %vm1615_vm0  ;;  %v1957_v19 = vsel %vm1893_vm3, %v10634_v18, 256  ;;  %vm10636_vm0 = vcmp.eq.f32.partialorder %v10627_v34, %v7007_v55  ;;  %vm10637_vm13 = vcmp.eq.f32.partialorder %v10628_v37, %v7007_v55  ;;  %vm10639_vm8 = vcmp.eq.f32.partialorder %v6345_v16, %v7007_v55  ;;  %v10664_v10 = vld [vmem:[#allocation17_spill] sm:$0xff] }
 0x252   : > { %v1959_v8 = vsel %vm10636_vm0, %v10635_v56, 256  ;;  %v1961_v57 = vsel %vm10637_vm13, %v5775_v31, 256  ;;  %vm10642_vm3 = vcmp.eq.f32.partialorder %v6371_v28, %v7007_v55  ;;  %vm10644_vm9 = vcmp.eq.f32.partialorder %v6383_v44, %v7007_v55  ;;  %v10647_v44 = vld [vmem:[#allocation71_spill] sm:$0xff] }
 0x253   : > { %4748 = vmatpush1.bf16.msk.msra.mxu1 %vm4747_vm1, %v10503_v9  ;;  %vm1947_vm1 = vcmp.eq.f32.partialorder %v6945_v17, %v7007_v55  ;;  %v1953_v17 = vsel %vm1889_vm14, %v10632_v54, 256  ;;  %vm10640_vm14 = vcmp.eq.f32.partialorder %v10629_v25, %v7007_v55  ;;  %v1969_v37 = vsel %vm10642_vm3, %v5787_v32, 256  ;;  %v10662_v59 = vld [vmem:[#allocation96_spill] sm:$0xff] }
 0x254   : > { %4750 = vmatprep.subr.msk.bf16.mxu1 %vm4749_vm6, %v10503_v9  ;;  %vm1945_vm6 = vcmp.eq.f32.partialorder %v6930_v23, %v7007_v55  ;;  %v10633_v23 = vld [vmem:[#allocation65_spill] sm:$0xff]  ;;  %v1965_v40 = vsel %vm10640_vm14, %v5781_v62, 256  ;;  %v7171_v25 = vsel %vm10644_vm9, %v5793_v5, 256  ;;  %vm10645_vm0 = vcmp.eq.f32.partialorder %v6401_v12, %v7007_v55 }
 0x255   : > { %v1955_v42 = vsel %vm1891_vm4, %v10633_v23, 256  ;;  %vm10641_vm4 = vcmp.eq.f32.partialorder %v6357_v24, %v7007_v55  ;;  %v7177_v24 = vsel %vm10645_vm0, %v5796_v46, 256  ;;  %vm10646_vm13 = vcmp.eq.f32.partialorder %v6407_v43, %v7007_v55 }
 0x256   : > { %v1967_v34 = vsel %vm10641_vm4, %v5784_v0, 256  ;;  %v7183_v28 = vsel %vm10646_vm13, %v5799_v2, 256  ;;  %v7196_v12 = vsel %vm1917_vm7, %v10647_v44, 256  ;;  %vm10650_vm14 = vcmp.eq.f32.partialorder %v6434_v27, %v7007_v55 }
 0x257   : > { %4752 = vmatpush1.bf16.msk.msra.mxu1 %vm4751_vm10, %v10503_v9  ;;  %v1963_v9 = vsel %vm10639_vm8, %v10638_v4, 256  ;;  %vm10643_vm10 = vcmp.eq.f32.partialorder %v6377_v41, %v7007_v55  ;;  %v7189_v41 = vsel %vm1915_vm11, %v5802_v47, 256  ;;  %vm10649_vm8 = vcmp.eq.f32.partialorder %v6428_v20, %v7007_v55 }
 0x258   : > { %v1971_v16 = vsel %vm10643_vm10, %v5790_v7, 256  ;;  %v7202_v43 = vsel %vm10649_vm8, %v10648_v3, 256  ;;  %v7208_v29 = vsel %vm10650_vm14, %v5813_v52, 256  ;;  %vm10651_vm11 = vcmp.eq.f32.partialorder %v6440_v51, %v7007_v55 }
 0x259   : > { %v7221_v20 = vsel %vm1925_vm15, %v5819_v45, 256  ;;  %vm10653_vm7 = vcmp.eq.f32.partialorder %v6461_v53, %v7007_v55  ;;  %vm10654_vm4 = vcmp.eq.f32.partialorder %v10574_v21, %v7007_v55  ;;  %vm10655_vm3 = vcmp.eq.f32.partialorder %v6510_v36, %v7007_v55 }
 0x25a   : > { %3615 = vmatmul.mubr.f32.vlgmr.msra.gmra.mrb[0].mxu1 %v6741_v58  ;;  %v7214_v58 = vsel %vm10651_vm11, %v5816_v6, 256  ;;  %v7227_v27 = vsel %vm10653_vm7, %v5822_v38, 256  ;;  %v7233_v51 = vsel %vm10654_vm4, %v5825_v50, 256  ;;  %vm10656_vm15 = vcmp.eq.f32.partialorder %v6516_v26, %v7007_v55 }
 0x25b   : > { %3685 = vmatprep.mubr.f32.mxu1 %v10652_v35  ;;  %v7239_v35 = vsel %vm10655_vm3, %v5828_v15, 256  ;;  %v7245_v63 = vsel %vm10656_vm15, %v5831_v39, 256  ;;  %vm10657_vm10 = vcmp.eq.f32.partialorder %v6530_v60, %v7007_v55  ;;  %vm10658_vm9 = vcmp.eq.f32.partialorder %v6569_v48, %v7007_v55  ;;  %v10665_v15 = vld [vmem:[#allocation98_spill] sm:$0xff]  ;;  %v10666_v55 = vld [vmem:[#allocation99_spill] sm:$0xff] }
 0x25c   : > { %v7251_v53 = vsel %vm10657_vm10, %v5834_v61, 256  ;;  %v7257_v21 = vsel %vm10658_vm9, %v10409_v33, 256  ;;  %v7263_v36 = vsel %vm1939_vm5, %v10411_v13, 256  ;;  %v7269_v26 = vsel %vm1941_vm12, %v10412_v1, 256  ;;  %v10663_v1 = vld [vmem:[#allocation13_spill] sm:$0xff] }
 0x25d   : > { %v7275_v60 = vsel %vm1943_vm2, %v10414_v22, 256  ;;  %v7281_v33 = vsel %vm1945_vm6, %v5857_v11, 256  ;;  %v7287_v61 = vsel %vm1947_vm1, %v10660_v30, 256  ;;  %vm2013_vm5 = vcmp.lt.s32.totalorder %v1949_v14, %v1953_v17 }
 0x25e   : > { %vm2015_vm12 = vcmp.lt.s32.totalorder %v1951_v49, %v1955_v42  ;;  %vm1890_vm0 = vcmp.eq.f32.partialorder %v10663_v1, %v10662_v59  ;;  %vm1892_vm2 = vcmp.eq.f32.partialorder %v10664_v10, %v10662_v59  ;;  %v2014_v22 = vsel %vm2013_vm5, %v1949_v14, %v1953_v17  ;;  %v10667_v17 = vld [vmem:[#allocation20_spill] sm:$0xff] }
 0x25f   : > { %v2016_v39 = vsel %vm2015_vm12, %v1951_v49, %v1955_v42  ;;  %v1954_v48 = vsel %vm1890_vm0, %v10632_v54, 256  ;;  %v1956_v11 = vsel %vm1892_vm2, %v10633_v23, 256  ;;  %vm2017_vm6 = vcmp.lt.s32.totalorder %v2014_v22, %v1957_v19  ;;  %v10668_v49 = vld [vmem:[#allocation23_spill] sm:$0xff] }
 0x260   : > { %vm2019_vm13 = vcmp.lt.s32.totalorder %v2016_v39, %v1959_v8  ;;  %vm2084_vm8 = vcmp.lt.s32.totalorder %v10665_v15, %v1954_v48  ;;  %vm2086_vm1 = vcmp.lt.s32.totalorder %v10666_v55, %v1956_v11  ;;  %v2018_v13 = vsel %vm2017_vm6, %v2014_v22, %v1957_v19  ;;  %v10670_v22 = vld [vmem:[#allocation25_spill] sm:$0xff] }
 0x261   : > { %v2020_v30 = vsel %vm2019_vm13, %v2016_v39, %v1959_v8  ;;  %v2085_v50 = vsel %vm2084_vm8, %v10665_v15, %v1954_v48  ;;  %v2087_v1 = vsel %vm2086_vm1, %v10666_v55, %v1956_v11  ;;  %vm2021_vm14 = vcmp.lt.s32.totalorder %v2018_v13, %v1961_v57  ;;  %v10669_v15 = vld [vmem:[#allocation24_spill] sm:$0xff]  ;;  %v10671_v8 = vld [vmem:[#allocation91_spill] sm:$0xff] }
 0x262   : > { %vm2023_vm11 = vcmp.lt.s32.totalorder %v2020_v30, %v1963_v9  ;;  %vm1894_vm7 = vcmp.eq.f32.partialorder %v10667_v17, %v10662_v59  ;;  %vm1896_vm4 = vcmp.eq.f32.partialorder %v10668_v49, %v10662_v59  ;;  %v2022_v14 = vsel %vm2021_vm14, %v2018_v13, %v1961_v57  ;;  %v10672_v57 = vld [vmem:[#allocation27_spill] sm:$0xff] }
 0x263   : > { %v2024_v42 = vsel %vm2023_vm11, %v2020_v30, %v1963_v9  ;;  %v1958_v10 = vsel %vm1894_vm7, %v10634_v18, 256  ;;  %v1960_v23 = vsel %vm1896_vm4, %v10635_v56, 256  ;;  %vm2025_vm3 = vcmp.lt.s32.totalorder %v2022_v14, %v1965_v40 }
 0x264   : > { %vm2027_vm15 = vcmp.lt.s32.totalorder %v2024_v42, %v1967_v34  ;;  %vm2088_vm10 = vcmp.lt.s32.totalorder %v2085_v50, %v1958_v10  ;;  %vm2090_vm9 = vcmp.lt.s32.totalorder %v2087_v1, %v1960_v23  ;;  %v2026_v39 = vsel %vm2025_vm3, %v2022_v14, %v1965_v40  ;;  %v10673_v14 = vld [vmem:[#allocation28_spill] sm:$0xff] }
 0x265   : > { %v2028_v11 = vsel %vm2027_vm15, %v2024_v42, %v1967_v34  ;;  %vm1898_vm5 = vcmp.eq.f32.partialorder %v10669_v15, %v10662_v59  ;;  %vm1900_vm12 = vcmp.eq.f32.partialorder %v10670_v22, %v10662_v59  ;;  %vm2029_vm0 = vcmp.lt.s32.totalorder %v2026_v39, %v1969_v37  ;;  %v10674_v42 = vld [vmem:[#allocation29_spill] sm:$0xff] }
 0x266   : > { %vm2031_vm2 = vcmp.lt.s32.totalorder %v2028_v11, %v1971_v16  ;;  %v1962_v13 = vsel %vm1898_vm5, %v5775_v31, 256  ;;  %v1964_v9 = vsel %vm1900_vm12, %v10638_v4, 256  ;;  %v2030_v48 = vsel %vm2029_vm0, %v2026_v39, %v1969_v37 }
 0x267   : > { %v2032_v30 = vsel %vm2031_vm2, %v2028_v11, %v1971_v16  ;;  %v2089_v55 = vsel %vm2088_vm10, %v2085_v50, %v1958_v10  ;;  %v2091_v19 = vsel %vm2090_vm9, %v2087_v1, %v1960_v23  ;;  %vm2033_vm6 = vcmp.lt.s32.totalorder %v2030_v48, %v7171_v25 }
 0x268   : > { %vm2035_vm13 = vcmp.lt.s32.totalorder %v2032_v30, %v7177_v24  ;;  %vm2092_vm8 = vcmp.lt.s32.totalorder %v2089_v55, %v1962_v13  ;;  %vm2094_vm1 = vcmp.lt.s32.totalorder %v2091_v19, %v1964_v9  ;;  %v2034_v34 = vsel %vm2033_vm6, %v2030_v48, %v7171_v25  ;;  %v10675_v48 = vld [vmem:[#allocation30_spill] sm:$0xff] }
 0x269   : > { %v2036_v40 = vsel %vm2035_vm13, %v2032_v30, %v7177_v24  ;;  %vm1902_vm14 = vcmp.eq.f32.partialorder %v10671_v8, %v10662_v59  ;;  %vm1904_vm11 = vcmp.eq.f32.partialorder %v10672_v57, %v10662_v59  ;;  %vm2037_vm7 = vcmp.lt.s32.totalorder %v2034_v34, %v7183_v28  ;;  %v10676_v30 = vld [vmem:[#allocation32_spill] sm:$0xff] }
 0x26a   : > { %vm2039_vm4 = vcmp.lt.s32.totalorder %v2036_v40, %v7189_v41  ;;  %v1966_v1 = vsel %vm1902_vm14, %v5781_v62, 256  ;;  %v1968_v50 = vsel %vm1904_vm11, %v5784_v0, 256  ;;  %v2038_v16 = vsel %vm2037_vm7, %v2034_v34, %v7183_v28 }
 0x26b   : > { %v2040_v10 = vsel %vm2039_vm4, %v2036_v40, %v7189_v41  ;;  %v2093_v37 = vsel %vm2092_vm8, %v2089_v55, %v1962_v13  ;;  %v2095_v24 = vsel %vm2094_vm1, %v2091_v19, %v1964_v9  ;;  %vm2041_vm3 = vcmp.lt.s32.totalorder %v2038_v16, %v7196_v12 }
 0x26c   : > { %vm2043_vm15 = vcmp.lt.s32.totalorder %v2040_v10, %v7202_v43  ;;  %vm2096_vm10 = vcmp.lt.s32.totalorder %v2093_v37, %v1966_v1  ;;  %vm2098_vm9 = vcmp.lt.s32.totalorder %v2095_v24, %v1968_v50  ;;  %v2042_v23 = vsel %vm2041_vm3, %v2038_v16, %v7196_v12 }
 0x26d   : > { %v2044_v25 = vsel %vm2043_vm15, %v2040_v10, %v7202_v43  ;;  %vm1906_vm5 = vcmp.eq.f32.partialorder %v10673_v14, %v10662_v59  ;;  %vm1908_vm12 = vcmp.eq.f32.partialorder %v10674_v42, %v10662_v59  ;;  %vm2045_vm0 = vcmp.lt.s32.totalorder %v2042_v23, %v7208_v29 }
 0x26e   : > { %vm2047_vm2 = vcmp.lt.s32.totalorder %v2044_v25, %v7214_v58  ;;  %v1970_v28 = vsel %vm1906_vm5, %v5787_v32, 256  ;;  %v1972_v41 = vsel %vm1908_vm12, %v5790_v7, 256  ;;  %v2046_v39 = vsel %vm2045_vm0, %v2042_v23, %v7208_v29  ;;  %v10679_v23 = vld [vmem:[#allocation8_spill] sm:$0xff] }
 0x26f   : > { %v2048_v12 = vsel %vm2047_vm2, %v2044_v25, %v7214_v58  ;;  %v2097_v11 = vsel %vm2096_vm10, %v2093_v37, %v1966_v1  ;;  %v2099_v43 = vsel %vm2098_vm9, %v2095_v24, %v1968_v50  ;;  %vm2049_vm6 = vcmp.lt.s32.totalorder %v2046_v39, %v7221_v20  ;;  %v10677_v1 = vld [vmem:[#allocation92_spill] sm:$0xff]  ;;  %v10678_v50 = vld [vmem:[#allocation93_spill] sm:$0xff]  ;;  %v10680_v25 = vld [vmem:[#allocation10_spill] sm:$0xff] }
 0x270   : > { %vm2051_vm13 = vcmp.lt.s32.totalorder %v2048_v12, %v7227_v27  ;;  %vm2100_vm8 = vcmp.lt.s32.totalorder %v2097_v11, %v1970_v28  ;;  %vm2102_vm1 = vcmp.lt.s32.totalorder %v2099_v43, %v1972_v41  ;;  %v2050_v13 = vsel %vm2049_vm6, %v2046_v39, %v7221_v20  ;;  %v10681_v39 = vld [vmem:[#allocation94_spill] sm:$0xff] }
 0x271   : > { %v2052_v9 = vsel %vm2051_vm13, %v2048_v12, %v7227_v27  ;;  %vm1910_vm14 = vcmp.eq.f32.partialorder %v10675_v48, %v10662_v59  ;;  %vm1912_vm11 = vcmp.eq.f32.partialorder %v10676_v30, %v10662_v59  ;;  %vm2053_vm7 = vcmp.lt.s32.totalorder %v2050_v13, %v7233_v51 }
 0x272   : > { %vm2055_vm4 = vcmp.lt.s32.totalorder %v2052_v9, %v7239_v35  ;;  %v1974_v29 = vsel %vm1910_vm14, %v5793_v5, 256  ;;  %v1976_v58 = vsel %vm1912_vm11, %v5796_v46, 256  ;;  %v2054_v55 = vsel %vm2053_vm7, %v2050_v13, %v7233_v51 }
 0x273   : > { %v2056_v20 = vsel %vm2055_vm4, %v2052_v9, %v7239_v35  ;;  %v2101_v19 = vsel %vm2100_vm8, %v2097_v11, %v1970_v28  ;;  %v2103_v27 = vsel %vm2102_vm1, %v2099_v43, %v1972_v41  ;;  %vm2057_vm3 = vcmp.lt.s32.totalorder %v2054_v55, %v7245_v63  ;;  %v10682_v11 = vld [vmem:[#allocation37_spill] sm:$0xff] }
 0x274   : > { %vm2059_vm15 = vcmp.lt.s32.totalorder %v2056_v20, %v7251_v53  ;;  %vm2104_vm10 = vcmp.lt.s32.totalorder %v2101_v19, %v1974_v29  ;;  %vm2106_vm9 = vcmp.lt.s32.totalorder %v2103_v27, %v1976_v58  ;;  %v2058_v34 = vsel %vm2057_vm3, %v2054_v55, %v7245_v63 }
 0x275   : > { %v2060_v40 = vsel %vm2059_vm15, %v2056_v20, %v7251_v53  ;;  %vm1914_vm5 = vcmp.eq.f32.partialorder %v10677_v1, %v10662_v59  ;;  %vm1916_vm12 = vcmp.eq.f32.partialorder %v10678_v50, %v10662_v59  ;;  %vm2061_vm0 = vcmp.lt.s32.totalorder %v2058_v34, %v7257_v21 }
 0x276   : > { %vm2063_vm2 = vcmp.lt.s32.totalorder %v2060_v40, %v7263_v36  ;;  %v1978_v51 = vsel %vm1914_vm5, %v5799_v2, 256  ;;  %v1980_v35 = vsel %vm1916_vm12, %v5802_v47, 256  ;;  %v2062_v16 = vsel %vm2061_vm0, %v2058_v34, %v7257_v21 }
 0x277   : > { %v2064_v63 = vsel %vm2063_vm2, %v2060_v40, %v7263_v36  ;;  %v2105_v10 = vsel %vm2104_vm10, %v2101_v19, %v1974_v29  ;;  %v2107_v53 = vsel %vm2106_vm9, %v2103_v27, %v1976_v58  ;;  %vm2065_vm6 = vcmp.lt.s32.totalorder %v2062_v16, %v7269_v26  ;;  %v10684_v58 = vld [vmem:[#allocation41_spill] sm:$0xff]  ;;  %v10685_v40 = vld [vmem:[#allocation43_spill] sm:$0xff] }
 0x278   : > { %vm2067_vm13 = vcmp.lt.s32.totalorder %v2064_v63, %v7275_v60  ;;  %vm2108_vm8 = vcmp.lt.s32.totalorder %v2105_v10, %v1978_v51  ;;  %vm2110_vm1 = vcmp.lt.s32.totalorder %v2107_v53, %v1980_v35  ;;  %v2066_v37 = vsel %vm2065_vm6, %v2062_v16, %v7269_v26 }
 0x279   : > { %v2068_v24 = vsel %vm2067_vm13, %v2064_v63, %v7275_v60  ;;  %vm1918_vm14 = vcmp.eq.f32.partialorder %v10679_v23, %v10662_v59  ;;  %vm1920_vm11 = vcmp.eq.f32.partialorder %v10680_v25, %v10662_v59  ;;  %vm2069_vm7 = vcmp.lt.s32.totalorder %v2066_v37, %v7281_v33 }
 0x27a   : > { %vm2071_vm4 = vcmp.lt.s32.totalorder %v2068_v24, %v7287_v61  ;;  %v1982_v36 = vsel %vm1918_vm14, %v10647_v44, 256  ;;  %v1984_v21 = vsel %vm1920_vm11, %v10648_v3, 256  ;;  %v2070_v28 = vsel %vm2069_vm7, %v2066_v37, %v7281_v33 }
 0x27b   : > { %v2072_v26 = vsel %vm2071_vm4, %v2068_v24, %v7287_v61  ;;  %v2109_v41 = vsel %vm2108_vm8, %v2105_v10, %v1978_v51  ;;  %v2111_v60 = vsel %vm2110_vm1, %v2107_v53, %v1980_v35  ;;  %vm1922_vm9 = vcmp.eq.f32.partialorder %v10681_v39, %v10662_v59  ;;  %v10683_v61 = vld [vmem:[#allocation39_spill] sm:$0xff]  ;;  %v10686_v35 = vld [vmem:[#allocation45_spill] sm:$0xff]  ;;  %v10688_v24 = vld [vmem:[#allocation78_spill] sm:$0xff] }
 0x27c   : > { %vm2073_vm3 = vcmp.lt.s32.totalorder %v2070_v28, %v2072_v26  ;;  %vm2112_vm15 = vcmp.lt.s32.totalorder %v2109_v41, %v1982_v36  ;;  %vm2114_vm10 = vcmp.lt.s32.totalorder %v2111_v60, %v1984_v21  ;;  %vm1924_vm5 = vcmp.eq.f32.partialorder %v10682_v11, %v10662_v59  ;;  %v10687_v10 = vld [vmem:[#allocation77_spill] sm:$0xff]  ;;  %v10729_v11 = vld [vmem:[#allocation31_spill] sm:$0xff]  ;;  %v10735_v39 = vld [vmem:[#allocation84_spill] sm:$0xff] }
 0x27d   : > { %v2074_v12 = vsel %vm2073_vm3, %v2070_v28, %v2072_v26  ;;  %v1986_v43 = vsel %vm1922_vm9, %v5813_v52, 256  ;;  %v2113_v13 = vsel %vm2112_vm15, %v2109_v41, %v1982_v36  ;;  %v1988_v33 = vsel %vm1924_vm5, %v5816_v6, 256  ;;  %v10689_v28 = vld [vmem:[#allocation47_spill] sm:$0xff]  ;;  %v10690_v26 = vld [vmem:[#allocation49_spill] sm:$0xff] }
 0x27e   : > { %v2075_v9 = vrot.slane %v2074_v12, 4  ;;  %v2115_v29 = vsel %vm2114_vm10, %v2111_v60, %v1984_v21  ;;  %vm2116_vm12 = vcmp.lt.s32.totalorder %v2113_v13, %v1986_v43  ;;  %vm1926_vm2 = vcmp.eq.f32.partialorder %v10683_v61, %v10662_v59 }
 0x27f   : > { %vm2118_vm0 = vcmp.lt.s32.totalorder %v2115_v29, %v1988_v33  ;;  %vm1928_vm6 = vcmp.eq.f32.partialorder %v10684_v58, %v10662_v59  ;;  %v2117_v55 = vsel %vm2116_vm12, %v2113_v13, %v1986_v43  ;;  %v1990_v20 = vsel %vm1926_vm2, %v5819_v45, 256  ;;  %v10692_v13 = vld [vmem:[#allocation80_spill] sm:$0xff] }
 0x280   : > { %vm2076_vm13 = vcmp.lt.s32.totalorder %v2074_v12, %v2075_v9  ;;  %v1992_v19 = vsel %vm1928_vm6, %v5822_v38, 256  ;;  %v2119_v27 = vsel %vm2118_vm0, %v2115_v29, %v1988_v33  ;;  %vm2120_vm8 = vcmp.lt.s32.totalorder %v2117_v55, %v1990_v20  ;;  %v10693_v29 = vld [vmem:[#allocation52_spill] sm:$0xff] }
 0x281   : > { %v2077_v34 = vsel %vm2076_vm13, %v2074_v12, %v2075_v9  ;;  %vm2122_vm1 = vcmp.lt.s32.totalorder %v2119_v27, %v1992_v19  ;;  %vm1930_vm14 = vcmp.eq.f32.partialorder %v10685_v40, %v10662_v59  ;;  %vm1932_vm11 = vcmp.eq.f32.partialorder %v10686_v35, %v10662_v59  ;;  %v10691_v12 = vld [vmem:[#allocation79_spill] sm:$0xff] }
 0x282   : > { %v2078_v51 = vrot.slane %v2077_v34, 2  ;;  %v2121_v16 = vsel %vm2120_vm8, %v2117_v55, %v1990_v20  ;;  %v2123_v63 = vsel %vm2122_vm1, %v2119_v27, %v1992_v19  ;;  %v1994_v53 = vsel %vm1930_vm14, %v10687_v10, 256  ;;  %v10694_v55 = vld [vmem:[#allocation53_spill] sm:$0xff]  ;;  %v10696_v27 = vld [vmem:[#allocation62_spill] sm:$0xff] }
 0x283   : > { %v1996_v36 = vsel %vm1932_vm11, %v10688_v24, 256  ;;  %vm2124_vm4 = vcmp.lt.s32.totalorder %v2121_v16, %v1994_v53  ;;  %vm1934_vm15 = vcmp.eq.f32.partialorder %v10689_v28, %v10662_v59  ;;  %vm1936_vm10 = vcmp.eq.f32.partialorder %v10690_v26, %v10662_v59  ;;  %v10695_v19 = vld [vmem:[#allocation57_spill] sm:$0xff] }
 0x284   : > { %vm2079_vm7 = vcmp.lt.s32.totalorder %v2077_v34, %v2078_v51  ;;  %vm2126_vm3 = vcmp.lt.s32.totalorder %v2123_v63, %v1996_v36  ;;  %v2125_v41 = vsel %vm2124_vm4, %v2121_v16, %v1994_v53  ;;  %v1998_v43 = vsel %vm1934_vm15, %v10691_v12, 256  ;;  %v10698_v16 = vld [vmem:[#allocation65_spill] sm:$0xff] }
 0x285   : > { %v2080_v37 = vsel %vm2079_vm7, %v2077_v34, %v2078_v51  ;;  %v2127_v60 = vsel %vm2126_vm3, %v2123_v63, %v1996_v36  ;;  %v2000_v9 = vsel %vm1936_vm10, %v10692_v13, 256  ;;  %vm2128_vm5 = vcmp.lt.s32.totalorder %v2125_v41, %v1998_v43  ;;  %v10697_v34 = vld [vmem:[#allocation63_spill] sm:$0xff]  ;;  %v10699_v63 = vld [vmem:[#allocation81_spill] sm:$0xff] }
 0x286   : > { %v2081_v21 = vrot.slane %v2080_v37, 1  ;;  %vm2130_vm12 = vcmp.lt.s32.totalorder %v2127_v60, %v2000_v9  ;;  %vm1938_vm0 = vcmp.eq.f32.partialorder %v10693_v29, %v10662_v59  ;;  %vm1940_vm2 = vcmp.eq.f32.partialorder %v10694_v55, %v10662_v59  ;;  %v10707_v29 = vld [vmem:[#allocation5_spill] sm:$0xff] }
 0x287   : > { %v2129_v20 = vsel %vm2128_vm5, %v2125_v41, %v1998_v43  ;;  %vm1942_vm6 = vcmp.eq.f32.partialorder %v10695_v19, %v10662_v59  ;;  %v2131_v51 = vsel %vm2130_vm12, %v2127_v60, %v2000_v9  ;;  %v2002_v53 = vsel %vm1938_vm0, %v10699_v63, 256  ;;  %v10702_v41 = vld [vmem:[#allocation83_spill] sm:$0xff]  ;;  %v10703_v60 = vld [vmem:[#allocation26_spill] sm:$0xff] }
 0x288   : > { %vm2082_vm9 = vcmp.lt.s32.totalorder %v2080_v37, %v2081_v21  ;;  %vm2132_vm7 = vcmp.lt.s32.totalorder %v2129_v20, %v2002_v53  ;;  %v2006_v43 = vsel %vm1942_vm6, %v10702_v41, 256  ;;  %v10705_v19 = vld [vmem:[#allocation7_spill] sm:$0xff] }
 0x289   : > { %v7405_v33 = vsel %vm2082_vm9, %v2080_v37, %v2081_v21  ;;  %v10700_v37 = vld [vmem:[#allocation82_spill] sm:$0xff]  ;;  %v10701_v21 = vld [vmem:[#allocation56_spill] sm:$0xff] }
 0x28a   : > { %vm2155_vm13 = vcmp.eq.s32.totalorder %v10696_v27, %v7405_v33  ;;  %vm10077_vm8 = vcmp.eq.s32.totalorder %v10697_v34, %v7405_v33  ;;  %vm10073_vm1 = vcmp.eq.s32.totalorder %v10632_v54, %v7405_v33  ;;  %vm10069_vm14 = vcmp.eq.s32.totalorder %v10698_v16, %v7405_v33 }
 0x28b   : > { %v2004_v36 = vsel %vm1940_vm2, %v10700_v37, 256  ;;  %vm10065_vm11 = vcmp.eq.s32.totalorder %v10634_v18, %v7405_v33  ;;  %vm1944_vm4 = vcmp.eq.f32.partialorder %v10701_v21, %v10662_v59  ;;  %vm10068_vm3 = vcmp.eq.s32.totalorder %v10635_v56, %v7405_v33  ;;  %v10739_v21 = vld [vmem:[#allocation86_spill] sm:$0xff] }
 0x28c   : > { %v7434_v9 = vsel %vm2155_vm13, 1e+30, %v10703_v60  ;;  %v7440_v55 = vsel %vm10077_vm8, 1e+30, %v10705_v19  ;;  %v7446_v26 = vsel %vm10073_vm1, 1e+30, %v10707_v29  ;;  %vm2134_vm15 = vcmp.lt.s32.totalorder %v2131_v51, %v2004_v36 }
 0x28d   : > { %10704 = vst [vmem:[#allocation68_spill] sm:$0xff] %v7434_v9  ;;  %10706 = vst [vmem:[#allocation71_spill] sm:$0xff] %v7440_v55  ;;  %vm10072_vm10 = vcmp.eq.s32.totalorder %v5775_v31, %v7405_v33  ;;  %vm10076_vm9 = vcmp.eq.s32.totalorder %v10638_v4, %v7405_v33  ;;  %v10709_v60 = vld [vmem:[#allocation35_spill] sm:$0xff]  ;;  %v2411_v19 = vmin.f32 %v7434_v9, %v7446_v26  ;;  %v10711_v29 = vld [vmem:[#allocation14_spill] sm:$0xff] }
 0x28e   : > { %10708 = vst [vmem:[#allocation98_spill] sm:$0xff] %v7446_v26  ;;  %v7456_v28 = vsel %vm10069_vm14, 1e+30, %v10709_v60  ;;  %vm10080_vm5 = vcmp.eq.s32.totalorder %v5781_v62, %v7405_v33  ;;  %vm10141_vm12 = vcmp.eq.s32.totalorder %v5784_v0, %v7405_v33  ;;  %v7468_v35 = vsel %vm10065_vm11, 1e+30, %v10711_v29  ;;  %v10713_v60 = vld [vmem:[#allocation12_spill] sm:$0xff] }
 0x28f   : > { %10710 = vst [vmem:[#allocation99_spill] sm:$0xff] %v7456_v28  ;;  %10712 = vst [vmem:[#allocation20_spill] sm:$0xff] %v7468_v35  ;;  %v2412_v40 = vmin.f32 %v7440_v55, %v7456_v28  ;;  %vm10140_vm0 = vcmp.eq.s32.totalorder %v5787_v32, %v7405_v33  ;;  %vm10139_vm2 = vcmp.eq.s32.totalorder %v5790_v7, %v7405_v33  ;;  %v7480_v26 = vsel %vm10068_vm3, 1e+30, %v10713_v60  ;;  %v10715_v29 = vld [vmem:[#allocation18_spill] sm:$0xff]  ;;  %v10725_v9 = vld [vmem:[#allocation89_spill] sm:$0xff] }
 0x290   : > { %10714 = vst [vmem:[#allocation23_spill] sm:$0xff] %v7480_v26  ;;  %v2413_v58 = vmin.f32 %v2411_v19, %v7468_v35  ;;  %vm10138_vm6 = vcmp.eq.s32.totalorder %v5793_v5, %v7405_v33  ;;  %vm10094_vm11 = vcmp.eq.s32.totalorder %v5796_v46, %v7405_v33  ;;  %v7491_v28 = vsel %vm10072_vm10, 1e+30, %v10715_v29  ;;  %v10717_v19 = vld [vmem:[#allocation16_spill] sm:$0xff] }
 0x291   : > { %10716 = vst [vmem:[#allocation24_spill] sm:$0xff] %v7491_v28  ;;  %v2414_v61 = vmin.f32 %v2412_v40, %v7480_v26  ;;  %vm10093_vm3 = vcmp.eq.s32.totalorder %v5799_v2, %v7405_v33  ;;  %vm10095_vm14 = vcmp.eq.s32.totalorder %v5802_v47, %v7405_v33  ;;  %v7502_v60 = vsel %vm10076_vm9, 1e+30, %v10717_v19  ;;  %v10719_v40 = vld [vmem:[#allocation19_spill] sm:$0xff] }
 0x292   : > { %10718 = vst [vmem:[#allocation25_spill] sm:$0xff] %v7502_v60  ;;  %v2415_v35 = vmin.f32 %v2413_v58, %v7491_v28  ;;  %vm10137_vm10 = vcmp.eq.s32.totalorder %v10647_v44, %v7405_v33  ;;  %vm10136_vm1 = vcmp.eq.s32.totalorder %v10648_v3, %v7405_v33  ;;  %v7513_v29 = vsel %vm10080_vm5, 1e+30, %v10719_v40  ;;  %v10721_v58 = vld [vmem:[#allocation22_spill] sm:$0xff]  ;;  %v10723_v40 = vld [vmem:[#allocation88_spill] sm:$0xff] }
 0x293   : > { %10720 = vst [vmem:[#allocation91_spill] sm:$0xff] %v7513_v29  ;;  %v2416_v26 = vmin.f32 %v2414_v61, %v7502_v60  ;;  %vm10135_vm9 = vcmp.eq.s32.totalorder %v5813_v52, %v7405_v33  ;;  %vm10134_vm8 = vcmp.eq.s32.totalorder %v5816_v6, %v7405_v33  ;;  %v7524_v19 = vsel %vm10141_vm12, 1e+30, %v10721_v58 }
 0x294   : > { %10722 = vst [vmem:[#allocation27_spill] sm:$0xff] %v7524_v19  ;;  %v2417_v28 = vmin.f32 %v2415_v35, %v7513_v29  ;;  %vm10102_vm5 = vcmp.eq.s32.totalorder %v5819_v45, %v7405_v33  ;;  %v7533_v61 = vsel %vm10140_vm0, 1e+30, %v10723_v40  ;;  %v2133_v55 = vsel %vm2132_vm7, %v2129_v20, %v2002_v53  ;;  %v10727_v35 = vld [vmem:[#allocation90_spill] sm:$0xff]  ;;  %v10731_v20 = vld [vmem:[#allocation33_spill] sm:$0xff] }
 0x295   : > { %10724 = vst [vmem:[#allocation28_spill] sm:$0xff] %v7533_v61  ;;  %v2418_v60 = vmin.f32 %v2416_v26, %v7524_v19  ;;  %v7541_v58 = vsel %vm10139_vm2, 1e+30, %v10725_v9  ;;  %v7547_v29 = vsel %vm10138_vm6, 1e+30, %v10727_v35  ;;  %v10733_v9 = vld [vmem:[#allocation6_spill] sm:$0xff]  ;;  %vm2136_vm7 = vcmp.lt.s32.totalorder %v2133_v55, %v2006_v43 }
 0x296   : > { %10726 = vst [vmem:[#allocation29_spill] sm:$0xff] %v7541_v58  ;;  %10728 = vst [vmem:[#allocation30_spill] sm:$0xff] %v7547_v29  ;;  %v7553_v40 = vsel %vm10094_vm11, 1e+30, %v10729_v11  ;;  %v2419_v26 = vmin.f32 %v2417_v28, %v7533_v61  ;;  %v7560_v53 = vsel %vm10093_vm3, 1e+30, %v10731_v20  ;;  %v2135_v61 = vsel %vm2134_vm15, %v2131_v51, %v2004_v36 }
 0x297   : > { %10730 = vst [vmem:[#allocation32_spill] sm:$0xff] %v7553_v40  ;;  %10732 = vst [vmem:[#allocation83_spill] sm:$0xff] %v7560_v53  ;;  %v7566_v35 = vsel %vm10095_vm14, 1e+30, %v10733_v9  ;;  %v2420_v19 = vmin.f32 %v2418_v60, %v7541_v58  ;;  %v2008_v11 = vsel %vm1944_vm4, %v10735_v39, 256  ;;  %v10736_v20 = vld [vmem:[#allocation59_spill] sm:$0xff]  ;;  %v2137_v1 = vsel %vm2136_vm7, %v2133_v55, %v2006_v43 }
 0x298   : > { %10734 = vst [vmem:[#allocation26_spill] sm:$0xff] %v7566_v35  ;;  %v2421_v28 = vmin.f32 %v2419_v26, %v7547_v29  ;;  %vm1946_vm3 = vcmp.eq.f32.partialorder %v10736_v20, %v10662_v59  ;;  %vm2138_vm11 = vcmp.lt.s32.totalorder %v2135_v61, %v2008_v11  ;;  %v10737_v9 = vld [vmem:[#allocation61_spill] sm:$0xff]  ;;  %v10740_v29 = vld [vmem:[#allocation11_spill] sm:$0xff]  ;;  %vm10112_vm7 = vcmp.eq.s32.totalorder %v10688_v24, %v7405_v33 }
 0x299   : > { %v2422_v25 = vmin.f32 %v2420_v19, %v7553_v40  ;;  %vm1948_vm14 = vcmp.eq.f32.partialorder %v10737_v9, %v10662_v59  ;;  %v10738_v60 = vld [vmem:[#allocation85_spill] sm:$0xff]  ;;  %v2139_v26 = vsel %vm2138_vm11, %v2135_v61, %v2008_v11  ;;  %v7587_v51 = vsel %vm10137_vm10, 1e+30, %v10740_v29  ;;  %v10744_v61 = vld [vmem:[#allocation34_spill] sm:$0xff]  ;;  %v10746_v11 = vld [vmem:[#allocation36_spill] sm:$0xff] }
 0x29a   : > { %v2010_v58 = vsel %vm1946_vm3, %v10738_v60, 256  ;;  %v2423_v23 = vmin.f32 %v2421_v28, %v7560_v53  ;;  %v2012_v50 = vsel %vm1948_vm14, %v10739_v21, 256  ;;  %10741 = vst [vmem:[#allocation7_spill] sm:$0xff] %v7587_v51  ;;  %v10742_v19 = vld [vmem:[#allocation9_spill] sm:$0xff]  ;;  %vm10105_vm14 = vcmp.eq.s32.totalorder %v5822_v38, %v7405_v33 }
 0x29b   : > { %v2424_v36 = vmin.f32 %v2422_v25, %v7566_v35  ;;  %vm2140_vm4 = vcmp.lt.s32.totalorder %v2137_v1, %v2010_v58  ;;  %vm2142_vm15 = vcmp.lt.s32.totalorder %v2139_v26, %v2012_v50  ;;  %v7594_v59 = vsel %vm10136_vm1, 1e+30, %v10742_v19  ;;  %v10822_v35 = vld [vmem:[#allocation43_spill] sm:$0xff] }
 0x29c   : > { %10743 = vst [vmem:[#allocation5_spill] sm:$0xff] %v7594_v59  ;;  %v2425_v28 = vmin.f32 %v2423_v23, %v7587_v51  ;;  %v2141_v55 = vsel %vm2140_vm4, %v2137_v1, %v2010_v58  ;;  %v2143_v43 = vsel %vm2142_vm15, %v2139_v26, %v2012_v50  ;;  %v7603_v25 = vsel %vm10135_vm9, 1e+30, %v10744_v61  ;;  %v10748_v58 = vld [vmem:[#allocation38_spill] sm:$0xff]  ;;  %v10750_v61 = vld [vmem:[#allocation40_spill] sm:$0xff] }
 0x29d   : > { %10745 = vst [vmem:[#allocation35_spill] sm:$0xff] %v7603_v25  ;;  %v2426_v29 = vmin.f32 %v2424_v36, %v7594_v59  ;;  %vm2144_vm11 = vcmp.lt.s32.totalorder %v2141_v55, %v2143_v43  ;;  %vm10110_vm3 = vcmp.eq.s32.totalorder %v10687_v10, %v7405_v33  ;;  %v7612_v1 = vsel %vm10134_vm8, 1e+30, %v10746_v11  ;;  %v10818_v59 = vld [vmem:[#allocation39_spill] sm:$0xff] }
 0x29e   : > { %10747 = vst [vmem:[#allocation14_spill] sm:$0xff] %v7612_v1  ;;  %v2427_v50 = vmin.f32 %v2425_v28, %v7603_v25  ;;  %v2145_v23 = vsel %vm2144_vm11, %v2141_v55, %v2143_v43  ;;  %v7621_v26 = vsel %vm10102_vm5, 1e+30, %v10748_v58  ;;  %vm10111_vm4 = vcmp.eq.s32.totalorder %v10691_v12, %v7405_v33  ;;  %v10752_v43 = vld [vmem:[#allocation42_spill] sm:$0xff]  ;;  %v10754_v58 = vld [vmem:[#allocation44_spill] sm:$0xff]  ;;  %v10766_v25 = vld [vmem:[#allocation55_spill] sm:$0xff] }
 0x29f   : > { %10749 = vst [vmem:[#allocation12_spill] sm:$0xff] %v7621_v26  ;;  %v2428_v36 = vmin.f32 %v2426_v29, %v7612_v1  ;;  %v2146_v19 = vrot.slane %v2145_v23, 4  ;;  %v7630_v28 = vsel %vm10105_vm14, 1e+30, %v10750_v61  ;;  %vm10117_vm15 = vcmp.eq.s32.totalorder %v10692_v13, %v7405_v33 }
 0x2a0   : > { %10751 = vst [vmem:[#allocation18_spill] sm:$0xff] %v7630_v28  ;;  %v2429_v55 = vmin.f32 %v2427_v50, %v7621_v26  ;;  %v7639_v29 = vsel %vm10110_vm3, 1e+30, %v10752_v43  ;;  %vm10133_vm5 = vcmp.eq.s32.totalorder %v10699_v63, %v7405_v33  ;;  %v7648_v50 = vsel %vm10112_vm7, 1e+30, %v10754_v58  ;;  %v10756_v43 = vld [vmem:[#allocation46_spill] sm:$0xff] }
 0x2a1   : > { %10753 = vst [vmem:[#allocation16_spill] sm:$0xff] %v7639_v29  ;;  %v2430_v11 = vmin.f32 %v2428_v36, %v7630_v28  ;;  %vm2147_vm11 = vcmp.lt.s32.totalorder %v2145_v23, %v2146_v19  ;;  %10755 = vst [vmem:[#allocation19_spill] sm:$0xff] %v7648_v50  ;;  %vm10131_vm14 = vcmp.eq.s32.totalorder %v10700_v37, %v7405_v33  ;;  %v7657_v36 = vsel %vm10111_vm4, 1e+30, %v10756_v43  ;;  %v10758_v58 = vld [vmem:[#allocation48_spill] sm:$0xff] }
 0x2a2   : > { %v2431_v61 = vmin.f32 %v2429_v55, %v7639_v29  ;;  %v2148_v26 = vsel %vm2147_vm11, %v2145_v23, %v2146_v19  ;;  %10757 = vst [vmem:[#allocation22_spill] sm:$0xff] %v7657_v36  ;;  %vm10130_vm3 = vcmp.eq.s32.totalorder %v10702_v41, %v7405_v33  ;;  %v7666_v23 = vsel %vm10117_vm15, 1e+30, %v10758_v58  ;;  %v10760_v55 = vld [vmem:[#allocation50_spill] sm:$0xff] }
 0x2a3   : > { %v2432_v28 = vmin.f32 %v2430_v11, %v7648_v50  ;;  %v2149_v1 = vrot.slane %v2148_v26, 2  ;;  %10759 = vst [vmem:[#allocation88_spill] sm:$0xff] %v7666_v23  ;;  %vm10128_vm11 = vcmp.eq.s32.totalorder %v10735_v39, %v7405_v33  ;;  %v7675_v11 = vsel %vm10133_vm5, 1e+30, %v10760_v55  ;;  %v10762_v50 = vld [vmem:[#allocation51_spill] sm:$0xff]  ;;  %v10764_v55 = vld [vmem:[#allocation54_spill] sm:$0xff] }
 0x2a4   : > { %v2433_v19 = vmin.f32 %v2431_v61, %v7657_v36  ;;  %10761 = vst [vmem:[#allocation89_spill] sm:$0xff] %v7675_v11  ;;  %vm10129_vm7 = vcmp.eq.s32.totalorder %v10738_v60, %v7405_v33  ;;  %v7684_v61 = vsel %vm10131_vm14, 1e+30, %v10762_v50  ;;  %vm10132_vm15 = vcmp.eq.s32.totalorder %v10739_v21, %v7405_v33 }
 0x2a5   : > { %v2434_v43 = vmin.f32 %v2432_v28, %v7666_v23  ;;  %vm2150_vm4 = vcmp.lt.s32.totalorder %v2148_v26, %v2149_v1  ;;  %10763 = vst [vmem:[#allocation90_spill] sm:$0xff] %v7684_v61  ;;  %v7693_v28 = vsel %vm10130_vm3, 1e+30, %v10764_v55  ;;  %v7700_v50 = vsel %vm10128_vm11, 1e+30, %v10766_v25 }
 0x2a6   : > { %v2435_v58 = vmin.f32 %v2433_v19, %v7675_v11  ;;  %v2151_v36 = vsel %vm2150_vm4, %v2148_v26, %v2149_v1  ;;  %10765 = vst [vmem:[#allocation31_spill] sm:$0xff] %v7693_v28  ;;  %10767 = vst [vmem:[#allocation33_spill] sm:$0xff] %v7700_v50  ;;  %v10768_v26 = vld [vmem:[#allocation58_spill] sm:$0xff]  ;;  %v10770_v11 = vld [vmem:[#allocation60_spill] sm:$0xff]  ;;  %vm10773_vm10 = vcmp.eq.s32.totalorder %v10697_v34, %v7405_v33 }
 0x2a7   : > { %v2436_v23 = vmin.f32 %v2434_v43, %v7684_v61  ;;  %v2152_v29 = vrot.slane %v2151_v36, 1  ;;  %v7707_v19 = vsel %vm10129_vm7, 1e+30, %v10768_v26  ;;  %v7714_v43 = vsel %vm10132_vm15, 1e+30, %v10770_v11  ;;  %vm4755_vm6 = vmpackc.low %vm10773_vm10, %vm2155_vm13  ;;  %v10776_v26 = vld [vmem:[#allocation15_spill] sm:$0xff] }
 0x2a8   : > { %v2437_v1 = vmin.f32 %v2435_v58, %v7693_v28  ;;  %10769 = vst [vmem:[#allocation6_spill] sm:$0xff] %v7707_v19  ;;  %10771 = vst [vmem:[#allocation59_spill] sm:$0xff] %v7714_v43  ;;  %vm10775_vm1 = vcmp.eq.s32.totalorder %v10698_v16, %v7405_v33  ;;  %v10804_v28 = vld [vmem:[#allocation8_spill] sm:$0xff] }
 0x2a9   : > { %v2438_v55 = vmin.f32 %v2436_v23, %v7700_v50  ;;  %vm2153_vm4 = vcmp.lt.s32.totalorder %v2151_v36, %v2152_v29 }
 0x2aa   : > { %v2439_v25 = vmin.f32 %v2437_v1, %v7707_v19  ;;  %v7717_v61 = vsel %vm2153_vm4, %v2151_v36, %v2152_v29  ;;  %v10772_v36 = vmov 1.0|1.0   ;;  %v10782_v19 = vld [vmem:[#allocation17_spill] sm:$0xff] }
 0x2ab   : > { %v2440_v58 = vmin.f32 %v2438_v55, %v7714_v43  ;;  %vm2156_vm11 = vcmp.eq.s32.totalorder %v10696_v27, %v7717_v61  ;;  %vm2158_vm7 = vcmp.eq.s32.totalorder %v10697_v34, %v7717_v61  ;;  %vm2160_vm3 = vcmp.eq.s32.totalorder %v10632_v54, %v7717_v61 }
 0x2ac   : > { %vm2162_vm14 = vcmp.eq.s32.totalorder %v10698_v16, %v7717_v61  ;;  %vm2164_vm15 = vcmp.eq.s32.totalorder %v10634_v18, %v7717_v61  ;;  %vm2166_vm4 = vcmp.eq.s32.totalorder %v10635_v56, %v7717_v61  ;;  %vm4753_vm5 = vmpackc.low %vm2158_vm7, %vm2156_vm11  ;;  %vm2168_vm8 = vcmp.eq.s32.totalorder %v5775_v31, %v7717_v61 }
 0x2ad   : > { %v2441_v29 = vmin.f32 %v2439_v25, %v2440_v58  ;;  %vm2170_vm9 = vcmp.eq.s32.totalorder %v10638_v4, %v7717_v61  ;;  %4754 = vmatprep.subr.msk.bf16.mxu1 %vm4753_vm5, %v10772_v36  ;;  %vm4757_vm13 = vmpackc.low %vm2162_vm14, %vm2160_vm3  ;;  %vm2202_vm10 = vcmp.eq.s32.totalorder %v10688_v24, %v7717_v61  ;;  %vm2212_vm2 = vcmp.eq.s32.totalorder %v10702_v41, %v7717_v61  ;;  %v10778_v25 = vld [vmem:[#allocation21_spill] sm:$0xff] }
 0x2ae   : > { %4756 = vmatpush1.bf16.msk.msra.mxu1 %vm4755_vm6, %v10772_v36  ;;  %vm10774_vm6 = vcmp.eq.s32.totalorder %v10632_v54, %v7405_v33  ;;  %vm2214_vm5 = vcmp.eq.s32.totalorder %v10735_v39, %v7717_v61  ;;  %vm10184_vm12 = vcmp.eq.s32.totalorder %v10739_v21, %v7717_v61  ;;  %v7823_v55 = vsel %vm2156_vm11, 1e+30, %v10776_v26  ;;  %vm4765_vm11 = vmpackc.low %vm2170_vm9, %vm2168_vm8  ;;  %v10846_v39 = vld [vmem:[#allocation99_spill] sm:$0xff] }
 0x2af   : > { %v2442_v23 = vrot.slane %v2441_v29, 4  ;;  %4758 = vmatprep.subr.msk.bf16.mxu1 %vm4757_vm13, %v10772_v36  ;;  %vm2200_vm13 = vcmp.eq.s32.totalorder %v10687_v10, %v7717_v61  ;;  %vm4759_vm0 = vmpackc.low %vm10775_vm1, %vm10774_vm6  ;;  %vm2210_vm6 = vcmp.eq.s32.totalorder %v10700_v37, %v7717_v61  ;;  %10777 = vst [vmem:[#allocation61_spill] sm:$0xff] %v7823_v55  ;;  %v7829_v58 = vsel %vm2158_vm7, 1e+30, %v10778_v25 }
 0x2b0   : > { %vm4761_vm1 = vmpackc.low %vm2166_vm4, %vm2164_vm15  ;;  %10779 = vst [vmem:[#allocation11_spill] sm:$0xff] %v7829_v58  ;;  %v7841_v50 = vsel %vm2162_vm14, 1e+30, %v10782_v19  ;;  %v7847_v26 = vsel %vm2164_vm15, 1e+30, %v10667_v17  ;;  %vm10787_vm7 = vcmp.eq.s32.totalorder %v10635_v56, %v7405_v33  ;;  %vm10790_vm15 = vcmp.eq.s32.totalorder %v5781_v62, %v7717_v61 }
 0x2b1   : > { %v2443_v11 = vmin.f32 %v2441_v29, %v2442_v23  ;;  %v10780_v29 = vld [vmem:[#allocation13_spill] sm:$0xff]  ;;  %10783 = vst [vmem:[#allocation34_spill] sm:$0xff] %v7841_v50  ;;  %10784 = vst [vmem:[#allocation36_spill] sm:$0xff] %v7847_v26  ;;  %v7853_v25 = vsel %vm2166_vm4, 1e+30, %v10668_v49  ;;  %vm10791_vm4 = vcmp.eq.s32.totalorder %v5784_v0, %v7717_v61 }
 0x2b2   : > { %4760 = vmatpush1.bf16.msk.msra.mxu1 %vm4759_vm0, %v10772_v36  ;;  %vm2216_vm0 = vcmp.eq.s32.totalorder %v10738_v60, %v7717_v61  ;;  %v7835_v23 = vsel %vm2160_vm3, 1e+30, %v10780_v29  ;;  %10785 = vst [vmem:[#allocation38_spill] sm:$0xff] %v7853_v25  ;;  %vm10786_vm3 = vcmp.eq.s32.totalorder %v10634_v18, %v7405_v33  ;;  %v7865_v19 = vsel %vm2168_vm8, 1e+30, %v10669_v15  ;;  %v10847_v60 = vld [vmem:[#allocation20_spill] sm:$0xff] }
 0x2b3   : > { %v2444_v1 = vrot.slane %v2443_v11, 2  ;;  %4762 = vmatprep.subr.msk.bf16.mxu1 %vm4761_vm1, %v10772_v36  ;;  %10781 = vst [vmem:[#allocation9_spill] sm:$0xff] %v7835_v23  ;;  %vm4763_vm14 = vmpackc.low %vm10787_vm7, %vm10786_vm3  ;;  %v7871_v17 = vsel %vm2170_vm9, 1e+30, %v10670_v22  ;;  %v7877_v49 = vsel %vm10790_vm15, 1e+30, %v10671_v8  ;;  %vm10793_vm1 = vcmp.eq.s32.totalorder %v5787_v32, %v7717_v61 }
 0x2b4   : > { %10788 = vst [vmem:[#allocation40_spill] sm:$0xff] %v7865_v19  ;;  %10789 = vst [vmem:[#allocation42_spill] sm:$0xff] %v7871_v17  ;;  %v7892_v22 = vsel %vm10791_vm4, 1e+30, %v10672_v57  ;;  %v7898_v8 = vsel %vm10793_vm1, 1e+30, %v10673_v14  ;;  %vm10795_vm8 = vcmp.eq.s32.totalorder %v5790_v7, %v7717_v61  ;;  %vm10797_vm9 = vcmp.eq.s32.totalorder %v5793_v5, %v7717_v61 }
 0x2b5   : > { %v2445_v43 = vmin.f32 %v2443_v11, %v2444_v1  ;;  %v2448_v11 = vmin.f32 %v7823_v55, %v7835_v23  ;;  %10792 = vst [vmem:[#allocation44_spill] sm:$0xff] %v7892_v22  ;;  %10794 = vst [vmem:[#allocation46_spill] sm:$0xff] %v7898_v8  ;;  %v2449_v1 = vmin.f32 %v7829_v58, %v7841_v50  ;;  %v7907_v29 = vsel %vm10795_vm8, 1e+30, %v10674_v42  ;;  %v10800_v58 = vld [vmem:[#allocation92_spill] sm:$0xff]  ;;  %v10802_v55 = vld [vmem:[#allocation93_spill] sm:$0xff] }
 0x2b6   : > { %4764 = vmatpush1.bf16.msk.msra.mxu1 %vm4763_vm14, %v10772_v36  ;;  %10796 = vst [vmem:[#allocation48_spill] sm:$0xff] %v7907_v29  ;;  %v7913_v57 = vsel %vm10797_vm9, 1e+30, %v10675_v48  ;;  %vm10798_vm3 = vcmp.eq.s32.totalorder %v5796_v46, %v7717_v61  ;;  %vm10801_vm7 = vcmp.eq.s32.totalorder %v5799_v2, %v7717_v61  ;;  %vm10803_vm14 = vcmp.eq.s32.totalorder %v5802_v47, %v7717_v61 }
 0x2b7   : > { %v2446_v15 = vrot.slane %v2445_v43, 1  ;;  %4766 = vmatprep.subr.msk.bf16.mxu1 %vm4765_vm11, %v10772_v36  ;;  %v7919_v14 = vsel %vm10798_vm3, 1e+30, %v10676_v30  ;;  %v2450_v50 = vmin.f32 %v2448_v11, %v7847_v26  ;;  %v7928_v42 = vsel %vm10801_vm7, 1e+30, %v10800_v58 }
 0x2b8   : > { %v7934_v48 = vsel %vm10803_vm14, 1e+30, %v10802_v55  ;;  %vm10805_vm15 = vcmp.eq.s32.totalorder %v10647_v44, %v7717_v61  ;;  %vm10806_vm11 = vcmp.eq.s32.totalorder %v5775_v31, %v7405_v33  ;;  %vm10807_vm4 = vcmp.eq.s32.totalorder %v10638_v4, %v7405_v33  ;;  %v10810_v55 = vld [vmem:[#allocation94_spill] sm:$0xff] }
 0x2b9   : > { %v7922_v23 = vmin.f32 %v2445_v43, %v2446_v15  ;;  %v7940_v30 = vsel %vm10805_vm15, 1e+30, %v10804_v28  ;;  %vm4767_vm1 = vmpackc.low %vm10807_vm4, %vm10806_vm11  ;;  %v10808_v43 = vld [vmem:[#allocation10_spill] sm:$0xff]  ;;  %vm10809_vm8 = vcmp.eq.s32.totalorder %v10648_v3, %v7717_v61  ;;  %vm10811_vm9 = vcmp.eq.s32.totalorder %v5813_v52, %v7717_v61  ;;  %v10812_v28 = vld [vmem:[#allocation37_spill] sm:$0xff] }
 0x2ba   : > { %v7952_v58 = vsel %vm10809_vm8, 1e+30, %v10808_v43  ;;  %v7958_v11 = vsel %vm10811_vm9, 1e+30, %v10810_v55  ;;  %vm10813_vm3 = vcmp.eq.s32.totalorder %v5816_v6, %v7717_v61  ;;  %v2451_v26 = vmin.f32 %v2449_v1, %v7853_v25  ;;  %4768 = vmatpush1.bf16.msk.msra.mxu1 %vm4767_vm1, %v10772_v36  ;;  %v10816_v43 = vld [vmem:[#allocation68_spill] sm:$0xff]  ;;  %v10817_v55 = vld [vmem:[#allocation71_spill] sm:$0xff] }
 0x2bb   : > { %10799 = vst [vmem:[#allocation50_spill] sm:$0xff] %v7922_v23  ;;  %v7964_v15 = vsel %vm10813_vm3, 1e+30, %v10812_v28  ;;  %vm10814_vm7 = vcmp.eq.s32.totalorder %v5781_v62, %v7717_v61  ;;  %vm10815_vm14 = vcmp.eq.s32.totalorder %v5784_v0, %v7717_v61  ;;  %vm2485_vm11 = vcmp.eq.f32.partialorder %v10816_v43, %v7922_v23  ;;  %v10820_v28 = vld [vmem:[#allocation41_spill] sm:$0xff] }
 0x2bc   : > { %vm4769_vm15 = vmpackc.low %vm10815_vm14, %vm10814_vm7  ;;  %vm2487_vm4 = vcmp.eq.f32.partialorder %v10817_v55, %v7922_v23  ;;  %vm10819_vm8 = vcmp.eq.s32.totalorder %v5819_v45, %v7717_v61  ;;  %vm10821_vm1 = vcmp.eq.s32.totalorder %v5822_v38, %v7717_v61  ;;  %v2549_v51 = vsel %vm2485_vm11, %v10696_v27, 256  ;;  %v10827_v27 = vld [vmem:[#allocation49_spill] sm:$0xff] }
 0x2bd   : > { %v7982_v1 = vsel %vm10819_vm8, 1e+30, %v10818_v59  ;;  %v7988_v25 = vsel %vm10821_vm1, 1e+30, %v10820_v28  ;;  %4770 = vmatprep.subr.msk.bf16.mxu1 %vm4769_vm15, %v10772_v36  ;;  %v2551_v43 = vsel %vm2487_vm4, %v10697_v34, 256  ;;  %v10823_v59 = vld [vmem:[#allocation45_spill] sm:$0xff]  ;;  %vm10825_vm9 = vcmp.eq.s32.totalorder %v10691_v12, %v7717_v61 }
 0x2be   : > { %v7997_v55 = vsel %vm2200_vm13, 1e+30, %v10822_v35  ;;  %v8003_v45 = vsel %vm2202_vm10, 1e+30, %v10823_v59  ;;  %v10824_v28 = vld [vmem:[#allocation47_spill] sm:$0xff]  ;;  %vm10828_vm3 = vcmp.eq.s32.totalorder %v10692_v13, %v7717_v61  ;;  %v10830_v35 = vld [vmem:[#allocation52_spill] sm:$0xff]  ;;  %vm10831_vm7 = vcmp.eq.s32.totalorder %v10699_v63, %v7717_v61 }
 0x2bf   : > { %v8009_v38 = vsel %vm10825_vm9, 1e+30, %v10824_v28  ;;  %v8015_v34 = vsel %vm10828_vm3, 1e+30, %v10827_v27  ;;  %v8021_v10 = vsel %vm10831_vm7, 1e+30, %v10830_v35  ;;  %v2452_v59 = vmin.f32 %v2450_v50, %v7865_v19 }
 0x2c0   : > { %10826 = vst [vmem:[#allocation51_spill] sm:$0xff] %v8009_v38  ;;  %10829 = vst [vmem:[#allocation54_spill] sm:$0xff] %v8015_v34  ;;  %vm10833_vm14 = vcmp.eq.s32.totalorder %v5781_v62, %v7405_v33  ;;  %vm10834_vm15 = vcmp.eq.s32.totalorder %v5784_v0, %v7405_v33  ;;  %v10835_v28 = vld [vmem:[#allocation53_spill] sm:$0xff]  ;;  %v10839_v50 = vld [vmem:[#allocation56_spill] sm:$0xff]  ;;  %v2453_v63 = vmin.f32 %v2451_v26, %v7871_v17  ;;  %v8066_v26 = vsel %vm10184_vm12, 1e+30, %v10737_v9 }
 0x2c1   : > { %10832 = vst [vmem:[#allocation55_spill] sm:$0xff] %v8021_v10  ;;  %vm4771_vm11 = vmpackc.low %vm10834_vm15, %vm10833_vm14  ;;  %v8034_v27 = vsel %vm2210_vm6, 1e+30, %v10835_v28  ;;  %v10837_v13 = vld [vmem:[#allocation57_spill] sm:$0xff]  ;;  %v8046_v19 = vsel %vm2214_vm5, 1e+30, %v10839_v50  ;;  %vm10841_vm4 = vcmp.eq.s32.totalorder %v5787_v32, %v7717_v61  ;;  %vm10842_vm8 = vcmp.eq.s32.totalorder %v5790_v7, %v7717_v61 }
 0x2c2   : > { %10836 = vst [vmem:[#allocation58_spill] sm:$0xff] %v8034_v27  ;;  %v8040_v35 = vsel %vm2212_vm2, 1e+30, %v10837_v13  ;;  %10840 = vst [vmem:[#allocation15_spill] sm:$0xff] %v8046_v19  ;;  %4772 = vmatpush1.bf16.msk.msra.mxu1 %vm4771_vm11, %v10772_v36  ;;  %v8060_v13 = vsel %vm2216_vm0, 1e+30, %v10736_v20  ;;  %v2454_v28 = vmin.f32 %v2452_v59, %v7877_v49  ;;  %v2455_v17 = vmin.f32 %v2453_v63, %v7892_v22 }
 0x2c3   : > { %10838 = vst [vmem:[#allocation60_spill] sm:$0xff] %v8040_v35  ;;  %vm4773_vm1 = vmpackc.low %vm10842_vm8, %vm10841_vm4  ;;  %v10845_v50 = vld [vmem:[#allocation98_spill] sm:$0xff]  ;;  %vm2491_vm3 = vcmp.eq.f32.partialorder %v10846_v39, %v7922_v23  ;;  %vm2493_vm7 = vcmp.eq.f32.partialorder %v10847_v60, %v7922_v23  ;;  %v10848_v59 = vld [vmem:[#allocation23_spill] sm:$0xff]  ;;  %vm10849_vm11 = vcmp.eq.s32.totalorder %v5787_v32, %v7405_v33  ;;  %vm10850_vm4 = vcmp.eq.s32.totalorder %v5790_v7, %v7405_v33 }
 0x2c4   : > { %10843 = vst [vmem:[#allocation21_spill] sm:$0xff] %v8060_v13  ;;  %10844 = vst [vmem:[#allocation13_spill] sm:$0xff] %v8066_v26  ;;  %vm2489_vm9 = vcmp.eq.f32.partialorder %v10845_v50, %v7922_v23  ;;  %4774 = vmatprep.subr.msk.bf16.mxu1 %vm4773_vm1, %v10772_v36  ;;  %v2456_v9 = vmin.f32 %v2454_v28, %v7898_v8  ;;  %v2555_v21 = vsel %vm2491_vm3, %v10698_v16, 256  ;;  %v2557_v60 = vsel %vm2493_vm7, %v10634_v18, 256 }
 0x2c5   : > { %v2553_v20 = vsel %vm2489_vm9, %v10632_v54, 256  ;;  %vm2495_vm15 = vcmp.eq.f32.partialorder %v10848_v59, %v7922_v23  ;;  %vm4775_vm8 = vmpackc.low %vm10850_vm4, %vm10849_vm11  ;;  %v2457_v63 = vmin.f32 %v2455_v17, %v7907_v29  ;;  %vm2615_vm1 = vcmp.lt.s32.totalorder %v2551_v43, %v2555_v21  ;;  %v10853_v17 = vld [vmem:[#allocation24_spill] sm:$0xff] }
 0x2c6   : > { %vm2613_vm14 = vcmp.lt.s32.totalorder %v2549_v51, %v2553_v20  ;;  %4776 = vmatpush1.bf16.msk.msra.mxu1 %vm4775_vm8, %v10772_v36  ;;  %vm10851_vm9 = vcmp.eq.s32.totalorder %v5793_v5, %v7717_v61  ;;  %vm10852_vm3 = vcmp.eq.s32.totalorder %v5796_v46, %v7717_v61  ;;  %v2458_v28 = vmin.f32 %v2456_v9, %v7913_v57 }
 0x2c7   : > { %v2614_v39 = vsel %vm2613_vm14, %v2549_v51, %v2553_v20  ;;  %vm4777_vm12 = vmpackc.low %vm10852_vm3, %vm10851_vm9  ;;  %v2616_v59 = vsel %vm2615_vm1, %v2551_v43, %v2555_v21  ;;  %v2559_v50 = vsel %vm2495_vm15, %v10635_v56, 256  ;;  %v2459_v51 = vmin.f32 %v2457_v63, %v7919_v14  ;;  %v10854_v20 = vld [vmem:[#allocation25_spill] sm:$0xff] }
 0x2c8   : > { %vm2617_vm11 = vcmp.lt.s32.totalorder %v2614_v39, %v2557_v60  ;;  %4778 = vmatprep.subr.msk.bf16.mxu1 %vm4777_vm12, %v10772_v36  ;;  %vm2619_vm7 = vcmp.lt.s32.totalorder %v2616_v59, %v2559_v50  ;;  %vm2497_vm14 = vcmp.eq.f32.partialorder %v10853_v17, %v7922_v23  ;;  %vm2499_vm4 = vcmp.eq.f32.partialorder %v10854_v20, %v7922_v23  ;;  %v10857_v20 = vld [vmem:[#allocation91_spill] sm:$0xff] }
 0x2c9   : > { %v2460_v29 = vmin.f32 %v2458_v28, %v7928_v42  ;;  %v2561_v8 = vsel %vm2497_vm14, %v5775_v31, 256  ;;  %v2563_v21 = vsel %vm2499_vm4, %v10638_v4, 256  ;;  %v2618_v43 = vsel %vm2617_vm11, %v2614_v39, %v2557_v60  ;;  %v10860_v60 = vld [vmem:[#allocation27_spill] sm:$0xff] }
 0x2ca   : > { %vm10855_vm15 = vcmp.eq.s32.totalorder %v5793_v5, %v7405_v33  ;;  %vm10856_vm12 = vcmp.eq.s32.totalorder %v5796_v46, %v7405_v33  ;;  %v2461_v9 = vmin.f32 %v2459_v51, %v7934_v48  ;;  %v2620_v63 = vsel %vm2619_vm7, %v2616_v59, %v2559_v50 }
 0x2cb   : > { %vm4779_vm8 = vmpackc.low %vm10856_vm12, %vm10855_vm15  ;;  %vm2621_vm1 = vcmp.lt.s32.totalorder %v2618_v43, %v2561_v8  ;;  %vm2501_vm9 = vcmp.eq.f32.partialorder %v10857_v20, %v7922_v23  ;;  %vm10858_vm3 = vcmp.eq.s32.totalorder %v5799_v2, %v7717_v61  ;;  %vm10859_vm11 = vcmp.eq.s32.totalorder %v5802_v47, %v7717_v61 }
 0x2cc   : > { %4780 = vmatpush1.bf16.msk.msra.mxu1 %vm4779_vm8, %v10772_v36  ;;  %vm4781_vm14 = vmpackc.low %vm10859_vm11, %vm10858_vm3  ;;  %v2462_v39 = vmin.f32 %v2460_v29, %v7940_v30  ;;  %vm2623_vm4 = vcmp.lt.s32.totalorder %v2620_v63, %v2563_v21  ;;  %vm2503_vm15 = vcmp.eq.f32.partialorder %v10860_v60, %v7922_v23  ;;  %v2565_v50 = vsel %vm2501_vm9, %v5781_v62, 256  ;;  %v10861_v29 = vld [vmem:[#allocation28_spill] sm:$0xff]  ;;  %v10864_v60 = vld [vmem:[#allocation29_spill] sm:$0xff] }
 0x2cd   : > { %4782 = vmatprep.subr.msk.bf16.mxu1 %vm4781_vm14, %v10772_v36  ;;  %v2463_v59 = vmin.f32 %v2461_v9, %v7952_v58  ;;  %v2567_v28 = vsel %vm2503_vm15, %v5784_v0, 256  ;;  %v2622_v51 = vsel %vm2621_vm1, %v2618_v43, %v2561_v8  ;;  %v2624_v20 = vsel %vm2623_vm4, %v2620_v63, %v2563_v21 }
 0x2ce   : > { %v2464_v17 = vmin.f32 %v2462_v39, %v7958_v11  ;;  %vm2625_vm7 = vcmp.lt.s32.totalorder %v2622_v51, %v2565_v50  ;;  %vm2627_vm12 = vcmp.lt.s32.totalorder %v2624_v20, %v2567_v28  ;;  %vm2505_vm8 = vcmp.eq.f32.partialorder %v10861_v29, %v7922_v23 }
 0x2cf   : > { %vm10862_vm3 = vcmp.eq.s32.totalorder %v5799_v2, %v7405_v33  ;;  %vm10863_vm9 = vcmp.eq.s32.totalorder %v5802_v47, %v7405_v33  ;;  %v2465_v9 = vmin.f32 %v2463_v59, %v7964_v15  ;;  %vm2507_vm1 = vcmp.eq.f32.partialorder %v10864_v60, %v7922_v23 }
 0x2d0   : > { %vm4783_vm11 = vmpackc.low %vm10863_vm9, %vm10862_vm3  ;;  %v2569_v8 = vsel %vm2505_vm8, %v5787_v32, 256  ;;  %v2626_v21 = vsel %vm2625_vm7, %v2622_v51, %v2565_v50  ;;  %vm10865_vm14 = vcmp.eq.s32.totalorder %v10647_v44, %v7717_v61  ;;  %vm10866_vm4 = vcmp.eq.s32.totalorder %v10648_v3, %v7717_v61  ;;  %v10867_v50 = vld [vmem:[#allocation30_spill] sm:$0xff] }
 0x2d1   : > { %4784 = vmatpush1.bf16.msk.msra.mxu1 %vm4783_vm11, %v10772_v36  ;;  %vm4785_vm15 = vmpackc.low %vm10866_vm4, %vm10865_vm14  ;;  %v2466_v43 = vmin.f32 %v2464_v17, %v7982_v1  ;;  %v2571_v63 = vsel %vm2507_vm1, %v5790_v7, 256  ;;  %v2628_v39 = vsel %vm2627_vm12, %v2624_v20, %v2567_v28  ;;  %vm2629_vm3 = vcmp.lt.s32.totalorder %v2626_v21, %v2569_v8 }
 0x2d2   : > { %4786 = vmatprep.subr.msk.bf16.mxu1 %vm4785_vm15, %v10772_v36  ;;  %v2467_v59 = vmin.f32 %v2465_v9, %v7988_v25  ;;  %vm2631_vm7 = vcmp.lt.s32.totalorder %v2628_v39, %v2571_v63  ;;  %vm2509_vm8 = vcmp.eq.f32.partialorder %v10867_v50, %v7922_v23  ;;  %vm2511_vm9 = vcmp.eq.f32.partialorder %v7553_v40, %v7922_v23 }
 0x2d3   : > { %v2468_v51 = vmin.f32 %v2466_v43, %v7997_v55  ;;  %v2573_v60 = vsel %vm2509_vm8, %v5793_v5, 256  ;;  %v2575_v17 = vsel %vm2511_vm9, %v5796_v46, 256  ;;  %v2630_v29 = vsel %vm2629_vm3, %v2626_v21, %v2569_v8  ;;  %v10872_v8 = vld [vmem:[#allocation26_spill] sm:$0xff] }
 0x2d4   : > { %vm10868_vm12 = vcmp.eq.s32.totalorder %v10647_v44, %v7405_v33  ;;  %vm10869_vm11 = vcmp.eq.s32.totalorder %v10648_v3, %v7405_v33  ;;  %v2469_v20 = vmin.f32 %v2467_v59, %v8003_v45  ;;  %v2632_v28 = vsel %vm2631_vm7, %v2628_v39, %v2571_v63 }
 0x2d5   : > { %vm4787_vm1 = vmpackc.low %vm10869_vm11, %vm10868_vm12  ;;  %vm2633_vm14 = vcmp.lt.s32.totalorder %v2630_v29, %v2573_v60  ;;  %vm2513_vm4 = vcmp.eq.f32.partialorder %v7560_v53, %v7922_v23  ;;  %vm10870_vm15 = vcmp.eq.s32.totalorder %v5813_v52, %v7717_v61  ;;  %vm10871_vm3 = vcmp.eq.s32.totalorder %v5816_v6, %v7717_v61 }
 0x2d6   : > { %4788 = vmatpush1.bf16.msk.msra.mxu1 %vm4787_vm1, %v10772_v36  ;;  %vm4789_vm8 = vmpackc.low %vm10871_vm3, %vm10870_vm15  ;;  %v2470_v9 = vmin.f32 %v2468_v51, %v8009_v38  ;;  %vm2635_vm9 = vcmp.lt.s32.totalorder %v2632_v28, %v2575_v17  ;;  %vm2515_vm12 = vcmp.eq.f32.partialorder %v10872_v8, %v7922_v23  ;;  %v2577_v21 = vsel %vm2513_vm4, %v5799_v2, 256  ;;  %v10873_v51 = vld [vmem:[#allocation7_spill] sm:$0xff]  ;;  %v10876_v8 = vld [vmem:[#allocation5_spill] sm:$0xff] }
 0x2d7   : > { %4790 = vmatprep.subr.msk.bf16.mxu1 %vm4789_vm8, %v10772_v36  ;;  %v2471_v43 = vmin.f32 %v2469_v20, %v8015_v34  ;;  %v2579_v63 = vsel %vm2515_vm12, %v5802_v47, 256  ;;  %v2634_v39 = vsel %vm2633_vm14, %v2630_v29, %v2573_v60  ;;  %v2636_v59 = vsel %vm2635_vm9, %v2632_v28, %v2575_v17  ;;  %v10877_v17 = vld [vmem:[#allocation75_spill] sm:$0xff]  ;;  %v10879_v28 = vld [vmem:[#allocation76_spill] sm:$0xff] }
 0x2d8   : > { %v2472_v53 = vmin.f32 %v2470_v9, %v8021_v10  ;;  %vm2637_vm7 = vcmp.lt.s32.totalorder %v2634_v39, %v2577_v21  ;;  %vm2639_vm11 = vcmp.lt.s32.totalorder %v2636_v59, %v2579_v63  ;;  %vm2517_vm1 = vcmp.eq.f32.partialorder %v10873_v51, %v7922_v23 }
 0x2d9   : > { %vm10874_vm15 = vcmp.eq.s32.totalorder %v5813_v52, %v7405_v33  ;;  %vm10875_vm4 = vcmp.eq.s32.totalorder %v5816_v6, %v7405_v33  ;;  %v2473_v20 = vmin.f32 %v2471_v43, %v8034_v27  ;;  %vm2519_vm14 = vcmp.eq.f32.partialorder %v10876_v8, %v7922_v23 }
 0x2da   : > { %vm4791_vm3 = vmpackc.low %vm10875_vm4, %vm10874_vm15  ;;  %v2581_v60 = vsel %vm2517_vm1, %v10647_v44, 256  ;;  %v2638_v29 = vsel %vm2637_vm7, %v2634_v39, %v2577_v21  ;;  %vm10878_vm8 = vcmp.eq.s32.totalorder %v10877_v17, %v7717_v61  ;;  %vm10880_vm9 = vcmp.eq.s32.totalorder %v10879_v28, %v7717_v61  ;;  %v10881_v21 = vld [vmem:[#allocation35_spill] sm:$0xff]  ;;  %v10882_v39 = vld [vmem:[#allocation14_spill] sm:$0xff] }
 0x2db   : > { %4792 = vmatpush1.bf16.msk.msra.mxu1 %vm4791_vm3, %v10772_v36  ;;  %vm4793_vm12 = vmpackc.low %vm10880_vm9, %vm10878_vm8  ;;  %v2474_v9 = vmin.f32 %v2472_v53, %v8040_v35  ;;  %v2583_v51 = vsel %vm2519_vm14, %v10648_v3, 256  ;;  %v2640_v43 = vsel %vm2639_vm11, %v2636_v59, %v2579_v63  ;;  %vm2641_vm15 = vcmp.lt.s32.totalorder %v2638_v29, %v2581_v60 }
 0x2dc   : > { %4794 = vmatprep.subr.msk.bf16.mxu1 %vm4793_vm12, %v10772_v36  ;;  %v2475_v8 = vmin.f32 %v2473_v20, %v8046_v19  ;;  %vm2643_vm7 = vcmp.lt.s32.totalorder %v2640_v43, %v2583_v51  ;;  %vm2521_vm1 = vcmp.eq.f32.partialorder %v10881_v21, %v7922_v23  ;;  %vm2523_vm4 = vcmp.eq.f32.partialorder %v10882_v39, %v7922_v23  ;;  %v10885_v20 = vld [vmem:[#allocation12_spill] sm:$0xff]  ;;  %vm4797_vm12 = vmpackc.low %vm2202_vm10, %vm2200_vm13  ;;  %v10889_v21 = vld [vmem:[#allocation19_spill] sm:$0xff] }
 0x2dd   : > { %v2476_v40 = vmin.f32 %v2474_v9, %v8060_v13  ;;  %v2585_v50 = vsel %vm2521_vm1, %v5813_v52, 256  ;;  %v2587_v53 = vsel %vm2523_vm4, %v5816_v6, 256  ;;  %v2642_v35 = vsel %vm2641_vm15, %v2638_v29, %v2581_v60  ;;  %v10886_v9 = vld [vmem:[#allocation77_spill] sm:$0xff]  ;;  %v10887_v60 = vld [vmem:[#allocation18_spill] sm:$0xff]  ;;  %v10888_v39 = vld [vmem:[#allocation16_spill] sm:$0xff] }
 0x2de   : > { %vm10883_vm11 = vcmp.eq.s32.totalorder %v10877_v17, %v7405_v33  ;;  %vm10884_vm3 = vcmp.eq.s32.totalorder %v10879_v28, %v7405_v33  ;;  %v2477_v63 = vmin.f32 %v2475_v8, %v8066_v26  ;;  %v2644_v59 = vsel %vm2643_vm7, %v2640_v43, %v2583_v51 }
 0x2df   : > { %vm4795_vm14 = vmpackc.low %vm10884_vm3, %vm10883_vm11  ;;  %vm2645_vm8 = vcmp.lt.s32.totalorder %v2642_v35, %v2585_v50  ;;  %vm2525_vm9 = vcmp.eq.f32.partialorder %v10885_v20, %v7922_v23  ;;  %vm2647_vm15 = vcmp.lt.s32.totalorder %v2644_v59, %v2587_v53  ;;  %vm2527_vm1 = vcmp.eq.f32.partialorder %v10887_v60, %v7922_v23 }
 0x2e0   : > { %4796 = vmatpush1.bf16.msk.msra.mxu1 %vm4795_vm14, %v10772_v36  ;;  %v2589_v8 = vsel %vm2525_vm9, %v10877_v17, 256  ;;  %v2646_v51 = vsel %vm2645_vm8, %v2642_v35, %v2585_v50  ;;  %v2478_v29 = vmin.f32 %v2476_v40, %v2477_v63  ;;  %v2591_v43 = vsel %vm2527_vm1, %v10879_v28, 256  ;;  %v10893_v63 = vld [vmem:[#allocation80_spill] sm:$0xff] }
 0x2e1   : > { %4798 = vmatprep.subr.msk.bf16.mxu1 %vm4797_vm12, %v10772_v36  ;;  %v2648_v20 = vsel %vm2647_vm15, %v2644_v59, %v2587_v53  ;;  %vm2649_vm7 = vcmp.lt.s32.totalorder %v2646_v51, %v2589_v8  ;;  %vm2529_vm11 = vcmp.eq.f32.partialorder %v10888_v39, %v7922_v23  ;;  %vm2531_vm10 = vcmp.eq.f32.partialorder %v10889_v21, %v7922_v23  ;;  %v10895_v59 = vld [vmem:[#allocation22_spill] sm:$0xff] }
 0x2e2   : > { %vm2651_vm4 = vcmp.lt.s32.totalorder %v2648_v20, %v2591_v43  ;;  %v2650_v26 = vsel %vm2649_vm7, %v2646_v51, %v2589_v8  ;;  %vm10890_vm13 = vcmp.eq.s32.totalorder %v10886_v9, %v7405_v33  ;;  %vm10891_vm3 = vcmp.eq.s32.totalorder %v10688_v24, %v7405_v33  ;;  %v10896_v8 = vld [vmem:[#allocation88_spill] sm:$0xff] }
 0x2e3   : > { %vm4799_vm14 = vmpackc.low %vm10891_vm3, %vm10890_vm13  ;;  %v2479_v40 = vrot.slane %v2478_v29, 4  ;;  %v2593_v35 = vsel %vm2529_vm11, %v10886_v9, 256  ;;  %v2595_v50 = vsel %vm2531_vm10, %v10688_v24, 256  ;;  %v2652_v53 = vsel %vm2651_vm4, %v2648_v20, %v2591_v43 }
 0x2e4   : > { %4800 = vmatpush1.bf16.msk.msra.mxu1 %vm4799_vm14, %v10772_v36  ;;  %vm10892_vm8 = vcmp.eq.s32.totalorder %v10691_v12, %v7717_v61  ;;  %vm10894_vm9 = vcmp.eq.s32.totalorder %v10893_v63, %v7717_v61  ;;  %vm2653_vm15 = vcmp.lt.s32.totalorder %v2650_v26, %v2593_v35  ;;  %vm2655_vm1 = vcmp.lt.s32.totalorder %v2652_v53, %v2595_v50 }
 0x2e5   : > { %vm4801_vm12 = vmpackc.low %vm10894_vm9, %vm10892_vm8  ;;  %vm2533_vm7 = vcmp.eq.f32.partialorder %v10895_v59, %v7922_v23  ;;  %vm2535_vm11 = vcmp.eq.f32.partialorder %v10896_v8, %v7922_v23  ;;  %v2480_v20 = vmin.f32 %v2478_v29, %v2479_v40  ;;  %v2654_v21 = vsel %vm2653_vm15, %v2650_v26, %v2593_v35  ;;  %v10899_v59 = vld [vmem:[#allocation89_spill] sm:$0xff]  ;;  %v10900_v8 = vld [vmem:[#allocation90_spill] sm:$0xff] }
 0x2e6   : > { %4802 = vmatprep.subr.msk.bf16.mxu1 %vm4801_vm12, %v10772_v36  ;;  %v2597_v51 = vsel %vm2533_vm7, %v10691_v12, 256  ;;  %v2599_v43 = vsel %vm2535_vm11, %v10893_v63, 256  ;;  %v2656_v39 = vsel %vm2655_vm1, %v2652_v53, %v2595_v50  ;;  %vm10897_vm10 = vcmp.eq.s32.totalorder %v10691_v12, %v7405_v33  ;;  %v10901_v26 = vld [vmem:[#allocation81_spill] sm:$0xff] }
 0x2e7   : > { %vm2657_vm4 = vcmp.lt.s32.totalorder %v2654_v21, %v2597_v51  ;;  %vm10898_vm13 = vcmp.eq.s32.totalorder %v10893_v63, %v7405_v33  ;;  %vm2537_vm14 = vcmp.eq.f32.partialorder %v10899_v59, %v7922_v23  ;;  %vm2539_vm8 = vcmp.eq.f32.partialorder %v10900_v8, %v7922_v23  ;;  %v10903_v8 = vld [vmem:[#allocation31_spill] sm:$0xff]  ;;  %v10904_v59 = vld [vmem:[#allocation33_spill] sm:$0xff] }
 0x2e8   : > { %vm4803_vm3 = vmpackc.low %vm10898_vm13, %vm10897_vm10  ;;  %v2481_v29 = vrot.slane %v2480_v20, 2  ;;  %vm2659_vm9 = vcmp.lt.s32.totalorder %v2656_v39, %v2599_v43  ;;  %vm10902_vm12 = vcmp.eq.s32.totalorder %v10901_v26, %v7717_v61  ;;  %v2601_v40 = vsel %vm2537_vm14, %v10901_v26, 256 }
 0x2e9   : > { %4804 = vmatpush1.bf16.msk.msra.mxu1 %vm4803_vm3, %v10772_v36  ;;  %vm4805_vm15 = vmpackc.low %vm2210_vm6, %vm10902_vm12  ;;  %v2603_v35 = vsel %vm2539_vm8, %v10700_v37, 256  ;;  %v2658_v50 = vsel %vm2657_vm4, %v2654_v21, %v2597_v51  ;;  %v2660_v53 = vsel %vm2659_vm9, %v2656_v39, %v2599_v43  ;;  %vm2541_vm1 = vcmp.eq.f32.partialorder %v10903_v8, %v7922_v23  ;;  %v10907_v21 = vld [vmem:[#allocation84_spill] sm:$0xff]  ;;  %v10908_v8 = vld [vmem:[#allocation6_spill] sm:$0xff] }
 0x2ea   : > { %4806 = vmatprep.subr.msk.bf16.mxu1 %vm4805_vm15, %v10772_v36  ;;  %vm2543_vm7 = vcmp.eq.f32.partialorder %v10904_v59, %v7922_v23  ;;  %v2482_v60 = vmin.f32 %v2480_v20, %v2481_v29  ;;  %vm2661_vm11 = vcmp.lt.s32.totalorder %v2658_v50, %v2601_v40  ;;  %vm2663_vm10 = vcmp.lt.s32.totalorder %v2660_v53, %v2603_v35  ;;  %vm4809_vm14 = vmpackc.low %vm2214_vm5, %vm2212_vm2  ;;  %v10909_v20 = vld [vmem:[#allocation59_spill] sm:$0xff]  ;;  %v10910_v29 = vld [vmem:[#allocation85_spill] sm:$0xff] }
 0x2eb   : > { %v2605_v13 = vsel %vm2541_vm1, %v10702_v41, 256  ;;  %vm10905_vm6 = vcmp.eq.s32.totalorder %v10901_v26, %v7405_v33  ;;  %vm10906_vm13 = vcmp.eq.s32.totalorder %v10700_v37, %v7405_v33  ;;  %v2607_v39 = vsel %vm2543_vm7, %v10907_v21, 256  ;;  %v10914_v37 = vld [vmem:[#allocation61_spill] sm:$0xff] }
 0x2ec   : > { %vm4807_vm3 = vmpackc.low %vm10906_vm13, %vm10905_vm6  ;;  %v2662_v51 = vsel %vm2661_vm11, %v2658_v50, %v2601_v40  ;;  %v2664_v43 = vsel %vm2663_vm10, %v2660_v53, %v2603_v35  ;;  %vm2545_vm4 = vcmp.eq.f32.partialorder %v10908_v8, %v7922_v23  ;;  %v2483_v59 = vrot.slane %v2482_v60, 1  ;;  %v10911_v35 = vld [vmem:[#allocation86_spill] sm:$0xff] }
 0x2ed   : > { %4808 = vmatpush1.bf16.msk.msra.mxu1 %vm4807_vm3, %v10772_v36  ;;  %vm2665_vm8 = vcmp.lt.s32.totalorder %v2662_v51, %v2605_v13  ;;  %vm2667_vm9 = vcmp.lt.s32.totalorder %v2664_v43, %v2607_v39  ;;  %vm2547_vm12 = vcmp.eq.f32.partialorder %v10909_v20, %v7922_v23  ;;  %v2609_v40 = vsel %vm2545_vm4, %v10910_v29, 256 }
 0x2ee   : > { %4810 = vmatprep.subr.msk.bf16.mxu1 %vm4809_vm14, %v10772_v36  ;;  %v2611_v50 = vsel %vm2547_vm12, %v10911_v35, 256  ;;  %v2666_v53 = vsel %vm2665_vm8, %v2662_v51, %v2605_v13  ;;  %v2668_v8 = vsel %vm2667_vm9, %v2664_v43, %v2607_v39  ;;  %v8309_v19 = vmin.f32 %v2482_v60, %v2483_v59  ;;  %v10915_v13 = vld [vmem:[#allocation11_spill] sm:$0xff]  ;;  %v10916_v60 = vld [vmem:[#allocation9_spill] sm:$0xff]  ;;  %v10917_v59 = vld [vmem:[#allocation34_spill] sm:$0xff] }
 0x2ef   : > { %vm2669_vm15 = vcmp.lt.s32.totalorder %v2666_v53, %v2609_v40  ;;  %vm2671_vm1 = vcmp.lt.s32.totalorder %v2668_v8, %v2611_v50  ;;  %vm10912_vm2 = vcmp.eq.s32.totalorder %v10702_v41, %v7405_v33  ;;  %vm10913_vm5 = vcmp.eq.s32.totalorder %v10907_v21, %v7405_v33  ;;  %v10920_v51 = vld [vmem:[#allocation63_spill] sm:$0xff] }
 0x2f0   : > { %vm4811_vm7 = vmpackc.low %vm10913_vm5, %vm10912_vm2  ;;  %v8317_v20 = vsel %vm2669_vm15, %v2666_v53, %v2609_v40  ;;  %v8319_v23 = vsel %vm2671_vm1, %v2668_v8, %v2611_v50  ;;  %vm2486_vm11 = vcmp.eq.f32.partialorder %v10914_v37, %v8309_v19  ;;  %vm2488_vm10 = vcmp.eq.f32.partialorder %v10915_v13, %v8309_v19  ;;  %v10919_v8 = vld [vmem:[#allocation62_spill] sm:$0xff]  ;;  %v10921_v53 = vld [vmem:[#allocation36_spill] sm:$0xff] }
 0x2f1   : > { %vm2490_vm6 = vcmp.eq.f32.partialorder %v10916_v60, %v8309_v19  ;;  %vm2492_vm13 = vcmp.eq.f32.partialorder %v10917_v59, %v8309_v19  ;;  %4812 = vmatpush1.bf16.msk.msra.mxu1 %vm4811_vm7, %v10772_v36  ;;  %vm10918_vm3 = vcmp.eq.s32.totalorder %v10911_v35, %v7717_v61  ;;  %v2550_v39 = vsel %vm2486_vm11, %v10919_v8, 256  ;;  %v10922_v59 = vld [vmem:[#allocation38_spill] sm:$0xff] }
 0x2f2   : > { %vm4813_vm4 = vmpackc.low %vm10918_vm3, %vm2216_vm0  ;;  %v2552_v43 = vsel %vm2488_vm10, %v10920_v51, 256  ;;  %v2554_v40 = vsel %vm2490_vm6, %v10632_v54, 256  ;;  %v2556_v50 = vsel %vm2492_vm13, %v10698_v16, 256  ;;  %vm2494_vm9 = vcmp.eq.f32.partialorder %v10921_v53, %v8309_v19  ;;  %v10925_v53 = vld [vmem:[#allocation40_spill] sm:$0xff] }
 0x2f3   : > { %4814 = vmatprep.subr.msk.bf16.mxu1 %vm4813_vm4, %v10772_v36  ;;  %vm2684_vm14 = vcmp.lt.s32.totalorder %v2550_v39, %v2554_v40  ;;  %vm2686_vm8 = vcmp.lt.s32.totalorder %v2552_v43, %v2556_v50  ;;  %vm2496_vm12 = vcmp.eq.f32.partialorder %v10922_v59, %v8309_v19  ;;  %v2558_v61 = vsel %vm2494_vm9, %v10634_v18, 256  ;;  %v10926_v59 = vld [vmem:[#allocation42_spill] sm:$0xff]  ;;  %v8367_v18 = vld [vmem:[%s6721_s26] sm:$0xff] }
 0x2f4   : > { %v2560_v60 = vsel %vm2496_vm12, %v10635_v56, 256  ;;  %v2685_v13 = vsel %vm2684_vm14, %v2550_v39, %v2554_v40  ;;  %v2687_v37 = vsel %vm2686_vm8, %v2552_v43, %v2556_v50  ;;  %vm10923_vm0 = vcmp.eq.s32.totalorder %v10910_v29, %v7405_v33  ;;  %10927 = vst [vmem:[#allocation17_spill] sm:$0xff] %v8367_v18 }
 0x2f5   : > { %vm10924_vm15 = vcmp.eq.s32.totalorder %v10911_v35, %v7405_v33  ;;  %vm2688_vm2 = vcmp.lt.s32.totalorder %v2685_v13, %v2558_v61  ;;  %vm2690_vm5 = vcmp.lt.s32.totalorder %v2687_v37, %v2560_v60  ;;  %vm2498_vm7 = vcmp.eq.f32.partialorder %v10925_v53, %v8309_v19 }
 0x2f6   : > { %vm4815_vm1 = vmpackc.low %vm10924_vm15, %vm10923_vm0  ;;  %vm2500_vm11 = vcmp.eq.f32.partialorder %v10926_v59, %v8309_v19  ;;  %v2562_v39 = vsel %vm2498_vm7, %v5775_v31, 256  ;;  %v2689_v40 = vsel %vm2688_vm2, %v2685_v13, %v2558_v61  ;;  %v2691_v50 = vsel %vm2690_vm5, %v2687_v37, %v2560_v60  ;;  %v10928_v37 = vld [vmem:[#allocation46_spill] sm:$0xff]  ;;  %v10929_v13 = vld [vmem:[#allocation48_spill] sm:$0xff] }
 0x2f7   : > { %4816 = vmatpush1.bf16.msk.msra.mxu1 %vm4815_vm1, %v10772_v36  ;;  %v2564_v43 = vsel %vm2500_vm11, %v10638_v4, 256  ;;  %vm2692_vm10 = vcmp.lt.s32.totalorder %v2689_v40, %v2562_v39  ;;  %vm2502_vm13 = vcmp.eq.f32.partialorder %v7877_v49, %v8309_v19  ;;  %vm2504_vm3 = vcmp.eq.f32.partialorder %v7892_v22, %v8309_v19  ;;  %v10930_v60 = vld [vmem:[#allocation95_spill] sm:$0xff] }
 0x2f8   : > { %vm2694_vm6 = vcmp.lt.s32.totalorder %v2691_v50, %v2564_v43  ;;  %v2566_v33 = vsel %vm2502_vm13, %v5781_v62, 256  ;;  %v2568_v59 = vsel %vm2504_vm3, %v5784_v0, 256  ;;  %v2693_v53 = vsel %vm2692_vm10, %v2689_v40, %v2562_v39 }
 0x2f9   : > { %v2695_v56 = vsel %vm2694_vm6, %v2691_v50, %v2564_v43  ;;  %vm2696_vm4 = vcmp.lt.s32.totalorder %v2693_v53, %v2566_v33  ;;  %vm2506_vm8 = vcmp.eq.f32.partialorder %v10928_v37, %v8309_v19  ;;  %vm2508_vm9 = vcmp.eq.f32.partialorder %v10929_v13, %v8309_v19 }
 0x2fa   : > { %3686 = vmatmul.mubr.f32.vlgmr.msra.gmra.mrb[2].mxu1 %v8367_v18  ;;  %vm2698_vm14 = vcmp.lt.s32.totalorder %v2695_v56, %v2568_v59  ;;  %v2570_v61 = vsel %vm2506_vm8, %v5787_v32, 256  ;;  %v2572_v22 = vsel %vm2508_vm9, %v5790_v7, 256  ;;  %v2697_v39 = vsel %vm2696_vm4, %v2693_v53, %v2566_v33 }
 0x2fb   : > { %3827 = vmatprep.mubr.f32.mxu1 %v10930_v60  ;;  %v2699_v43 = vsel %vm2698_vm14, %v2695_v56, %v2568_v59  ;;  %vm2700_vm12 = vcmp.lt.s32.totalorder %v2697_v39, %v2570_v61  ;;  %vm2510_vm15 = vcmp.eq.f32.partialorder %v7913_v57, %v8309_v19  ;;  %vm2512_vm1 = vcmp.eq.f32.partialorder %v7919_v14, %v8309_v19 }
 0x2fc   : > { %vm2702_vm0 = vcmp.lt.s32.totalorder %v2699_v43, %v2572_v22  ;;  %v2574_v40 = vsel %vm2510_vm15, %v5793_v5, 256  ;;  %v2576_v50 = vsel %vm2512_vm1, %v5796_v46, 256  ;;  %v2701_v18 = vsel %vm2700_vm12, %v2697_v39, %v2570_v61 }
 0x2fd   : > { %v2703_v60 = vsel %vm2702_vm0, %v2699_v43, %v2572_v22  ;;  %vm2704_vm2 = vcmp.lt.s32.totalorder %v2701_v18, %v2574_v40  ;;  %vm2514_vm7 = vcmp.eq.f32.partialorder %v7928_v42, %v8309_v19  ;;  %vm2516_vm11 = vcmp.eq.f32.partialorder %v7934_v48, %v8309_v19 }
 0x2fe   : > { %vm2706_vm5 = vcmp.lt.s32.totalorder %v2703_v60, %v2576_v50  ;;  %v2578_v56 = vsel %vm2514_vm7, %v5799_v2, 256  ;;  %v2580_v59 = vsel %vm2516_vm11, %v5802_v47, 256  ;;  %v2705_v53 = vsel %vm2704_vm2, %v2701_v18, %v2574_v40 }
 0x2ff   : > { %v2707_v33 = vsel %vm2706_vm5, %v2703_v60, %v2576_v50  ;;  %vm2708_vm10 = vcmp.lt.s32.totalorder %v2705_v53, %v2578_v56  ;;  %vm2518_vm13 = vcmp.eq.f32.partialorder %v7940_v30, %v8309_v19  ;;  %vm2520_vm3 = vcmp.eq.f32.partialorder %v7952_v58, %v8309_v19 }
 0x300   : > { %vm2710_vm6 = vcmp.lt.s32.totalorder %v2707_v33, %v2580_v59  ;;  %v2582_v22 = vsel %vm2518_vm13, %v10647_v44, 256  ;;  %v2584_v61 = vsel %vm2520_vm3, %v10648_v3, 256  ;;  %v2709_v39 = vsel %vm2708_vm10, %v2705_v53, %v2578_v56 }
 0x301   : > { %v2711_v43 = vsel %vm2710_vm6, %v2707_v33, %v2580_v59  ;;  %vm2712_vm4 = vcmp.lt.s32.totalorder %v2709_v39, %v2582_v22  ;;  %vm2522_vm8 = vcmp.eq.f32.partialorder %v7958_v11, %v8309_v19  ;;  %vm2524_vm9 = vcmp.eq.f32.partialorder %v7964_v15, %v8309_v19 }
 0x302   : > { %vm2714_vm14 = vcmp.lt.s32.totalorder %v2711_v43, %v2584_v61  ;;  %v2586_v18 = vsel %vm2522_vm8, %v5813_v52, 256  ;;  %v2588_v40 = vsel %vm2524_vm9, %v5816_v6, 256  ;;  %v2713_v50 = vsel %vm2712_vm4, %v2709_v39, %v2582_v22 }
 0x303   : > { %v2715_v60 = vsel %vm2714_vm14, %v2711_v43, %v2584_v61  ;;  %vm2716_vm12 = vcmp.lt.s32.totalorder %v2713_v50, %v2586_v18  ;;  %vm2526_vm15 = vcmp.eq.f32.partialorder %v7982_v1, %v8309_v19  ;;  %vm2528_vm1 = vcmp.eq.f32.partialorder %v7988_v25, %v8309_v19 }
 0x304   : > { %vm2718_vm0 = vcmp.lt.s32.totalorder %v2715_v60, %v2588_v40  ;;  %v2590_v56 = vsel %vm2526_vm15, %v10877_v17, 256  ;;  %v2592_v59 = vsel %vm2528_vm1, %v10879_v28, 256  ;;  %v2717_v53 = vsel %vm2716_vm12, %v2713_v50, %v2586_v18 }
 0x305   : > { %v2719_v33 = vsel %vm2718_vm0, %v2715_v60, %v2588_v40  ;;  %vm2720_vm2 = vcmp.lt.s32.totalorder %v2717_v53, %v2590_v56  ;;  %vm2530_vm7 = vcmp.eq.f32.partialorder %v7997_v55, %v8309_v19  ;;  %vm2532_vm11 = vcmp.eq.f32.partialorder %v8003_v45, %v8309_v19 }
 0x306   : > { %vm2722_vm5 = vcmp.lt.s32.totalorder %v2719_v33, %v2592_v59  ;;  %v2594_v22 = vsel %vm2530_vm7, %v10886_v9, 256  ;;  %v2596_v61 = vsel %vm2532_vm11, %v10688_v24, 256  ;;  %v2721_v39 = vsel %vm2720_vm2, %v2717_v53, %v2590_v56 }
 0x307   : > { %v2723_v43 = vsel %vm2722_vm5, %v2719_v33, %v2592_v59  ;;  %vm2724_vm10 = vcmp.lt.s32.totalorder %v2721_v39, %v2594_v22  ;;  %vm2534_vm13 = vcmp.eq.f32.partialorder %v8009_v38, %v8309_v19  ;;  %vm2536_vm3 = vcmp.eq.f32.partialorder %v8015_v34, %v8309_v19  ;;  %v10931_v59 = vld [vmem:[#allocation82_spill] sm:$0xff]  ;;  %v10932_v38 = vld [vmem:[#allocation60_spill] sm:$0xff] }
 0x308   : > { %vm2726_vm6 = vcmp.lt.s32.totalorder %v2723_v43, %v2596_v61  ;;  %v2598_v18 = vsel %vm2534_vm13, %v10691_v12, 256  ;;  %v2600_v40 = vsel %vm2536_vm3, %v10893_v63, 256  ;;  %v2725_v50 = vsel %vm2724_vm10, %v2721_v39, %v2594_v22  ;;  %v10933_v22 = vld [vmem:[#allocation15_spill] sm:$0xff] }
 0x309   : > { %v2727_v60 = vsel %vm2726_vm6, %v2723_v43, %v2596_v61  ;;  %vm2728_vm4 = vcmp.lt.s32.totalorder %v2725_v50, %v2598_v18  ;;  %vm2538_vm8 = vcmp.eq.f32.partialorder %v8021_v10, %v8309_v19  ;;  %vm2540_vm9 = vcmp.eq.f32.partialorder %v8034_v27, %v8309_v19  ;;  %v10934_v10 = vld [vmem:[#allocation21_spill] sm:$0xff] }
 0x30a   : > { %vm2730_vm14 = vcmp.lt.s32.totalorder %v2727_v60, %v2600_v40  ;;  %v2602_v56 = vsel %vm2538_vm8, %v10901_v26, 256  ;;  %v2604_v53 = vsel %vm2540_vm9, %v10931_v59, 256  ;;  %v2729_v33 = vsel %vm2728_vm4, %v2725_v50, %v2598_v18  ;;  %v10935_v18 = vld [vmem:[#allocation13_spill] sm:$0xff] }
 0x30b   : > { %v2731_v34 = vsel %vm2730_vm14, %v2727_v60, %v2600_v40  ;;  %vm2732_vm12 = vcmp.lt.s32.totalorder %v2729_v33, %v2602_v56  ;;  %vm2542_vm15 = vcmp.eq.f32.partialorder %v10932_v38, %v8309_v19  ;;  %vm2544_vm1 = vcmp.eq.f32.partialorder %v10933_v22, %v8309_v19 }
 0x30c   : > { %vm2734_vm0 = vcmp.lt.s32.totalorder %v2731_v34, %v2604_v53  ;;  %v2606_v61 = vsel %vm2542_vm15, %v10702_v41, 256  ;;  %v2608_v39 = vsel %vm2544_vm1, %v10907_v21, 256  ;;  %v2733_v43 = vsel %vm2732_vm12, %v2729_v33, %v2602_v56 }
 0x30d   : > { %v2735_v27 = vsel %vm2734_vm0, %v2731_v34, %v2604_v53  ;;  %vm2736_vm2 = vcmp.lt.s32.totalorder %v2733_v43, %v2606_v61  ;;  %vm2546_vm7 = vcmp.eq.f32.partialorder %v10934_v10, %v8309_v19  ;;  %vm2548_vm11 = vcmp.eq.f32.partialorder %v10935_v18, %v8309_v19 }
 0x30e   : > { %vm2738_vm5 = vcmp.lt.s32.totalorder %v2735_v27, %v2608_v39  ;;  %v2610_v40 = vsel %vm2546_vm7, %v10910_v29, 256  ;;  %v2612_v50 = vsel %vm2548_vm11, %v10911_v35, 256  ;;  %v2737_v60 = vsel %vm2736_vm2, %v2733_v43, %v2606_v61 }
 0x30f   : > { %v2739_v22 = vsel %vm2738_vm5, %v2735_v27, %v2608_v39  ;;  %vm2740_vm10 = vcmp.lt.s32.totalorder %v2737_v60, %v2610_v40  ;;  %vm2673_vm13 = vcmp.lt.s32.totalorder %v8317_v20, %v8319_v23 }
 0x310   : > { %vm2742_vm6 = vcmp.lt.s32.totalorder %v2739_v22, %v2612_v50  ;;  %v2741_v34 = vsel %vm2740_vm10, %v2737_v60, %v2610_v40  ;;  %v2674_v53 = vsel %vm2673_vm13, %v8317_v20, %v8319_v23  ;;  %v10938_v20 = vld [vmem:[#allocation61_spill] sm:$0xff] }
 0x311   : > { %v2743_v56 = vsel %vm2742_vm6, %v2739_v22, %v2612_v50  ;;  %v2675_v33 = vrot.slane %v2674_v53, 4  ;;  %v10940_v50 = vld [vmem:[#allocation9_spill] sm:$0xff] }
 0x312   : > { %vm2744_vm3 = vcmp.lt.s32.totalorder %v2741_v34, %v2743_v56 }
 0x313   : > { %v2745_v10 = vsel %vm2744_vm3, %v2741_v34, %v2743_v56  ;;  %vm2676_vm4 = vcmp.lt.s32.totalorder %v2674_v53, %v2675_v33  ;;  %v10941_v34 = vld [vmem:[#allocation34_spill] sm:$0xff] }
 0x314   : > { %v2746_v18 = vrot.slane %v2745_v10, 4  ;;  %v2677_v38 = vsel %vm2676_vm4, %v2674_v53, %v2675_v33  ;;  %v10943_v33 = vld [vmem:[#allocation36_spill] sm:$0xff] }
 0x315   : > { %v2678_v35 = vrot.slane %v2677_v38, 2 }
 0x316   : > { %vm2747_vm14 = vcmp.lt.s32.totalorder %v2745_v10, %v2746_v18 }
 0x317   : > { %v2748_v61 = vsel %vm2747_vm14, %v2745_v10, %v2746_v18  ;;  %vm2679_vm8 = vcmp.lt.s32.totalorder %v2677_v38, %v2678_v35  ;;  %v10937_v10 = vld [vmem:[#allocation67_spill] sm:$0xff] }
 0x318   : > { %v2749_v27 = vrot.slane %v2748_v61, 2  ;;  %v2680_v39 = vsel %vm2679_vm8, %v2677_v38, %v2678_v35  ;;  %v10936_v38 = vld [vmem:[#allocation66_spill] sm:$0xff]  ;;  %v10939_v35 = vld [vmem:[#allocation11_spill] sm:$0xff] }
 0x319   : > { %v2681_v43 = vrot.slane %v2680_v39, 1 }
 0x31a   : > { %vm2750_vm9 = vcmp.lt.s32.totalorder %v2748_v61, %v2749_v27 }
 0x31b   : > { %v2751_v29 = vsel %vm2750_vm9, %v2748_v61, %v2749_v27  ;;  %vm2682_vm12 = vcmp.lt.s32.totalorder %v2680_v39, %v2681_v43 }
 0x31c   : > { %v2752_v40 = vrot.slane %v2751_v29, 1  ;;  %v8441_v22 = vsel %vm2682_vm12, %v2680_v39, %v2681_v43  ;;  %v10945_v39 = vld [vmem:[#allocation38_spill] sm:$0xff] }
 0x31d   : > { %vm2755_vm15 = vcmp.eq.s32.totalorder %v10919_v8, %v8441_v22  ;;  %vm10218_vm1 = vcmp.eq.s32.totalorder %v10920_v51, %v8441_v22  ;;  %vm10219_vm13 = vcmp.eq.s32.totalorder %v10632_v54, %v8441_v22  ;;  %vm10217_vm3 = vcmp.eq.s32.totalorder %v10698_v16, %v8441_v22 }
 0x31e   : > { %vm2753_vm0 = vcmp.lt.s32.totalorder %v2751_v29, %v2752_v40  ;;  %vm4819_vm6 = vmpackc.low %vm10218_vm1, %vm2755_vm15  ;;  %vm10226_vm1 = vcmp.eq.s32.totalorder %v5781_v62, %v8441_v22 }
 0x31f   : > { %v8443_v23 = vsel %vm2753_vm0, %v2751_v29, %v2752_v40  ;;  %vm4823_vm9 = vmpackc.low %vm10217_vm3, %vm10219_vm13  ;;  %vm10216_vm0 = vcmp.eq.s32.totalorder %v10936_v38, %v8441_v22  ;;  %vm10225_vm13 = vcmp.eq.s32.totalorder %v5784_v0, %v8441_v22 }
 0x320   : > { %vm2756_vm2 = vcmp.eq.s32.totalorder %v10919_v8, %v8443_v23  ;;  %vm2758_vm5 = vcmp.eq.s32.totalorder %v10920_v51, %v8443_v23  ;;  %vm2760_vm7 = vcmp.eq.s32.totalorder %v10632_v54, %v8443_v23  ;;  %vm2762_vm11 = vcmp.eq.s32.totalorder %v10698_v16, %v8443_v23 }
 0x321   : > { %vm4817_vm10 = vmpackc.low %vm2758_vm5, %vm2756_vm2  ;;  %vm2764_vm14 = vcmp.eq.s32.totalorder %v10936_v38, %v8443_v23  ;;  %vm2766_vm8 = vcmp.eq.s32.totalorder %v10937_v10, %v8443_v23  ;;  %vm2768_vm12 = vcmp.eq.s32.totalorder %v5775_v31, %v8443_v23  ;;  %v8511_v29 = vsel %vm2756_vm2, 1e+30, %v10938_v20  ;;  %v10947_v20 = vld [vmem:[#allocation40_spill] sm:$0xff] }
 0x322   : > { %4818 = vmatprep.subr.msk.bf16.mxu0 %vm4817_vm10, %v10772_v36  ;;  %vm4821_vm4 = vmpackc.low %vm2762_vm11, %vm2760_vm7  ;;  %vm10215_vm10 = vcmp.eq.s32.totalorder %v10937_v10, %v8441_v22  ;;  %v8517_v18 = vsel %vm2758_vm5, 1e+30, %v10939_v35  ;;  %v8523_v60 = vsel %vm2760_vm7, 1e+30, %v10940_v50  ;;  %v8530_v56 = vsel %vm2762_vm11, 1e+30, %v10941_v34 }
 0x323   : > { %4820 = vmatpush1.bf16.msk.msra.mxu0 %vm4819_vm6, %v10772_v36  ;;  %vm4825_vm6 = vmpackc.low %vm2766_vm8, %vm2764_vm14  ;;  %10942 = vst [vmem:[#allocation92_spill] sm:$0xff] %v8530_v56  ;;  %v3048_v53 = vmin.f32 %v8511_v29, %v8523_v60  ;;  %v8538_v61 = vsel %vm2764_vm14, 1e+30, %v10943_v33  ;;  %v3049_v27 = vmin.f32 %v8517_v18, %v8530_v56  ;;  %vm2772_vm5 = vcmp.eq.s32.totalorder %v5781_v62, %v8443_v23  ;;  %v10949_v34 = vld [vmem:[#allocation42_spill] sm:$0xff] }
 0x324   : > { %4822 = vmatprep.subr.msk.bf16.mxu0 %vm4821_vm4, %v10772_v36  ;;  %vm2770_vm4 = vcmp.eq.s32.totalorder %v10638_v4, %v8443_v23  ;;  %10944 = vst [vmem:[#allocation93_spill] sm:$0xff] %v8538_v61  ;;  %vm4827_vm2 = vmpackc.low %vm10215_vm10, %vm10216_vm0  ;;  %v8554_v43 = vsel %vm2766_vm8, 1e+30, %v10945_v39  ;;  %vm2774_vm11 = vcmp.eq.s32.totalorder %v5784_v0, %v8443_v23  ;;  %v8570_v35 = vsel %vm2768_vm12, 1e+30, %v10947_v20  ;;  %v10950_v20 = vld [vmem:[#allocation70_spill] sm:$0xff] }
 0x325   : > { %10946 = vst [vmem:[#allocation8_spill] sm:$0xff] %v8554_v43  ;;  %v3050_v40 = vmin.f32 %v3048_v53, %v8538_v61  ;;  %vm4829_vm7 = vmpackc.low %vm2770_vm4, %vm2768_vm12  ;;  %v3051_v50 = vmin.f32 %v3049_v27, %v8554_v43  ;;  %vm2776_vm14 = vcmp.eq.s32.totalorder %v5787_v32, %v8443_v23  ;;  %v8580_v53 = vsel %vm2770_vm4, 1e+30, %v10949_v34  ;;  %v10952_v34 = vld [vmem:[#allocation44_spill] sm:$0xff]  ;;  %v10953_v61 = vld [vmem:[#allocation87_spill] sm:$0xff] }
 0x326   : > { %10948 = vst [vmem:[#allocation10_spill] sm:$0xff] %v8570_v35  ;;  %vm2778_vm8 = vcmp.eq.s32.totalorder %v5790_v7, %v8443_v23  ;;  %v8589_v27 = vsel %vm2772_vm5, 1e+30, %v7877_v49  ;;  %v8593_v43 = vmul.f32 -1.0, %v10950_v20  ;;  %v8605_v56 = vmul.f32 -1.0, %v10953_v61  ;;  %v10955_v20 = vld [vmem:[#allocation97_spill] sm:$0xff] }
 0x327   : > { %4824 = vmatpush1.bf16.msk.msra.mxu0 %vm4823_vm9, %v10772_v36  ;;  %v3052_v33 = vmin.f32 %v3050_v40, %v8570_v35  ;;  %v3053_v39 = vmin.f32 %v3051_v50, %v8580_v53  ;;  %vm2780_vm9 = vcmp.eq.s32.totalorder %v5793_v5, %v8443_v23  ;;  %v8601_v40 = vsel %vm2774_vm11, 1e+30, %v10952_v34 }
 0x328   : > { %4826 = vmatprep.subr.msk.bf16.mxu0 %vm4825_vm6, %v10772_v36  ;;  %10951 = vst [vmem:[#allocation94_spill] sm:$0xff] %v8593_v43  ;;  %10954 = vst [vmem:[#allocation37_spill] sm:$0xff] %v8605_v56  ;;  %vm2782_vm12 = vcmp.eq.s32.totalorder %v5796_v46, %v8443_v23  ;;  %v8613_v49 = vsel %vm2776_vm14, 1e+30, %v10928_v37  ;;  %vm10221_vm6 = vcmp.eq.s32.totalorder %v5775_v31, %v8441_v22  ;;  %v8624_v61 = vsel %vm2778_vm8, 1e+30, %v10929_v13 }
 0x329   : > { %v3054_v35 = vmin.f32 %v3052_v33, %v8589_v27  ;;  %v3055_v50 = vmin.f32 %v3053_v39, %v8601_v40  ;;  %vm2784_vm4 = vcmp.eq.s32.totalorder %v5799_v2, %v8443_v23  ;;  %v8628_v34 = vmul.f32 -1.0, %v10955_v20  ;;  %v10959_v20 = vld [vmem:[#allocation96_spill] sm:$0xff]  ;;  %v10982_v43 = vld [vmem:[#allocation15_spill] sm:$0xff] }
 0x32a   : > { %v8636_v37 = vsel %vm2780_vm9, 1e+30, %v7913_v57  ;;  %vm10224_vm10 = vcmp.eq.s32.totalorder %v10647_v44, %v8443_v23  ;;  %vm10223_vm0 = vcmp.eq.s32.totalorder %v10648_v3, %v8443_v23  ;;  %v8649_v13 = vsel %vm2782_vm12, 1e+30, %v7919_v14 }
 0x32b   : > { %4828 = vmatpush1.bf16.msk.msra.mxu0 %vm4827_vm2, %v10772_v36  ;;  %v3056_v33 = vmin.f32 %v3054_v35, %v8613_v49  ;;  %10956 = vst [vmem:[#allocation39_spill] sm:$0xff] %v8628_v34  ;;  %vm2786_vm2 = vcmp.eq.s32.totalorder %v5802_v47, %v8443_v23  ;;  %v3057_v39 = vmin.f32 %v3055_v50, %v8624_v61  ;;  %10957 = vst [vmem:[#allocation41_spill] sm:$0xff] %v8649_v13 }
 0x32c   : > { %4830 = vmatprep.subr.msk.bf16.mxu0 %vm4829_vm7, %v10772_v36  ;;  %vm10220_vm7 = vcmp.eq.s32.totalorder %v10638_v4, %v8441_v22  ;;  %v8664_v50 = vsel %vm2784_vm4, 1e+30, %v7928_v42  ;;  %v8684_v42 = vsel %vm2786_vm2, 1e+30, %v7934_v48 }
 0x32d   : > { %v3058_v57 = vmin.f32 %v3056_v33, %v8636_v37  ;;  %vm4831_vm3 = vmpackc.low %vm10220_vm7, %vm10221_vm6  ;;  %v8658_v35 = vpop.f32.mrb[0].mxu1  ;;  %v3059_v14 = vmin.f32 %v3057_v39, %v8649_v13  ;;  %vm2792_vm6 = vcmp.eq.s32.totalorder %v5813_v52, %v8443_v23  ;;  %v8689_v39 = vmul.f32 -1.0, %v10959_v20 }
 0x32e   : > { %10958 = vst [vmem:[#allocation43_spill] sm:$0xff] %v8658_v35  ;;  %vm4833_vm7 = vmpackc.low %vm2774_vm11, %vm2772_vm5  ;;  %v8697_v35 = vsel %vm10224_vm10, 1e+30, %v7940_v30  ;;  %vm10230_vm5 = vcmp.eq.s32.totalorder %v10877_v17, %v8443_v23  ;;  %vm10229_vm11 = vcmp.eq.s32.totalorder %v10879_v28, %v8443_v23  ;;  %vm10231_vm10 = vcmp.eq.s32.totalorder %v5790_v7, %v8441_v22 }
 0x32f   : > { %4832 = vmatpush1.bf16.msk.msra.mxu0 %vm4831_vm3, %v10772_v36  ;;  %v3060_v33 = vmin.f32 %v3058_v57, %v8664_v50  ;;  %10960 = vst [vmem:[#allocation45_spill] sm:$0xff] %v8689_v39  ;;  %vm2794_vm3 = vcmp.eq.s32.totalorder %v5816_v6, %v8443_v23  ;;  %v3061_v13 = vmin.f32 %v3059_v14, %v8684_v42  ;;  %v8710_v57 = vsel %vm10223_vm0, 1e+30, %v7952_v58 }
 0x330   : > { %4834 = vmatprep.subr.msk.bf16.mxu0 %vm4833_vm7, %v10772_v36  ;;  %vm4835_vm7 = vmpackc.low %vm10225_vm13, %vm10226_vm1  ;;  %v8723_v14 = vsel %vm2792_vm6, 1e+30, %v7958_v11  ;;  %vm2775_vm0 = vcmp.eq.s32.totalorder %v5787_v32, %v8441_v22  ;;  %vm10232_vm1 = vcmp.eq.s32.totalorder %v10886_v9, %v8443_v23  ;;  %v8743_v58 = vsel %vm2794_vm3, 1e+30, %v7964_v15  ;;  %v10964_v15 = vld [vmem:[#allocation50_spill] sm:$0xff] }
 0x331   : > { %v3062_v30 = vmin.f32 %v3060_v33, %v8697_v35  ;;  %10961 = vst [vmem:[#allocation47_spill] sm:$0xff] %v8723_v14  ;;  %v3063_v20 = vmin.f32 %v3061_v13, %v8710_v57  ;;  %vm4837_vm13 = vmpackc.low %vm2778_vm8, %vm2776_vm14  ;;  %v8755_v33 = vsel %vm10230_vm5, 1e+30, %v7982_v1  ;;  %v8759_v34 = vmul.f32 -1.0, %v10964_v15 }
 0x332   : > { %10962 = vst [vmem:[#allocation49_spill] sm:$0xff] %v8743_v58  ;;  %10963 = vst [vmem:[#allocation52_spill] sm:$0xff] %v8755_v33  ;;  %vm10239_vm14 = vcmp.eq.s32.totalorder %v10893_v63, %v8443_v23  ;;  %vm10241_vm5 = vcmp.eq.s32.totalorder %v5796_v46, %v8441_v22 }
 0x333   : > { %4836 = vmatpush1.bf16.msk.msra.mxu0 %vm4835_vm7, %v10772_v36  ;;  %v3064_v11 = vmin.f32 %v3062_v30, %v8723_v14  ;;  %vm10240_vm7 = vcmp.eq.s32.totalorder %v10688_v24, %v8443_v23  ;;  %v3065_v48 = vmin.f32 %v3063_v20, %v8743_v58  ;;  %10965 = vst [vmem:[#allocation53_spill] sm:$0xff] %v8759_v34  ;;  %v8769_v30 = vsel %vm10229_vm11, 1e+30, %v7988_v25  ;;  %vm4839_vm8 = vmpackc.low %vm10231_vm10, %vm2775_vm0  ;;  %v11041_v58 = vld [vmem:[#allocation35_spill] sm:$0xff]  ;;  %v11056_v14 = vld [vmem:[#allocation89_spill] sm:$0xff] }
 0x334   : > { %4838 = vmatprep.subr.msk.bf16.mxu0 %vm4837_vm13, %v10772_v36  ;;  %vm10237_vm13 = vcmp.eq.s32.totalorder %v10691_v12, %v8443_v23  ;;  %10966 = vst [vmem:[#allocation57_spill] sm:$0xff] %v8769_v30  ;;  %v8782_v20 = vsel %vm10232_vm1, 1e+30, %v7997_v55  ;;  %vm2779_vm11 = vcmp.eq.s32.totalorder %v5793_v5, %v8441_v22  ;;  %vm4841_vm10 = vmpackc.low %vm2782_vm12, %vm2780_vm9  ;;  %vm10242_vm1 = vcmp.eq.s32.totalorder %v10901_v26, %v8443_v23 }
 0x335   : > { %v3066_v1 = vmin.f32 %v3064_v11, %v8755_v33  ;;  %10967 = vst [vmem:[#allocation56_spill] sm:$0xff] %v8782_v20  ;;  %v3067_v15 = vmin.f32 %v3065_v48, %v8769_v30  ;;  %v8802_v25 = vsel %vm10240_vm7, 1e+30, %v8003_v45  ;;  %v8807_v48 = vmul.f32 -1.0, %v8309_v19  ;;  %v10970_v11 = vld [vmem:[#allocation51_spill] sm:$0xff]  ;;  %v10972_v19 = vld [vmem:[#allocation85_spill] sm:$0xff] }
 0x336   : > { %10968 = vst [vmem:[#allocation77_spill] sm:$0xff] %v8802_v25  ;;  %vm10261_vm9 = vcmp.eq.s32.totalorder %v10702_v41, %v8443_v23  ;;  %v8817_v13 = vsel %vm10237_vm13, 1e+30, %v10970_v11  ;;  %vm10255_vm12 = vcmp.eq.s32.totalorder %v10972_v19, %v8443_v23  ;;  %vm4843_vm13 = vmpackc.low %vm10241_vm5, %vm2779_vm11  ;;  %vm2785_vm7 = vcmp.eq.s32.totalorder %v5802_v47, %v8441_v22  ;;  %v10994_v30 = vld [vmem:[#allocation99_spill] sm:$0xff] }
 0x337   : > { %4840 = vmatpush1.bf16.msk.msra.mxu0 %vm4839_vm8, %v10772_v36  ;;  %v3068_v55 = vmin.f32 %v3066_v1, %v8782_v20  ;;  %10969 = vst [vmem:[#allocation81_spill] sm:$0xff] %v8807_v48  ;;  %vm10263_vm8 = vcmp.eq.s32.totalorder %v10931_v59, %v8443_v23  ;;  %10971 = vst [vmem:[#allocation84_spill] sm:$0xff] %v8817_v13  ;;  %v3069_v45 = vmin.f32 %v3067_v15, %v8802_v25  ;;  %v10973_v1 = vld [vmem:[#allocation54_spill] sm:$0xff]  ;;  %v10975_v15 = vld [vmem:[#allocation55_spill] sm:$0xff] }
 0x338   : > { %4842 = vmatprep.subr.msk.bf16.mxu0 %vm4841_vm10, %v10772_v36  ;;  %vm10257_vm10 = vcmp.eq.s32.totalorder %v10907_v21, %v8443_v23  ;;  %v8828_v39 = vsel %vm10239_vm14, 1e+30, %v10973_v1  ;;  %v8841_v11 = vsel %vm10242_vm1, 1e+30, %v10975_v15  ;;  %vm2783_vm14 = vcmp.eq.s32.totalorder %v5799_v2, %v8441_v22  ;;  %vm4845_vm5 = vmpackc.low %vm2786_vm2, %vm2784_vm4  ;;  %v10978_v1 = vld [vmem:[#allocation58_spill] sm:$0xff]  ;;  %v10980_v15 = vld [vmem:[#allocation60_spill] sm:$0xff] }
 0x339   : > { %10974 = vst [vmem:[#allocation46_spill] sm:$0xff] %v8828_v39  ;;  %v3070_v56 = vmin.f32 %v3068_v55, %v8817_v13  ;;  %10976 = vst [vmem:[#allocation48_spill] sm:$0xff] %v8841_v11  ;;  %v3071_v48 = vmin.f32 %v3069_v45, %v8828_v39  ;;  %v10977_v55 = vld [vmem:[#allocation86_spill] sm:$0xff]  ;;  %v8861_v45 = vsel %vm10263_vm8, 1e+30, %v10978_v1  ;;  %v10984_v1 = vld [vmem:[#allocation68_spill] sm:$0xff]  ;;  %vm10987_vm4 = vcmp.eq.s32.totalorder %v10632_v54, %v8441_v22 }
 0x33a   : > { %vm10256_vm1 = vcmp.eq.s32.totalorder %v10977_v55, %v8443_v23  ;;  %10979 = vst [vmem:[#allocation95_spill] sm:$0xff] %v8861_v45  ;;  %v8867_v39 = vsel %vm10261_vm9, 1e+30, %v10980_v15  ;;  %v8875_v34 = vsel %vm10257_vm10, 1e+30, %v10982_v43  ;;  %v10986_v15 = vld [vmem:[#allocation98_spill] sm:$0xff]  ;;  %vm10992_vm2 = vcmp.eq.s32.totalorder %v10920_v51, %v8441_v22 }
 0x33b   : > { %4844 = vmatpush1.bf16.msk.msra.mxu0 %vm4843_vm13, %v10772_v36  ;;  %10981 = vst [vmem:[#allocation82_spill] sm:$0xff] %v8867_v39  ;;  %v3072_v13 = vmin.f32 %v3070_v56, %v8841_v11  ;;  %10983 = vst [vmem:[#allocation66_spill] sm:$0xff] %v8875_v34  ;;  %v3073_v25 = vmin.f32 %v3071_v48, %v8861_v45  ;;  %v8882_v20 = vsel %vm2755_vm15, 1e+30, %v10984_v1  ;;  %v8888_v56 = vsel %vm10987_vm4, 1e+30, %v10986_v15 }
 0x33c   : > { %4846 = vmatprep.subr.msk.bf16.mxu0 %vm4845_vm5, %v10772_v36  ;;  %10985 = vst [vmem:[#allocation61_spill] sm:$0xff] %v8882_v20  ;;  %10988 = vst [vmem:[#allocation11_spill] sm:$0xff] %v8888_v56  ;;  %v10989_v11 = vld [vmem:[#allocation21_spill] sm:$0xff]  ;;  %v10991_v45 = vld [vmem:[#allocation71_spill] sm:$0xff]  ;;  %vm10995_vm15 = vcmp.eq.s32.totalorder %v10698_v16, %v8441_v22  ;;  %vm2787_vm13 = vcmp.eq.s32.totalorder %v10647_v44, %v8441_v22  ;;  %vm10266_vm4 = vcmp.eq.s32.totalorder %v10648_v3, %v8441_v22 }
 0x33d   : > { %v8894_v43 = vsel %vm10255_vm12, 1e+30, %v10989_v11  ;;  %v3074_v48 = vmin.f32 %v3072_v13, %v8867_v39  ;;  %v8901_v1 = vsel %vm10992_vm2, 1e+30, %v10991_v45  ;;  %v8907_v15 = vsel %vm10995_vm15, 1e+30, %v10994_v30  ;;  %vm4847_vm5 = vmpackc.low %vm2785_vm7, %vm2783_vm14 }
 0x33e   : > { %10990 = vst [vmem:[#allocation9_spill] sm:$0xff] %v8894_v43  ;;  %10993 = vst [vmem:[#allocation34_spill] sm:$0xff] %v8901_v1  ;;  %v10997_v13 = vld [vmem:[#allocation13_spill] sm:$0xff]  ;;  %v3075_v45 = vmin.f32 %v3073_v25, %v8875_v34  ;;  %vm10999_vm2 = vcmp.eq.s32.totalorder %v10647_v44, %v8443_v23  ;;  %vm11000_vm15 = vcmp.eq.s32.totalorder %v10648_v3, %v8443_v23  ;;  %v11002_v39 = vld [vmem:[#allocation20_spill] sm:$0xff] }
 0x33f   : > { %10996 = vst [vmem:[#allocation36_spill] sm:$0xff] %v8907_v15  ;;  %v8919_v11 = vsel %vm10256_vm1, 1e+30, %v10997_v13  ;;  %4848 = vmatpush1.bf16.msk.msra.mxu0 %vm4847_vm5, %v10772_v36  ;;  %vm4849_vm12 = vmpackc.low %vm11000_vm15, %vm10999_vm2  ;;  %v3076_v30 = vmin.f32 %v3074_v48, %v8894_v43  ;;  %vm2791_vm1 = vcmp.eq.s32.totalorder %v5813_v52, %v8441_v22  ;;  %vm2793_vm10 = vcmp.eq.s32.totalorder %v5816_v6, %v8441_v22  ;;  %v8941_v13 = vpop.f32.mrb[1].mxu1  ;;  %v11036_v33 = vld [vmem:[#allocation7_spill] sm:$0xff]  ;;  %v11049_v6 = vld [vmem:[#allocation16_spill] sm:$0xff] }
 0x340   : > { %10998 = vst [vmem:[#allocation38_spill] sm:$0xff] %v8919_v11  ;;  %v3011_v25 = vmin.f32 %v8882_v20, %v8888_v56  ;;  %4850 = vmatprep.subr.msk.bf16.mxu0 %vm4849_vm12, %v10772_v36  ;;  %11001 = vst [vmem:[#allocation40_spill] sm:$0xff] %v8941_v13  ;;  %v3077_v34 = vmin.f32 %v3075_v45, %v8919_v11  ;;  %vm2795_vm5 = vcmp.eq.s32.totalorder %v10877_v17, %v8441_v22  ;;  %v11005_v13 = vld [vmem:[#allocation23_spill] sm:$0xff] }
 0x341   : > { %vm11003_vm2 = vcmp.eq.s32.totalorder %v10936_v38, %v8441_v22  ;;  %v3012_v43 = vmin.f32 %v8901_v1, %v8907_v15  ;;  %vm2797_vm15 = vcmp.eq.s32.totalorder %v10879_v28, %v8441_v22  ;;  %vm11006_vm9 = vcmp.eq.s32.totalorder %v10937_v10, %v8441_v22  ;;  %v11008_v15 = vld [vmem:[#allocation24_spill] sm:$0xff]  ;;  %v11032_v20 = vld [vmem:[#allocation83_spill] sm:$0xff] }
 0x342   : > { %v8950_v48 = vsel %vm11003_vm2, 1e+30, %v11002_v39  ;;  %v8962_v45 = vsel %vm11006_vm9, 1e+30, %v11005_v13  ;;  %vm4851_vm2 = vmpackc.low %vm10266_vm4, %vm2787_vm13  ;;  %v3078_v39 = vmin.f32 %v3076_v30, %v3077_v34  ;;  %vm11009_vm12 = vcmp.eq.s32.totalorder %v5775_v31, %v8441_v22  ;;  %v11011_v34 = vld [vmem:[#allocation25_spill] sm:$0xff] }
 0x343   : > { %11004 = vst [vmem:[#allocation42_spill] sm:$0xff] %v8950_v48  ;;  %11007 = vst [vmem:[#allocation70_spill] sm:$0xff] %v8962_v45  ;;  %v3013_v11 = vmin.f32 %v3011_v25, %v8950_v48  ;;  %v8977_v56 = vsel %vm11009_vm12, 1e+30, %v11008_v15  ;;  %v3014_v13 = vmin.f32 %v3012_v43, %v8962_v45  ;;  %4852 = vmatpush1.bf16.msk.msra.mxu0 %vm4851_vm2, %v10772_v36  ;;  %v11014_v25 = vld [vmem:[#allocation91_spill] sm:$0xff] }
 0x344   : > { %11010 = vst [vmem:[#allocation44_spill] sm:$0xff] %v8977_v56  ;;  %vm4853_vm9 = vmpackc.low %vm2794_vm3, %vm2792_vm6  ;;  %vm2803_vm8 = vcmp.eq.s32.totalorder %v10691_v12, %v8441_v22  ;;  %vm11012_vm12 = vcmp.eq.s32.totalorder %v10638_v4, %v8441_v22  ;;  %v3079_v30 = vrot.slane %v3078_v39, 4  ;;  %vm11015_vm3 = vcmp.eq.s32.totalorder %v5781_v62, %v8441_v22 }
 0x345   : > { %v8995_v43 = vsel %vm11012_vm12, 1e+30, %v11011_v34  ;;  %v3015_v15 = vmin.f32 %v3013_v11, %v8977_v56  ;;  %4854 = vmatprep.subr.msk.bf16.mxu0 %vm4853_vm9, %v10772_v36  ;;  %v9005_v45 = vsel %vm11015_vm3, 1e+30, %v11014_v25  ;;  %v11017_v11 = vld [vmem:[#allocation27_spill] sm:$0xff]  ;;  %vm11018_vm9 = vcmp.eq.s32.totalorder %v5784_v0, %v8441_v22  ;;  %vm4855_vm3 = vmpackc.low %vm2793_vm10, %vm2791_vm1  ;;  %v11020_v25 = vld [vmem:[#allocation28_spill] sm:$0xff] }
 0x346   : > { %11013 = vst [vmem:[#allocation87_spill] sm:$0xff] %v8995_v43  ;;  %11016 = vst [vmem:[#allocation97_spill] sm:$0xff] %v9005_v45  ;;  %v3016_v48 = vmin.f32 %v3014_v13, %v8995_v43  ;;  %v9016_v34 = vsel %vm11018_vm9, 1e+30, %v11017_v11  ;;  %v3080_v13 = vmin.f32 %v3078_v39, %v3079_v30  ;;  %v9031_v43 = vsel %vm2775_vm0, 1e+30, %v11020_v25 }
 0x347   : > { %11019 = vst [vmem:[#allocation96_spill] sm:$0xff] %v9016_v34  ;;  %v3017_v56 = vmin.f32 %v3015_v15, %v9005_v45  ;;  %11021 = vst [vmem:[#allocation50_spill] sm:$0xff] %v9031_v43  ;;  %4856 = vmatpush1.bf16.msk.msra.mxu0 %vm4855_vm3, %v10772_v36  ;;  %vm11022_vm9 = vcmp.eq.s32.totalorder %v10877_v17, %v8443_v23  ;;  %vm11023_vm12 = vcmp.eq.s32.totalorder %v10879_v28, %v8443_v23  ;;  %v11024_v39 = vld [vmem:[#allocation29_spill] sm:$0xff]  ;;  %v11027_v25 = vld [vmem:[#allocation30_spill] sm:$0xff] }
 0x348   : > { %v3018_v11 = vmin.f32 %v3016_v48, %v9016_v34  ;;  %vm4857_vm6 = vmpackc.low %vm11023_vm12, %vm11022_vm9  ;;  %vm2815_vm2 = vcmp.eq.s32.totalorder %v10972_v19, %v8441_v22  ;;  %vm2817_vm4 = vcmp.eq.s32.totalorder %v10977_v55, %v8441_v22  ;;  %vm11025_vm0 = vcmp.eq.s32.totalorder %v5790_v7, %v8441_v22  ;;  %v11029_v45 = vld [vmem:[#allocation32_spill] sm:$0xff]  ;;  %v11051_v17 = vld [vmem:[#allocation19_spill] sm:$0xff] }
 0x349   : > { %v9049_v48 = vsel %vm11025_vm0, 1e+30, %v11024_v39  ;;  %v3019_v15 = vmin.f32 %v3017_v56, %v9031_v43  ;;  %4858 = vmatprep.subr.msk.bf16.mxu0 %vm4857_vm6, %v10772_v36  ;;  %v3081_v30 = vrot.slane %v3080_v13, 2  ;;  %v9057_v34 = vsel %vm2779_vm11, 1e+30, %v11027_v25  ;;  %v11034_v43 = vld [vmem:[#allocation26_spill] sm:$0xff]  ;;  %vm4859_vm11 = vmpackc.low %vm2797_vm15, %vm2795_vm5 }
 0x34a   : > { %11026 = vst [vmem:[#allocation51_spill] sm:$0xff] %v9049_v48  ;;  %11028 = vst [vmem:[#allocation85_spill] sm:$0xff] %v9057_v34  ;;  %vm11030_vm12 = vcmp.eq.s32.totalorder %v5796_v46, %v8441_v22  ;;  %v3020_v39 = vmin.f32 %v3018_v11, %v9049_v48  ;;  %v9070_v56 = vsel %vm2783_vm14, 1e+30, %v11032_v20  ;;  %v9076_v25 = vsel %vm2785_vm7, 1e+30, %v11034_v43 }
 0x34b   : > { %v9063_v1 = vsel %vm11030_vm12, 1e+30, %v11029_v45  ;;  %11033 = vst [vmem:[#allocation55_spill] sm:$0xff] %v9070_v56  ;;  %11035 = vst [vmem:[#allocation86_spill] sm:$0xff] %v9076_v25  ;;  %v9082_v45 = vsel %vm2787_vm13, 1e+30, %v11036_v33  ;;  %v3021_v11 = vmin.f32 %v3019_v15, %v9057_v34  ;;  %v3082_v20 = vmin.f32 %v3080_v13, %v3081_v30  ;;  %4860 = vmatpush1.bf16.msk.msra.mxu0 %vm4859_vm11, %v10772_v36 }
 0x34c   : > { %11031 = vst [vmem:[#allocation54_spill] sm:$0xff] %v9063_v1  ;;  %11037 = vst [vmem:[#allocation58_spill] sm:$0xff] %v9082_v45  ;;  %v11038_v48 = vld [vmem:[#allocation5_spill] sm:$0xff]  ;;  %vm11039_vm7 = vcmp.eq.s32.totalorder %v10648_v3, %v8441_v22  ;;  %v9101_v33 = vsel %vm2791_vm1, 1e+30, %v11041_v58  ;;  %v3022_v15 = vmin.f32 %v3020_v39, %v9063_v1  ;;  %vm11042_vm14 = vcmp.eq.s32.totalorder %v10886_v9, %v8443_v23  ;;  %v11044_v13 = vld [vmem:[#allocation14_spill] sm:$0xff] }
 0x34d   : > { %v9095_v43 = vsel %vm11039_vm7, 1e+30, %v11038_v48  ;;  %vm11043_vm13 = vcmp.eq.s32.totalorder %v10688_v24, %v8443_v23  ;;  %v9115_v48 = vsel %vm2793_vm10, 1e+30, %v11044_v13  ;;  %v11045_v30 = vld [vmem:[#allocation12_spill] sm:$0xff]  ;;  %v11047_v39 = vld [vmem:[#allocation18_spill] sm:$0xff]  ;;  %v3023_v34 = vmin.f32 %v3021_v11, %v9070_v56 }
 0x34e   : > { %11040 = vst [vmem:[#allocation60_spill] sm:$0xff] %v9095_v43  ;;  %vm4861_vm6 = vmpackc.low %vm11043_vm13, %vm11042_vm14  ;;  %v9121_v58 = vsel %vm2795_vm5, 1e+30, %v11045_v30  ;;  %v9127_v1 = vsel %vm2797_vm15, 1e+30, %v11047_v39  ;;  %v3083_v52 = vrot.slane %v3082_v20, 1  ;;  %vm11050_vm1 = vcmp.eq.s32.totalorder %v10886_v9, %v8441_v22 }
 0x34f   : > { %11046 = vst [vmem:[#allocation15_spill] sm:$0xff] %v9121_v58  ;;  %11048 = vst [vmem:[#allocation68_spill] sm:$0xff] %v9127_v1  ;;  %4862 = vmatprep.subr.msk.bf16.mxu0 %vm4861_vm6, %v10772_v36  ;;  %v9135_v13 = vsel %vm11050_vm1, 1e+30, %v11049_v6  ;;  %vm11052_vm10 = vcmp.eq.s32.totalorder %v10688_v24, %v8441_v22  ;;  %v3024_v39 = vmin.f32 %v3022_v15, %v9076_v25  ;;  %v11053_v28 = vld [vmem:[#allocation22_spill] sm:$0xff]  ;;  %v11054_v56 = vld [vmem:[#allocation88_spill] sm:$0xff] }
 0x350   : > { %v9141_v30 = vsel %vm11052_vm10, 1e+30, %v11051_v17  ;;  %v9148_v11 = vsel %vm2803_vm8, 1e+30, %v11053_v28  ;;  %vm11055_vm5 = vcmp.eq.s32.totalorder %v10893_v63, %v8441_v22  ;;  %vm11057_vm15 = vcmp.eq.s32.totalorder %v10901_v26, %v8441_v22  ;;  %vm11058_vm3 = vmmov %vm11050_vm1  ;;  %v11060_v25 = vld [vmem:[#allocation90_spill] sm:$0xff]  ;;  %v11062_v3 = vld [vmem:[#allocation31_spill] sm:$0xff] }
 0x351   : > { %v9154_v6 = vsel %vm11055_vm5, 1e+30, %v11054_v56  ;;  %v9160_v17 = vsel %vm11057_vm15, 1e+30, %v11056_v14  ;;  %v3025_v15 = vmin.f32 %v3023_v34, %v9082_v45  ;;  %vm11059_vm9 = vmmov %vm11052_vm10  ;;  %v9169_v28 = vmin.f32 %v3082_v20, %v3083_v52  ;;  %v11066_v52 = vld [vmem:[#allocation33_spill] sm:$0xff]  ;;  %v11068_v20 = vld [vmem:[#allocation6_spill] sm:$0xff] }
 0x352   : > { %vm4863_vm0 = vmpackc.low %vm11059_vm9, %vm11058_vm3  ;;  %vm11061_vm12 = vcmp.eq.s32.totalorder %v10931_v59, %v8441_v22  ;;  %vm11063_vm11 = vcmp.eq.s32.totalorder %v10702_v41, %v8441_v22  ;;  %v3026_v34 = vmin.f32 %v3024_v39, %v9095_v43  ;;  %vm11064_vm7 = vcmp.eq.s32.totalorder %v10691_v12, %v8443_v23  ;;  %v11069_v39 = vld [vmem:[#allocation59_spill] sm:$0xff] }
 0x353   : > { %v9175_v56 = vsel %vm11061_vm12, 1e+30, %v11060_v25  ;;  %v9181_v14 = vsel %vm11063_vm11, 1e+30, %v11062_v3  ;;  %4864 = vmatpush1.bf16.msk.msra.mxu0 %vm4863_vm0, %v10772_v36  ;;  %vm11065_vm14 = vcmp.eq.s32.totalorder %v10893_v63, %v8443_v23  ;;  %vm11067_vm6 = vcmp.eq.s32.totalorder %v10907_v21, %v8441_v22 }
 0x354   : > { %vm4865_vm13 = vmpackc.low %vm11065_vm14, %vm11064_vm7  ;;  %v9195_v25 = vsel %vm11067_vm6, 1e+30, %v11066_v52  ;;  %v9201_v3 = vsel %vm2815_vm2, 1e+30, %v11068_v20  ;;  %v9207_v43 = vsel %vm2817_vm4, 1e+30, %v11069_v39  ;;  %v3027_v45 = vmin.f32 %v3025_v15, %v9101_v33 }
 0x355   : > { %4866 = vmatprep.subr.msk.bf16.mxu0 %vm4865_vm13, %v10772_v36  ;;  %vm3086_vm1 = vcmp.eq.f32.partialorder %v8511_v29, %v9169_v28  ;;  %vm3088_vm10 = vcmp.eq.f32.partialorder %v8517_v18, %v9169_v28  ;;  %v3028_v52 = vmin.f32 %v3026_v34, %v9115_v48  ;;  %vm3090_vm5 = vcmp.eq.f32.partialorder %v8523_v60, %v9169_v28  ;;  %v11070_v15 = vld [vmem:[#allocation92_spill] sm:$0xff]  ;;  %v11072_v34 = vld [vmem:[#allocation93_spill] sm:$0xff] }
 0x356   : > { %v3150_v20 = vsel %vm3086_vm1, %v10919_v8, 256  ;;  %v3152_v39 = vsel %vm3088_vm10, %v10920_v51, 256  ;;  %v3029_v24 = vmin.f32 %v3027_v45, %v9121_v58  ;;  %vm3092_vm15 = vcmp.eq.f32.partialorder %v11070_v15, %v9169_v28 }
 0x357   : > { %vm11071_vm3 = vcmp.eq.s32.totalorder %v10893_v63, %v8441_v22  ;;  %v3030_v29 = vmin.f32 %v3028_v52, %v9127_v1  ;;  %v3154_v18 = vsel %vm3090_vm5, %v10632_v54, 256  ;;  %v3156_v60 = vsel %vm3092_vm15, %v10698_v16, 256  ;;  %v11075_v52 = vld [vmem:[#allocation8_spill] sm:$0xff] }
 0x358   : > { %vm4867_vm9 = vmpackc.low %vm11071_vm3, %vm2803_vm8  ;;  %vm3094_vm0 = vcmp.eq.f32.partialorder %v11072_v34, %v9169_v28  ;;  %vm11073_vm12 = vcmp.eq.s32.totalorder %v10901_v26, %v8443_v23  ;;  %vm11074_vm11 = vcmp.eq.s32.totalorder %v10931_v59, %v8443_v23  ;;  %v3031_v45 = vmin.f32 %v3029_v24, %v9135_v13  ;;  %v11076_v24 = vld [vmem:[#allocation10_spill] sm:$0xff] }
 0x359   : > { %4868 = vmatpush1.bf16.msk.msra.mxu0 %vm4867_vm9, %v10772_v36  ;;  %vm4869_vm7 = vmpackc.low %vm11074_vm11, %vm11073_vm12  ;;  %vm3284_vm8 = vcmp.lt.s32.totalorder %v3150_v20, %v3154_v18  ;;  %vm3286_vm14 = vcmp.lt.s32.totalorder %v3152_v39, %v3156_v60  ;;  %vm3096_vm13 = vcmp.eq.f32.partialorder %v11075_v52, %v9169_v28  ;;  %v3032_v15 = vmin.f32 %v3030_v29, %v9141_v30 }
 0x35a   : > { %4870 = vmatprep.subr.msk.bf16.mxu0 %vm4869_vm7, %v10772_v36  ;;  %v3158_v34 = vsel %vm3094_vm0, %v10936_v38, 256  ;;  %v3160_v63 = vsel %vm3096_vm13, %v10937_v10, 256  ;;  %v3285_v12 = vsel %vm3284_vm8, %v3150_v20, %v3154_v18  ;;  %v3033_v1 = vmin.f32 %v3031_v45, %v9148_v11 }
 0x35b   : > { %v3287_v58 = vsel %vm3286_vm14, %v3152_v39, %v3156_v60  ;;  %vm3288_vm6 = vcmp.lt.s32.totalorder %v3285_v12, %v3158_v34  ;;  %vm3098_vm1 = vcmp.eq.f32.partialorder %v11076_v24, %v9169_v28  ;;  %vm11077_vm10 = vcmp.eq.s32.totalorder %v10901_v26, %v8441_v22 }
 0x35c   : > { %vm11078_vm5 = vcmp.eq.s32.totalorder %v10931_v59, %v8441_v22  ;;  %v3034_v29 = vmin.f32 %v3032_v15, %v9154_v6  ;;  %vm3290_vm3 = vcmp.lt.s32.totalorder %v3287_v58, %v3160_v63  ;;  %vm3100_vm9 = vcmp.eq.f32.partialorder %v8580_v53, %v9169_v28 }
 0x35d   : > { %vm4871_vm15 = vmpackc.low %vm11078_vm5, %vm11077_vm10  ;;  %v3162_v20 = vsel %vm3098_vm1, %v5775_v31, 256  ;;  %vm11079_vm0 = vcmp.eq.s32.totalorder %v10702_v41, %v8443_v23  ;;  %vm11080_vm12 = vcmp.eq.s32.totalorder %v10907_v21, %v8443_v23  ;;  %v3035_v39 = vmin.f32 %v3033_v1, %v9160_v17 }
 0x35e   : > { %4872 = vmatpush1.bf16.msk.msra.mxu0 %vm4871_vm15, %v10772_v36  ;;  %vm4873_vm11 = vmpackc.low %vm11080_vm12, %vm11079_vm0  ;;  %v3164_v18 = vsel %vm3100_vm9, %v10638_v4, 256  ;;  %v3289_v60 = vsel %vm3288_vm6, %v3285_v12, %v3158_v34  ;;  %v3291_v45 = vsel %vm3290_vm3, %v3287_v58, %v3160_v63  ;;  %v3036_v53 = vmin.f32 %v3034_v29, %v9175_v56 }
 0x35f   : > { %4874 = vmatprep.subr.msk.bf16.mxu0 %vm4873_vm11, %v10772_v36  ;;  %vm3292_vm7 = vcmp.lt.s32.totalorder %v3289_v60, %v3162_v20  ;;  %vm3294_vm8 = vcmp.lt.s32.totalorder %v3291_v45, %v3164_v18  ;;  %vm3102_vm14 = vcmp.eq.f32.partialorder %v8589_v27, %v9169_v28  ;;  %v3037_v52 = vmin.f32 %v3035_v39, %v9181_v14 }
 0x360   : > { %vm3104_vm13 = vcmp.eq.f32.partialorder %v8601_v40, %v9169_v28  ;;  %v3166_v1 = vsel %vm3102_vm14, %v5781_v62, 256  ;;  %v3293_v15 = vsel %vm3292_vm7, %v3289_v60, %v3162_v20  ;;  %vm11081_vm6 = vcmp.eq.s32.totalorder %v10702_v41, %v8441_v22  ;;  %v11085_v20 = vld [vmem:[#allocation41_spill] sm:$0xff] }
 0x361   : > { %vm11082_vm1 = vcmp.eq.s32.totalorder %v10907_v21, %v8441_v22  ;;  %v3038_v12 = vmin.f32 %v3036_v53, %v9195_v25  ;;  %v3168_v63 = vsel %vm3104_vm13, %v5784_v0, 256  ;;  %v3295_v27 = vsel %vm3294_vm8, %v3291_v45, %v3164_v18  ;;  %vm4879_vm13 = vmpackc.low %vm2817_vm4, %vm2815_vm2 }
 0x362   : > { %vm4875_vm10 = vmpackc.low %vm11082_vm1, %vm11081_vm6  ;;  %vm3296_vm5 = vcmp.lt.s32.totalorder %v3293_v15, %v3166_v1  ;;  %vm11083_vm15 = vcmp.eq.s32.totalorder %v10972_v19, %v8443_v23  ;;  %vm11084_vm3 = vcmp.eq.s32.totalorder %v10977_v55, %v8443_v23  ;;  %v3039_v40 = vmin.f32 %v3037_v52, %v9201_v3 }
 0x363   : > { %4876 = vmatpush1.bf16.msk.msra.mxu0 %vm4875_vm10, %v10772_v36  ;;  %vm4877_vm9 = vmpackc.low %vm11084_vm3, %vm11083_vm15  ;;  %vm3298_vm0 = vcmp.lt.s32.totalorder %v3295_v27, %v3168_v63  ;;  %vm3106_vm12 = vcmp.eq.f32.partialorder %v8613_v49, %v9169_v28  ;;  %vm3108_vm11 = vcmp.eq.f32.partialorder %v8624_v61, %v9169_v28  ;;  %v3040_v58 = vmin.f32 %v3038_v12, %v9207_v43 }
 0x364   : > { %4878 = vmatprep.subr.msk.bf16.mxu0 %vm4877_vm9, %v10772_v36  ;;  %v3170_v34 = vsel %vm3106_vm12, %v5787_v32, 256  ;;  %v3172_v24 = vsel %vm3108_vm11, %v5790_v7, 256  ;;  %v3297_v29 = vsel %vm3296_vm5, %v3293_v15, %v3166_v1  ;;  %v3299_v23 = vsel %vm3298_vm0, %v3295_v27, %v3168_v63  ;;  %v11086_v1 = vld [vmem:[#allocation17_spill] sm:$0xff] }
 0x365   : > { %vm3300_vm7 = vcmp.lt.s32.totalorder %v3297_v29, %v3170_v34  ;;  %vm3110_vm8 = vcmp.eq.f32.partialorder %v8636_v37, %v9169_v28  ;;  %vm3112_vm14 = vcmp.eq.f32.partialorder %v11085_v20, %v9169_v28  ;;  %v3041_v49 = vmin.f32 %v3039_v40, %v3040_v58  ;;  %v11088_v58 = vld [vmem:[#allocation47_spill] sm:$0xff]  ;;  %v11091_v20 = vld [vmem:[#allocation74_spill] sm:$0xff] }
 0x366   : > { %vm3302_vm6 = vcmp.lt.s32.totalorder %v3299_v23, %v3172_v24  ;;  %v3174_v61 = vsel %vm3110_vm8, %v5793_v5, 256  ;;  %v3176_v39 = vsel %vm3112_vm14, %v5796_v46, 256  ;;  %v3301_v18 = vsel %vm3300_vm7, %v3297_v29, %v3170_v34  ;;  %v11090_v34 = vld [vmem:[#allocation73_spill] sm:$0xff] }
 0x367   : > { %4880 = vmatpush1.bf16.msk.msra.mxu0 %vm4879_vm13, %v10772_v36  ;;  %v3303_v37 = vsel %vm3302_vm6, %v3299_v23, %v3172_v24  ;;  %vm3114_vm1 = vcmp.eq.f32.partialorder %v8664_v50, %v9169_v28  ;;  %vm3116_vm10 = vcmp.eq.f32.partialorder %v8684_v42, %v9169_v28  ;;  %v3042_v60 = vrot.slane %v3041_v49, 4  ;;  %v11087_v42 = vld [vmem:[#allocation72_spill] sm:$0xff]  ;;  %v11109_v36 = vld [vmem:[#allocation11_spill] sm:$0xff] }
 0x368   : > { %vm3304_vm5 = vcmp.lt.s32.totalorder %v3301_v18, %v3174_v61  ;;  %vm3306_vm15 = vcmp.lt.s32.totalorder %v3303_v37, %v3176_v39  ;;  %v3178_v22 = vsel %vm3114_vm1, %v5799_v2, 256  ;;  %v3180_v45 = vsel %vm3116_vm10, %v5802_v47, 256 }
 0x369   : > { %v3305_v53 = vsel %vm3304_vm5, %v3301_v18, %v3174_v61  ;;  %v3307_v52 = vsel %vm3306_vm15, %v3303_v37, %v3176_v39  ;;  %vm3118_vm4 = vcmp.eq.f32.partialorder %v8697_v35, %v9169_v28  ;;  %v3043_v15 = vmin.f32 %v3041_v49, %v3042_v60  ;;  %v11089_v35 = vld [vmem:[#allocation49_spill] sm:$0xff]  ;;  %v11092_v61 = vld [vmem:[#allocation52_spill] sm:$0xff]  ;;  %v11094_v18 = vld [vmem:[#allocation75_spill] sm:$0xff] }
 0x36a   : > { %3757 = vmatmul.mubr.f32.vlgmr.msra.gmra.mrb[64].mxu0 %v11086_v1  ;;  %vm3308_vm2 = vcmp.lt.s32.totalorder %v3305_v53, %v3178_v22  ;;  %vm3310_vm3 = vcmp.lt.s32.totalorder %v3307_v52, %v3180_v45  ;;  %vm3120_vm9 = vcmp.eq.f32.partialorder %v8710_v57, %v9169_v28  ;;  %v3182_v50 = vsel %vm3118_vm4, %v10647_v44, 256  ;;  %v11093_v39 = vld [vmem:[#allocation57_spill] sm:$0xff]  ;;  %v11096_v1 = vld [vmem:[#allocation56_spill] sm:$0xff] }
 0x36b   : > { %v3184_v12 = vsel %vm3120_vm9, %v11087_v42, 256  ;;  %v3309_v63 = vsel %vm3308_vm2, %v3305_v53, %v3178_v22  ;;  %v3311_v27 = vsel %vm3310_vm3, %v3307_v52, %v3180_v45  ;;  %v3044_v40 = vrot.slane %v3043_v15, 2  ;;  %v11095_v45 = vld [vmem:[#allocation76_spill] sm:$0xff] }
 0x36c   : > { %vm3312_vm0 = vcmp.lt.s32.totalorder %v3309_v63, %v3182_v50  ;;  %vm3314_vm12 = vcmp.lt.s32.totalorder %v3311_v27, %v3184_v12  ;;  %vm3122_vm11 = vcmp.eq.f32.partialorder %v11088_v58, %v9169_v28  ;;  %vm3124_vm7 = vcmp.eq.f32.partialorder %v11089_v35, %v9169_v28  ;;  %v11102_v35 = vld [vmem:[#allocation81_spill] sm:$0xff] }
 0x36d   : > { %v3186_v24 = vsel %vm3122_vm11, %v11090_v34, 256  ;;  %v3313_v29 = vsel %vm3312_vm0, %v3309_v63, %v3182_v50  ;;  %v3315_v23 = vsel %vm3314_vm12, %v3311_v27, %v3184_v12  ;;  %v3045_v57 = vmin.f32 %v3043_v15, %v3044_v40  ;;  %v11097_v15 = vld [vmem:[#allocation77_spill] sm:$0xff]  ;;  %v11099_v63 = vld [vmem:[#allocation94_spill] sm:$0xff]  ;;  %v11100_v27 = vld [vmem:[#allocation39_spill] sm:$0xff] }
 0x36e   : > { %v3188_v49 = vsel %vm3124_vm7, %v11091_v20, 256  ;;  %vm3316_vm8 = vcmp.lt.s32.totalorder %v3313_v29, %v3186_v24  ;;  %vm3126_vm14 = vcmp.eq.f32.partialorder %v11092_v61, %v9169_v28  ;;  %vm3128_vm6 = vcmp.eq.f32.partialorder %v11093_v39, %v9169_v28  ;;  %v11098_v12 = vld [vmem:[#allocation53_spill] sm:$0xff]  ;;  %v11106_v39 = vld [vmem:[#allocation78_spill] sm:$0xff] }
 0x36f   : > { %vm3318_vm13 = vcmp.lt.s32.totalorder %v3315_v23, %v3188_v49  ;;  %v3190_v37 = vsel %vm3126_vm14, %v11094_v18, 256  ;;  %v3317_v60 = vsel %vm3316_vm8, %v3313_v29, %v3186_v24  ;;  %v3046_v22 = vrot.slane %v3045_v57, 1  ;;  %v11103_v24 = vld [vmem:[#allocation37_spill] sm:$0xff] }
 0x370   : > { %v3192_v53 = vsel %vm3128_vm6, %v11095_v45, 256  ;;  %v3319_v52 = vsel %vm3318_vm13, %v3315_v23, %v3188_v49  ;;  %vm3320_vm1 = vcmp.lt.s32.totalorder %v3317_v60, %v3190_v37  ;;  %vm3130_vm5 = vcmp.eq.f32.partialorder %v11096_v1, %v9169_v28  ;;  %v11104_v29 = vld [vmem:[#allocation45_spill] sm:$0xff] }
 0x371   : > { %vm3322_vm10 = vcmp.lt.s32.totalorder %v3319_v52, %v3192_v53  ;;  %vm3132_vm15 = vcmp.eq.f32.partialorder %v11097_v15, %v9169_v28  ;;  %v9344_v50 = vmin.f32 %v3045_v57, %v3046_v22  ;;  %v11101_v40 = vmax.f32 %v11099_v63, %v11100_v27  ;;  %v11107_v15 = vld [vmem:[#allocation61_spill] sm:$0xff] }
 0x372   : > { %v11105_v23 = vmax.f32 %v11103_v24, %v11104_v29  ;;  %v9359_v61 = vsel %vm3130_vm5, %v10886_v9, 256  ;;  %v9362_v1 = vsel %vm3132_vm15, %v11106_v39, 256  ;;  %v9364_v57 = vsel %vm3320_vm1, %v3317_v60, %v3190_v37 }
 0x373   : > { %v9350_v58 = vmax.f32 %v11101_v40, %v11098_v12  ;;  %v9366_v22 = vsel %vm3322_vm10, %v3319_v52, %v3192_v53  ;;  %vm3085_vm4 = vcmp.eq.f32.partialorder %v11107_v15, %v9344_v50  ;;  %v11108_v40 = vld [vmem:[#allocation34_spill] sm:$0xff]  ;;  %vm3089_vm3 = vcmp.eq.f32.partialorder %v11109_v36, %v9344_v50 }
 0x374   : > { %v9356_v49 = vmax.f32 %v11105_v23, %v11102_v35  ;;  %vm3087_vm2 = vcmp.eq.f32.partialorder %v11108_v40, %v9344_v50  ;;  %v11110_v23 = vld [vmem:[#allocation36_spill] sm:$0xff]  ;;  %v3149_v35 = vsel %vm3085_vm4, %v10919_v8, 256  ;;  %v3153_v37 = vsel %vm3089_vm3, %v10632_v54, 256  ;;  %v11111_v53 = vld [vmem:[#allocation42_spill] sm:$0xff] }
 0x375   : > { %vm3091_vm9 = vcmp.eq.f32.partialorder %v11110_v23, %v9344_v50  ;;  %v3151_v29 = vsel %vm3087_vm2, %v10920_v51, 256  ;;  %vm3213_vm0 = vcmp.lt.s32.totalorder %v3149_v35, %v3153_v37  ;;  %vm3093_vm11 = vcmp.eq.f32.partialorder %v11111_v53, %v9344_v50  ;;  %v11112_v52 = vld [vmem:[#allocation70_spill] sm:$0xff]  ;;  %v11113_v54 = vld [vmem:[#allocation44_spill] sm:$0xff] }
 0x376   : > { %v3155_v60 = vsel %vm3091_vm9, %v10698_v16, 256  ;;  %vm3095_vm7 = vcmp.eq.f32.partialorder %v11112_v52, %v9344_v50  ;;  %v3157_v36 = vsel %vm3093_vm11, %v10936_v38, 256  ;;  %v3214_v40 = vsel %vm3213_vm0, %v3149_v35, %v3153_v37  ;;  %v11114_v16 = vld [vmem:[#allocation87_spill] sm:$0xff]  ;;  %v11116_v35 = vld [vmem:[#allocation96_spill] sm:$0xff] }
 0x377   : > { %vm3215_vm12 = vcmp.lt.s32.totalorder %v3151_v29, %v3155_v60  ;;  %v3159_v15 = vsel %vm3095_vm7, %v10937_v10, 256  ;;  %vm3217_vm8 = vcmp.lt.s32.totalorder %v3214_v40, %v3157_v36  ;;  %vm3097_vm13 = vcmp.eq.f32.partialorder %v11113_v54, %v9344_v50  ;;  %v11115_v10 = vld [vmem:[#allocation97_spill] sm:$0xff] }
 0x378   : > { %v3216_v23 = vsel %vm3215_vm12, %v3151_v29, %v3155_v60  ;;  %vm3099_vm6 = vcmp.eq.f32.partialorder %v11114_v16, %v9344_v50  ;;  %v3161_v51 = vsel %vm3097_vm13, %v5775_v31, 256  ;;  %v3218_v8 = vsel %vm3217_vm8, %v3214_v40, %v3157_v36  ;;  %v11117_v60 = vld [vmem:[#allocation50_spill] sm:$0xff]  ;;  %v11118_v36 = vld [vmem:[#allocation51_spill] sm:$0xff] }
 0x379   : > { %vm3219_vm14 = vcmp.lt.s32.totalorder %v3216_v23, %v3159_v15  ;;  %v3163_v53 = vsel %vm3099_vm6, %v10638_v4, 256  ;;  %vm3221_vm1 = vcmp.lt.s32.totalorder %v3218_v8, %v3161_v51  ;;  %vm3101_vm5 = vcmp.eq.f32.partialorder %v11115_v10, %v9344_v50 }
 0x37a   : > { %v3220_v52 = vsel %vm3219_vm14, %v3216_v23, %v3159_v15  ;;  %vm3103_vm15 = vcmp.eq.f32.partialorder %v11116_v35, %v9344_v50  ;;  %v3165_v29 = vsel %vm3101_vm5, %v5781_v62, 256  ;;  %v3222_v37 = vsel %vm3221_vm1, %v3218_v8, %v3161_v51  ;;  %v11119_v35 = vld [vmem:[#allocation85_spill] sm:$0xff]  ;;  %v11120_v8 = vld [vmem:[#allocation54_spill] sm:$0xff] }
 0x37b   : > { %vm3223_vm10 = vcmp.lt.s32.totalorder %v3220_v52, %v3163_v53  ;;  %v3167_v54 = vsel %vm3103_vm15, %v5784_v0, 256  ;;  %vm3225_vm4 = vcmp.lt.s32.totalorder %v3222_v37, %v3165_v29  ;;  %vm3105_vm3 = vcmp.eq.f32.partialorder %v11117_v60, %v9344_v50 }
 0x37c   : > { %v3224_v16 = vsel %vm3223_vm10, %v3220_v52, %v3163_v53  ;;  %vm3107_vm9 = vcmp.eq.f32.partialorder %v11118_v36, %v9344_v50  ;;  %v3169_v15 = vsel %vm3105_vm3, %v5787_v32, 256  ;;  %v3226_v40 = vsel %vm3225_vm4, %v3222_v37, %v3165_v29  ;;  %v11121_v36 = vld [vmem:[#allocation84_spill] sm:$0xff]  ;;  %v11122_v29 = vld [vmem:[#allocation46_spill] sm:$0xff] }
 0x37d   : > { %vm3227_vm2 = vcmp.lt.s32.totalorder %v3224_v16, %v3167_v54  ;;  %v3171_v10 = vsel %vm3107_vm9, %v5790_v7, 256  ;;  %vm3229_vm0 = vcmp.lt.s32.totalorder %v3226_v40, %v3169_v15  ;;  %vm3109_vm11 = vcmp.eq.f32.partialorder %v11119_v35, %v9344_v50  ;;  %v11124_v37 = vld [vmem:[#allocation86_spill] sm:$0xff]  ;;  %v11126_v35 = vld [vmem:[#allocation60_spill] sm:$0xff] }
 0x37e   : > { %v3228_v23 = vsel %vm3227_vm2, %v3224_v16, %v3167_v54  ;;  %vm3111_vm7 = vcmp.eq.f32.partialorder %v11120_v8, %v9344_v50  ;;  %v3173_v51 = vsel %vm3109_vm11, %v5793_v5, 256  ;;  %v3230_v52 = vsel %vm3229_vm0, %v3226_v40, %v3169_v15  ;;  %v11123_v54 = vld [vmem:[#allocation55_spill] sm:$0xff] }
 0x37f   : > { %vm3231_vm12 = vcmp.lt.s32.totalorder %v3228_v23, %v3171_v10  ;;  %v3175_v53 = vsel %vm3111_vm7, %v5796_v46, 256  ;;  %vm3134_vm8 = vcmp.eq.f32.partialorder %v11121_v36, %v9169_v28  ;;  %vm3136_vm14 = vcmp.eq.f32.partialorder %v11122_v29, %v9169_v28 }
 0x380   : > { %v3232_v60 = vsel %vm3231_vm12, %v3228_v23, %v3171_v10  ;;  %vm3233_vm13 = vcmp.lt.s32.totalorder %v3230_v52, %v3173_v51  ;;  %vm3113_vm1 = vcmp.eq.f32.partialorder %v11123_v54, %v9344_v50  ;;  %vm3115_vm10 = vcmp.eq.f32.partialorder %v11124_v37, %v9344_v50  ;;  %v11125_v23 = vld [vmem:[#allocation58_spill] sm:$0xff] }
 0x381   : > { %vm3235_vm6 = vcmp.lt.s32.totalorder %v3232_v60, %v3175_v53  ;;  %vm3324_vm5 = vcmp.lt.s32.totalorder %v9364_v57, %v9359_v61  ;;  %vm3326_vm15 = vcmp.lt.s32.totalorder %v9366_v22, %v9362_v1  ;;  %v3177_v16 = vsel %vm3113_vm1, %v5799_v2, 256 }
 0x382   : > { %v3179_v15 = vsel %vm3115_vm10, %v5802_v47, 256  ;;  %v3234_v10 = vsel %vm3233_vm13, %v3230_v52, %v3173_v51  ;;  %v3236_v40 = vsel %vm3235_vm6, %v3232_v60, %v3175_v53  ;;  %vm3117_vm3 = vcmp.eq.f32.partialorder %v11125_v23, %v9344_v50  ;;  %v11127_v23 = vld [vmem:[#allocation15_spill] sm:$0xff] }
 0x383   : > { %vm3237_vm4 = vcmp.lt.s32.totalorder %v3234_v10, %v3177_v16  ;;  %vm3239_vm2 = vcmp.lt.s32.totalorder %v3236_v40, %v3179_v15  ;;  %vm3119_vm9 = vcmp.eq.f32.partialorder %v11126_v35, %v9344_v50  ;;  %v3181_v8 = vsel %vm3117_vm3, %v10647_v44, 256 }
 0x384   : > { %v3183_v54 = vsel %vm3119_vm9, %v11087_v42, 256  ;;  %v3238_v37 = vsel %vm3237_vm4, %v3234_v10, %v3177_v16  ;;  %v3240_v46 = vsel %vm3239_vm2, %v3236_v40, %v3179_v15  ;;  %vm3121_vm11 = vcmp.eq.f32.partialorder %v9101_v33, %v9344_v50  ;;  %v11128_v16 = vld [vmem:[#allocation68_spill] sm:$0xff] }
 0x385   : > { %vm3241_vm0 = vcmp.lt.s32.totalorder %v3238_v37, %v3181_v8  ;;  %vm3243_vm12 = vcmp.lt.s32.totalorder %v3240_v46, %v3183_v54  ;;  %vm3123_vm7 = vcmp.eq.f32.partialorder %v9115_v48, %v9344_v50  ;;  %v3185_v51 = vsel %vm3121_vm11, %v11090_v34, 256 }
 0x386   : > { %v3187_v53 = vsel %vm3123_vm7, %v11091_v20, 256  ;;  %v3242_v52 = vsel %vm3241_vm0, %v3238_v37, %v3181_v8  ;;  %v3244_v60 = vsel %vm3243_vm12, %v3240_v46, %v3183_v54  ;;  %vm3125_vm1 = vcmp.eq.f32.partialorder %v11127_v23, %v9344_v50  ;;  %v11129_v54 = vld [vmem:[#allocation79_spill] sm:$0xff] }
 0x387   : > { %vm3245_vm13 = vcmp.lt.s32.totalorder %v3242_v52, %v3185_v51  ;;  %vm3247_vm6 = vcmp.lt.s32.totalorder %v3244_v60, %v3187_v53  ;;  %vm3127_vm10 = vcmp.eq.f32.partialorder %v11128_v16, %v9344_v50  ;;  %v3189_v15 = vsel %vm3125_vm1, %v11094_v18, 256 }
 0x388   : > { %v3191_v33 = vsel %vm3127_vm10, %v11095_v45, 256  ;;  %v3246_v10 = vsel %vm3245_vm13, %v3242_v52, %v3185_v51  ;;  %v3248_v48 = vsel %vm3247_vm6, %v3244_v60, %v3187_v53  ;;  %vm3129_vm3 = vcmp.eq.f32.partialorder %v9135_v13, %v9344_v50  ;;  %v11130_v51 = vld [vmem:[#allocation80_spill] sm:$0xff]  ;;  %v11132_v60 = vld [vmem:[#allocation95_spill] sm:$0xff] }
 0x389   : > { %vm3249_vm4 = vcmp.lt.s32.totalorder %v3246_v10, %v3189_v15  ;;  %vm3251_vm2 = vcmp.lt.s32.totalorder %v3248_v48, %v3191_v33  ;;  %vm3131_vm9 = vcmp.eq.f32.partialorder %v9141_v30, %v9344_v50  ;;  %v3193_v46 = vsel %vm3129_vm3, %v10886_v9, 256 }
 0x38a   : > { %v3195_v40 = vsel %vm3131_vm9, %v11106_v39, 256  ;;  %v3250_v35 = vsel %vm3249_vm4, %v3246_v10, %v3189_v15  ;;  %v3252_v8 = vsel %vm3251_vm2, %v3248_v48, %v3191_v33  ;;  %v3198_v37 = vsel %vm3134_vm8, %v11129_v54, 256  ;;  %v11133_v10 = vld [vmem:[#allocation82_spill] sm:$0xff] }
 0x38b   : > { %vm3253_vm0 = vcmp.lt.s32.totalorder %v3250_v35, %v3193_v46  ;;  %vm3255_vm12 = vcmp.lt.s32.totalorder %v3252_v8, %v3195_v40  ;;  %v3200_v13 = vsel %vm3136_vm14, %v11130_v51, 256  ;;  %v3325_v30 = vsel %vm3324_vm5, %v9364_v57, %v9359_v61  ;;  %v11131_v57 = vld [vmem:[#allocation48_spill] sm:$0xff]  ;;  %v11134_v48 = vld [vmem:[#allocation66_spill] sm:$0xff] }
 0x38c   : > { %v3327_v53 = vsel %vm3326_vm15, %v9366_v22, %v9362_v1  ;;  %vm3133_vm8 = vcmp.eq.f32.partialorder %v9148_v11, %v9344_v50  ;;  %vm3135_vm11 = vcmp.eq.f32.partialorder %v9154_v6, %v9344_v50  ;;  %vm3328_vm7 = vcmp.lt.s32.totalorder %v3325_v30, %v3198_v37 }
 0x38d   : > { %vm3330_vm14 = vcmp.lt.s32.totalorder %v3327_v53, %v3200_v13  ;;  %v3197_v36 = vsel %vm3133_vm8, %v11129_v54, 256  ;;  %v3199_v29 = vsel %vm3135_vm11, %v11130_v51, 256  ;;  %v3254_v52 = vsel %vm3253_vm0, %v3250_v35, %v3193_v46 }
 0x38e   : > { %v3256_v61 = vsel %vm3255_vm12, %v3252_v8, %v3195_v40  ;;  %vm3138_vm5 = vcmp.eq.f32.partialorder %v11131_v57, %v9169_v28  ;;  %vm3140_vm15 = vcmp.eq.f32.partialorder %v11132_v60, %v9169_v28  ;;  %vm3257_vm13 = vcmp.lt.s32.totalorder %v3254_v52, %v3197_v36 }
 0x38f   : > { %vm3259_vm6 = vcmp.lt.s32.totalorder %v3256_v61, %v3199_v29  ;;  %v3202_v11 = vsel %vm3138_vm5, %v10901_v26, 256  ;;  %v3204_v6 = vsel %vm3140_vm15, %v10931_v59, 256  ;;  %v3329_v1 = vsel %vm3328_vm7, %v3325_v30, %v3198_v37  ;;  %v11135_v30 = vld [vmem:[#allocation9_spill] sm:$0xff] }
 0x390   : > { %v3331_v22 = vsel %vm3330_vm14, %v3327_v53, %v3200_v13  ;;  %vm3137_vm1 = vcmp.eq.f32.partialorder %v9160_v17, %v9344_v50  ;;  %vm3139_vm10 = vcmp.eq.f32.partialorder %v9175_v56, %v9344_v50  ;;  %vm3332_vm4 = vcmp.lt.s32.totalorder %v3329_v1, %v3202_v11  ;;  %v11136_v53 = vld [vmem:[#allocation38_spill] sm:$0xff] }
 0x391   : > { %vm3334_vm2 = vcmp.lt.s32.totalorder %v3331_v22, %v3204_v6  ;;  %v3201_v23 = vsel %vm3137_vm1, %v10901_v26, 256  ;;  %v3203_v16 = vsel %vm3139_vm10, %v10931_v59, 256  ;;  %v3258_v15 = vsel %vm3257_vm13, %v3254_v52, %v3197_v36 }
 0x392   : > { %v3260_v33 = vsel %vm3259_vm6, %v3256_v61, %v3199_v29  ;;  %vm3142_vm3 = vcmp.eq.f32.partialorder %v11133_v10, %v9169_v28  ;;  %vm3144_vm9 = vcmp.eq.f32.partialorder %v11134_v48, %v9169_v28  ;;  %vm3261_vm0 = vcmp.lt.s32.totalorder %v3258_v15, %v3201_v23 }
 0x393   : > { %vm3263_vm12 = vcmp.lt.s32.totalorder %v3260_v33, %v3203_v16  ;;  %v3206_v17 = vsel %vm3142_vm3, %v10702_v41, 256  ;;  %v3208_v56 = vsel %vm3144_vm9, %v10907_v21, 256  ;;  %v3333_v46 = vsel %vm3332_vm4, %v3329_v1, %v3202_v11 }
 0x394   : > { %v3335_v40 = vsel %vm3334_vm2, %v3331_v22, %v3204_v6  ;;  %vm3141_vm8 = vcmp.eq.f32.partialorder %v9181_v14, %v9344_v50  ;;  %vm3143_vm11 = vcmp.eq.f32.partialorder %v9195_v25, %v9344_v50  ;;  %vm3336_vm7 = vcmp.lt.s32.totalorder %v3333_v46, %v3206_v17 }
 0x395   : > { %vm3338_vm14 = vcmp.lt.s32.totalorder %v3335_v40, %v3208_v56  ;;  %v3205_v35 = vsel %vm3141_vm8, %v10702_v41, 256  ;;  %v3207_v8 = vsel %vm3143_vm11, %v10907_v21, 256  ;;  %v3262_v37 = vsel %vm3261_vm0, %v3258_v15, %v3201_v23 }
 0x396   : > { %v3264_v13 = vsel %vm3263_vm12, %v3260_v33, %v3203_v16  ;;  %vm3146_vm5 = vcmp.eq.f32.partialorder %v11135_v30, %v9169_v28  ;;  %vm3148_vm15 = vcmp.eq.f32.partialorder %v11136_v53, %v9169_v28  ;;  %vm3265_vm13 = vcmp.lt.s32.totalorder %v3262_v37, %v3205_v35 }
 0x397   : > { %vm3267_vm6 = vcmp.lt.s32.totalorder %v3264_v13, %v3207_v8  ;;  %v3210_v14 = vsel %vm3146_vm5, %v10972_v19, 256  ;;  %v3212_v25 = vsel %vm3148_vm15, %v10977_v55, 256  ;;  %v3337_v36 = vsel %vm3336_vm7, %v3333_v46, %v3206_v17 }
 0x398   : > { %v3339_v29 = vsel %vm3338_vm14, %v3335_v40, %v3208_v56  ;;  %vm3145_vm1 = vcmp.eq.f32.partialorder %v9201_v3, %v9344_v50  ;;  %vm3147_vm10 = vcmp.eq.f32.partialorder %v9207_v43, %v9344_v50  ;;  %vm3340_vm4 = vcmp.lt.s32.totalorder %v3337_v36, %v3210_v14 }
 0x399   : > { %vm3342_vm2 = vcmp.lt.s32.totalorder %v3339_v29, %v3212_v25  ;;  %v3209_v52 = vsel %vm3145_vm1, %v10972_v19, 256  ;;  %v3211_v61 = vsel %vm3147_vm10, %v10977_v55, 256  ;;  %v3341_v57 = vsel %vm3340_vm4, %v3337_v36, %v3210_v14 }
 0x39a   : > { %v3343_v60 = vsel %vm3342_vm2, %v3339_v29, %v3212_v25  ;;  %v3266_v11 = vsel %vm3265_vm13, %v3262_v37, %v3205_v35  ;;  %v3268_v6 = vsel %vm3267_vm6, %v3264_v13, %v3207_v8  ;;  %v3840_v1 = vmul.f32 -1.0, %v9344_v50  ;;  %v11138_v25 = vld [vmem:[#allocation81_spill] sm:$0xff] }
 0x39b   : > { %vm3344_vm3 = vcmp.lt.s32.totalorder %v3341_v57, %v3343_v60  ;;  %vm3269_vm9 = vcmp.lt.s32.totalorder %v3266_v11, %v3209_v52  ;;  %vm3271_vm0 = vcmp.lt.s32.totalorder %v3268_v6, %v3211_v61  ;;  %v3841_v43 = vmul.f32 -1.0, %v9169_v28 }
 0x39c   : > { %v3345_v22 = vsel %vm3344_vm3, %v3341_v57, %v3343_v60  ;;  %v3270_v3 = vsel %vm3269_vm9, %v3266_v11, %v3209_v52  ;;  %v3272_v23 = vsel %vm3271_vm0, %v3268_v6, %v3211_v61  ;;  %v3846_v15 = vmax.f32 %v9350_v58, %v3840_v1  ;;  %v11139_v6 = vld [vmem:[#allocation62_spill] sm:$0xff] }
 0x39d   : > { %v3346_v16 = vrot.slane %v3345_v22, 4  ;;  %vm3273_vm12 = vcmp.lt.s32.totalorder %v3270_v3, %v3272_v23  ;;  %v3847_v10 = vmax.f32 %v9356_v49, %v3841_v43 }
 0x39e   : > { %v3274_v33 = vsel %vm3273_vm12, %v3270_v3, %v3272_v23  ;;  %v3848_v17 = vsub.f32 %v11099_v63, %v3846_v15  ;;  %v3854_v56 = vsub.f32 %v11100_v27, %v3846_v15  ;;  %v3860_v50 = vsub.f32 %v11098_v12, %v3846_v15  ;;  %v11137_v63 = vld [vmem:[#allocation45_spill] sm:$0xff]  ;;  %v11141_v3 = vld [vmem:[#allocation64_spill] sm:$0xff] }
 0x39f   : > { %vm3347_vm8 = vcmp.lt.s32.totalorder %v3345_v22, %v3346_v16  ;;  %v3275_v48 = vrot.slane %v3274_v33, 4  ;;  %v3866_v40 = vsub.f32 %v3840_v1, %v3846_v15  ;;  %v3849_v35 = vsub.f32 %v11103_v24, %v3847_v10  ;;  %v11140_v1 = vld [vmem:[#allocation63_spill] sm:$0xff]  ;;  %v11142_v23 = vld [vmem:[#allocation65_spill] sm:$0xff] }
 0x3a0   : > { %v3348_v46 = vsel %vm3347_vm8, %v3345_v22, %v3346_v16  ;;  %v3850_v8 = vmul.f32 1.442695, %v3848_v17  ;;  %v3856_v37 = vmul.f32 1.442695, %v3854_v56  ;;  %v3862_v13 = vmul.f32 1.442695, %v3860_v50 }
 0x3a1   : > { %v3349_v28 = vrot.slane %v3348_v46, 2  ;;  %vm3276_vm11 = vcmp.lt.s32.totalorder %v3274_v33, %v3275_v48  ;;  %v3868_v30 = vmul.f32 1.442695, %v3866_v40  ;;  %v3852_v49 = vmul.f32 1.442695, %v3849_v35 }
 0x3a2   : > { %v3277_v58 = vsel %vm3276_vm11, %v3274_v33, %v3275_v48  ;;  %5045 = vpow2.f32 %v3850_v8  ;;  %v3855_v14 = vsub.f32 %v11137_v63, %v3847_v10  ;;  %v3861_v12 = vsub.f32 %v11138_v25, %v3847_v10  ;;  %v11144_v33 = vld [vmem:[#allocation67_spill] sm:$0xff] }
 0x3a3   : > { %vm3350_vm7 = vcmp.lt.s32.totalorder %v3348_v46, %v3349_v28  ;;  %v3278_v53 = vrot.slane %v3277_v58, 2  ;;  %5047 = vpow2.f32 %v3856_v37  ;;  %v3867_v36 = vsub.f32 %v3841_v43, %v3847_v10 }
 0x3a4   : > { %v3351_v27 = vsel %vm3350_vm7, %v3348_v46, %v3349_v28  ;;  %5049 = vpow2.f32 %v3862_v13  ;;  %v3858_v24 = vmul.f32 1.442695, %v3855_v14  ;;  %v3864_v61 = vmul.f32 1.442695, %v3861_v12 }
 0x3a5   : > { %v3352_v29 = vrot.slane %v3351_v27, 1  ;;  %vm3279_vm14 = vcmp.lt.s32.totalorder %v3277_v58, %v3278_v53  ;;  %5051 = vpow2.f32 %v3868_v30  ;;  %v3870_v11 = vmul.f32 1.442695, %v3867_v36 }
 0x3a6   : > { %v3280_v52 = vsel %vm3279_vm14, %v3277_v58, %v3278_v53  ;;  %5053 = vpow2.f32 %v3852_v49  ;;  %v11143_v43 = vmov 1.0|1.0  }
 0x3a7   : > { %vm3353_vm5 = vcmp.lt.s32.totalorder %v3351_v27, %v3352_v29  ;;  %v3281_v57 = vrot.slane %v3280_v52, 1  ;;  %5055 = vpow2.f32 %v3858_v24 }
 0x3a8   : > { %v9518_v60 = vsel %vm3353_vm5, %v3351_v27, %v3352_v29  ;;  %5057 = vpow2.f32 %v3864_v61 }
 0x3a9   : > { %vm3282_vm15 = vcmp.lt.s32.totalorder %v3280_v52, %v3281_v57  ;;  %vm3356_vm13 = vcmp.eq.s32.totalorder %v11139_v6, %v9518_v60  ;;  %vm3358_vm6 = vcmp.eq.s32.totalorder %v11140_v1, %v9518_v60  ;;  %vm3360_vm10 = vcmp.eq.s32.totalorder %v11141_v3, %v9518_v60 }
 0x3aa   : > { %v9524_v22 = vsel %vm3282_vm15, %v3280_v52, %v3281_v57  ;;  %vm4881_vm1 = vmpackc.low %vm3358_vm6, %vm3356_vm13  ;;  %vm3362_vm4 = vcmp.eq.s32.totalorder %v11142_v23, %v9518_v60  ;;  %5059 = vpow2.f32 %v3870_v11  ;;  %vm3364_vm11 = vcmp.eq.s32.totalorder %v10936_v38, %v9518_v60 }
 0x3ab   : > { %4882 = vmatprep.subr.msk.bf16.mxu1 %vm4881_vm1, %v11143_v43  ;;  %vm3355_vm2 = vcmp.eq.s32.totalorder %v11139_v6, %v9524_v22  ;;  %vm3357_vm3 = vcmp.eq.s32.totalorder %v11140_v1, %v9524_v22  ;;  %vm4885_vm0 = vmpackc.low %vm3362_vm4, %vm3360_vm10  ;;  %vm3359_vm12 = vcmp.eq.s32.totalorder %v11141_v3, %v9524_v22  ;;  %vm3361_vm8 = vcmp.eq.s32.totalorder %v11142_v23, %v9524_v22 }
 0x3ac   : > { %vm4883_vm9 = vmpackc.low %vm3357_vm3, %vm3355_vm2  ;;  %v5046_v16 = vpop.eup %5045  ;;  %vm3366_vm7 = vcmp.eq.s32.totalorder %v11144_v33, %v9518_v60  ;;  %vm3363_vm15 = vcmp.eq.s32.totalorder %v10936_v38, %v9524_v22  ;;  %vm3365_vm13 = vcmp.eq.s32.totalorder %v11144_v33, %v9524_v22  ;;  %vm3368_vm6 = vcmp.eq.s32.totalorder %v5775_v31, %v9518_v60 }
 0x3ad   : > { %4884 = vmatpush1.bf16.msk.msra.mxu1 %vm4883_vm9, %v11143_v43  ;;  %v5048_v15 = vpop.eup %5047  ;;  %vm4887_vm14 = vmpackc.low %vm3361_vm8, %vm3359_vm12  ;;  %vm3370_vm1 = vcmp.eq.s32.totalorder %v10638_v4, %v9518_v60  ;;  %vm3367_vm2 = vcmp.eq.s32.totalorder %v5775_v31, %v9524_v22  ;;  %vm3369_vm3 = vcmp.eq.s32.totalorder %v10638_v4, %v9524_v22  ;;  %vm3372_vm9 = vcmp.eq.s32.totalorder %v5781_v62, %v9518_v60  ;;  %v11145_v31 = vld [vmem:[#allocation69_spill] sm:$0xff] }
 0x3ae   : > { %4886 = vmatprep.subr.msk.bf16.mxu1 %vm4885_vm0, %v11143_v43  ;;  %v5050_v10 = vpop.eup %5049  ;;  %v3872_v48 = vadd.f32 %v5048_v15, %v5046_v16  ;;  %vm4889_vm5 = vmpackc.low %vm3366_vm7, %vm3364_vm11  ;;  %vm3374_vm0 = vcmp.eq.s32.totalorder %v5784_v0, %v9518_v60  ;;  %vm3371_vm11 = vcmp.eq.s32.totalorder %v5781_v62, %v9524_v22  ;;  %vm3373_vm7 = vcmp.eq.s32.totalorder %v5784_v0, %v9524_v22 }
 0x3af   : > { %v5052_v17 = vpop.eup %5051  ;;  %vm4891_vm10 = vmpackc.low %vm3365_vm13, %vm3363_vm15 }
 0x3b0   : > { %v5054_v56 = vpop.eup %5053  ;;  %v3874_v46 = vadd.f32 %v5050_v10, %v3872_v48  ;;  %vm4893_vm4 = vmpackc.low %vm3370_vm1, %vm3368_vm6  ;;  %vm3375_vm6 = vcmp.eq.s32.totalorder %v5787_v32, %v9524_v22  ;;  %vm3377_vm1 = vcmp.eq.s32.totalorder %v5790_v7, %v9524_v22 }
 0x3b1   : > { %4888 = vmatpush1.bf16.msk.msra.mxu1 %vm4887_vm14, %v11143_v43  ;;  %v9550_v50 = vpop.eup %5055  ;;  %vm4895_vm12 = vmpackc.low %vm3369_vm3, %vm3367_vm2  ;;  %vm3376_vm14 = vcmp.eq.s32.totalorder %v5787_v32, %v9518_v60  ;;  %v11146_v32 = vld [vmem:[#allocation43_spill] sm:$0xff] }
 0x3b2   : > { %4890 = vmatprep.subr.msk.bf16.mxu1 %vm4889_vm5, %v11143_v43  ;;  %v3876_v40 = vadd.f32 %v5052_v17, %v3874_v46  ;;  %v3873_v35 = vadd.f32 %v9550_v50, %v5054_v56  ;;  %v9558_v28 = vpop.eup %5057  ;;  %vm4897_vm8 = vmpackc.low %vm3374_vm0, %vm3372_vm9  ;;  %vm3378_vm5 = vcmp.eq.s32.totalorder %v5790_v7, %v9518_v60  ;;  %vm3379_vm9 = vcmp.eq.s32.totalorder %v5793_v5, %v9524_v22 }
 0x3b3   : > { %vm4899_vm15 = vmpackc.low %vm3373_vm7, %vm3371_vm11  ;;  %vm3381_vm0 = vcmp.eq.s32.totalorder %v11145_v31, %v9524_v22 }
 0x3b4   : > { %5061 = vrcp.f32 %v3876_v40  ;;  %v3875_v38 = vadd.f32 %v9558_v28, %v3873_v35  ;;  %v9566_v8 = vpop.eup %5059  ;;  %vm4901_vm13 = vmpackc.low %vm3378_vm5, %vm3376_vm14  ;;  %vm3383_vm14 = vcmp.eq.s32.totalorder %v5799_v2, %v9524_v22  ;;  %vm3385_vm5 = vcmp.eq.s32.totalorder %v5802_v47, %v9524_v22 }
 0x3b5   : > { %4892 = vmatpush1.bf16.msk.msra.mxu1 %vm4891_vm10, %v11143_v43  ;;  %vm3380_vm10 = vcmp.eq.s32.totalorder %v5793_v5, %v9518_v60  ;;  %vm4903_vm2 = vmpackc.low %vm3377_vm1, %vm3375_vm6  ;;  %v11147_v5 = vld [vmem:[#allocation40_spill] sm:$0xff] }
 0x3b6   : > { %4894 = vmatprep.subr.msk.bf16.mxu1 %vm4893_vm4, %v11143_v43  ;;  %v3877_v37 = vadd.f32 %v9566_v8, %v3875_v38  ;;  %vm3382_vm4 = vcmp.eq.s32.totalorder %v11145_v31, %v9518_v60  ;;  %vm4907_vm11 = vmpackc.low %vm3381_vm0, %vm3379_vm9 }
 0x3b7   : > { %vm4905_vm3 = vmpackc.low %vm3382_vm4, %vm3380_vm10  ;;  %vm3387_vm10 = vcmp.eq.s32.totalorder %v10647_v44, %v9524_v22  ;;  %vm3389_vm4 = vcmp.eq.s32.totalorder %v11087_v42, %v9524_v22 }
 0x3b8   : > { %5063 = vrcp.f32 %v3877_v37  ;;  %vm4911_vm6 = vmpackc.low %vm3385_vm5, %vm3383_vm14 }
 0x3b9   : > { %4896 = vmatpush1.bf16.msk.msra.mxu1 %vm4895_vm12, %v11143_v43  ;;  %vm3384_vm12 = vcmp.eq.s32.totalorder %v5799_v2, %v9518_v60  ;;  %vm4915_vm9 = vmpackc.low %vm3389_vm4, %vm3387_vm10 }
 0x3ba   : > { %4898 = vmatprep.subr.msk.bf16.mxu1 %vm4897_vm8, %v11143_v43  ;;  %vm3386_vm8 = vcmp.eq.s32.totalorder %v5802_v47, %v9518_v60 }
 0x3bb   : > { %vm4909_vm7 = vmpackc.low %vm3386_vm8, %vm3384_vm12  ;;  %vm3391_vm12 = vcmp.eq.s32.totalorder %v11090_v34, %v9524_v22  ;;  %vm3393_vm8 = vcmp.eq.s32.totalorder %v11091_v20, %v9524_v22 }
 0x3bc   : > { %vm4919_vm14 = vmpackc.low %vm3393_vm8, %vm3391_vm12 }
 0x3bd   : > { %4900 = vmatpush1.bf16.msk.msra.mxu1 %vm4899_vm15, %v11143_v43  ;;  %vm3388_vm15 = vcmp.eq.s32.totalorder %v10647_v44, %v9518_v60 }
 0x3be   : > { %4902 = vmatprep.subr.msk.bf16.mxu1 %vm4901_vm13, %v11143_v43  ;;  %v5062_v62 = vpop.eup %5061  ;;  %vm3390_vm13 = vcmp.eq.s32.totalorder %v11087_v42, %v9518_v60 }
 0x3bf   : > { %v3880_v0 = vmul.f32 %v5062_v62, %v5046_v16  ;;  %v3884_v4 = vmul.f32 %v5062_v62, %v5048_v15  ;;  %v9594_v58 = vmul.f32 %v5062_v62, %v5050_v10  ;;  %v9596_v13 = vmul.f32 %v5062_v62, %v5052_v17  ;;  %vm4913_vm1 = vmpackc.low %vm3390_vm13, %vm3388_vm15 }
 0x3c0   : > { %vm3395_vm15 = vcmp.eq.s32.totalorder %v11094_v18, %v9524_v22  ;;  %vm3397_vm13 = vcmp.eq.s32.totalorder %v11095_v45, %v9524_v22 }
 0x3c1   : > { %4904 = vmatpush1.bf16.msk.msra.mxu1 %vm4903_vm2, %v11143_v43  ;;  %v3882_v7 = vmul.f32 %v3880_v0, %v11146_v32  ;;  %vm3392_vm2 = vcmp.eq.s32.totalorder %v11090_v34, %v9518_v60  ;;  %vm4923_vm10 = vmpackc.low %vm3397_vm13, %vm3395_vm15 }
 0x3c2   : > { %4906 = vmatprep.subr.msk.bf16.mxu1 %vm4905_vm3, %v11143_v43  ;;  %v9609_v30 = vpop.eup %5063  ;;  %vm3394_vm3 = vcmp.eq.s32.totalorder %v11091_v20, %v9518_v60 }
 0x3c3   : > { %v3881_v49 = vmul.f32 %v9609_v30, %v5054_v56  ;;  %vm4917_vm0 = vmpackc.low %vm3394_vm3, %vm3392_vm2  ;;  %v3885_v47 = vmul.f32 %v9609_v30, %v9550_v50  ;;  %vm3399_vm2 = vcmp.eq.s32.totalorder %v10886_v9, %v9524_v22  ;;  %vm3401_vm3 = vcmp.eq.s32.totalorder %v11106_v39, %v9524_v22 }
 0x3c4   : > { %vm4927_vm12 = vmpackc.low %vm3401_vm3, %vm3399_vm2 }
 0x3c5   : > { %4908 = vmatpush1.bf16.msk.msra.mxu1 %vm4907_vm11, %v11143_v43  ;;  %v3883_v53 = vmul.f32 %v3881_v49, %v11147_v5  ;;  %vm3396_vm11 = vcmp.eq.s32.totalorder %v11094_v18, %v9518_v60 }
 0x3c6   : > { %4910 = vmatprep.subr.msk.bf16.mxu1 %vm4909_vm7, %v11143_v43  ;;  %vm3398_vm7 = vcmp.eq.s32.totalorder %v11095_v45, %v9518_v60 }
 0x3c7   : > { %vm4921_vm5 = vmpackc.low %vm3398_vm7, %vm3396_vm11  ;;  %vm3403_vm11 = vcmp.eq.s32.totalorder %v11129_v54, %v9524_v22  ;;  %vm3405_vm7 = vcmp.eq.s32.totalorder %v11130_v51, %v9524_v22 }
 0x3c8   : > { %vm4931_vm15 = vmpackc.low %vm3405_vm7, %vm3403_vm11 }
 0x3c9   : > { %4912 = vmatpush1.bf16.msk.msra.mxu1 %vm4911_vm6, %v11143_v43  ;;  %vm3400_vm6 = vcmp.eq.s32.totalorder %v10886_v9, %v9518_v60 }
 0x3ca   : > { %4914 = vmatprep.subr.msk.bf16.mxu1 %vm4913_vm1, %v11143_v43  ;;  %vm3402_vm1 = vcmp.eq.s32.totalorder %v11106_v39, %v9518_v60  ;;  %v3897_v39 = vmul.f32 %v9609_v30, %v9566_v8 }
 0x3cb   : > { %vm4925_vm4 = vmpackc.low %vm3402_vm1, %vm3400_vm6  ;;  %vm3407_vm6 = vcmp.eq.s32.totalorder %v10901_v26, %v9524_v22  ;;  %vm3409_vm1 = vcmp.eq.s32.totalorder %v10931_v59, %v9524_v22 }
 0x3cc   : > { %vm4935_vm2 = vmpackc.low %vm3409_vm1, %vm3407_vm6 }
 0x3cd   : > { %4916 = vmatpush1.bf16.msk.msra.mxu1 %vm4915_vm9, %v11143_v43  ;;  %v3687_v2 = vpop.f32.mrb[2].mxu1  ;;  %vm3404_vm9 = vcmp.eq.s32.totalorder %v11129_v54, %v9518_v60 }
 0x3ce   : > { %4918 = vmatprep.subr.msk.bf16.mxu1 %vm4917_vm0, %v11143_v43  ;;  %v3886_v44 = vmul.f32 %v3884_v4, %v3687_v2  ;;  %v3689_v42 = vpop.f32.mrb[3].mxu1  ;;  %vm3406_vm0 = vcmp.eq.s32.totalorder %v11130_v51, %v9518_v60 }
 0x3cf   : > { %v3887_v34 = vmul.f32 %v3885_v47, %v3689_v42  ;;  %vm4929_vm8 = vmpackc.low %vm3406_vm0, %vm3404_vm9  ;;  %vm3411_vm9 = vcmp.eq.s32.totalorder %v10702_v41, %v9524_v22  ;;  %vm3413_vm0 = vcmp.eq.s32.totalorder %v10907_v21, %v9524_v22 }
 0x3d0   : > { %v3888_v20 = vadd.f32 %v3886_v44, %v3882_v7  ;;  %vm4939_vm11 = vmpackc.low %vm3413_vm0, %vm3411_vm9 }
 0x3d1   : > { %4920 = vmatpush1.bf16.msk.msra.mxu1 %vm4919_vm14, %v11143_v43  ;;  %v3889_v63 = vadd.f32 %v3887_v34, %v3883_v53  ;;  %vm3408_vm14 = vcmp.eq.s32.totalorder %v10901_v26, %v9518_v60  ;;  %v3891_v26 = vmul.f32 %v9609_v30, %v9558_v28 }
 0x3d2   : > { %4922 = vmatprep.subr.msk.bf16.mxu1 %vm4921_vm5, %v11143_v43  ;;  %vm3410_vm5 = vcmp.eq.s32.totalorder %v10931_v59, %v9518_v60 }
 0x3d3   : > { %vm4933_vm13 = vmpackc.low %vm3410_vm5, %vm3408_vm14  ;;  %vm3415_vm14 = vcmp.eq.s32.totalorder %v10972_v19, %v9524_v22  ;;  %vm3417_vm5 = vcmp.eq.s32.totalorder %v10977_v55, %v9524_v22 }
 0x3d5   : > { %4924 = vmatpush1.bf16.msk.msra.mxu1 %vm4923_vm10, %v11143_v43  ;;  %vm3412_vm10 = vcmp.eq.s32.totalorder %v10702_v41, %v9518_v60  ;;  %v5066_v41 = vld [vmem:[%s6721_s26] sm:$0xff] }
 0x3d6   : > { %4926 = vmatprep.subr.msk.bf16.mxu1 %vm4925_vm4, %v11143_v43  ;;  %vm3414_vm4 = vcmp.eq.s32.totalorder %v10907_v21, %v9518_v60 }
 0x3d7   : > { %vm4937_vm3 = vmpackc.low %vm3414_vm4, %vm3412_vm10 }
 0x3d9   : > { %4928 = vmatpush1.bf16.msk.msra.mxu1 %vm4927_vm12, %v11143_v43  ;;  %vm3416_vm12 = vcmp.eq.s32.totalorder %v10972_v19, %v9518_v60 }
 0x3da   : > { %4930 = vmatprep.subr.msk.bf16.mxu1 %vm4929_vm8, %v11143_v43  ;;  %vm3418_vm8 = vcmp.eq.s32.totalorder %v10977_v55, %v9518_v60 }
 0x3db   : > { %vm4941_vm7 = vmpackc.low %vm3418_vm8, %vm3416_vm12 }
 0x3dd   : > { %4932 = vmatpush1.bf16.msk.msra.mxu1 %vm4931_vm15, %v11143_v43  ;;  %vm4943_vm15 = vmpackc.low %vm3417_vm5, %vm3415_vm14 }
 0x3de   : > { %4934 = vmatprep.subr.msk.bf16.mxu1 %vm4933_vm13, %v11143_v43 }
 0x3e1   : > { %4936 = vmatpush1.bf16.msk.msra.mxu1 %vm4935_vm2, %v11143_v43 }
 0x3e2   : > { %4938 = vmatprep.subr.msk.bf16.mxu1 %vm4937_vm3, %v11143_v43 }
 0x3e5   : > { %4940 = vmatpush1.bf16.msk.msra.mxu1 %vm4939_vm11, %v11143_v43 }
 0x3e6   : > { %4942 = vmatprep.subr.msk.bf16.mxu1 %vm4941_vm7, %v11143_v43 }
 0x3e9   : > { %4944 = vmatpush1.bf16.msk.msra.mxu1 %vm4943_vm15, %v11143_v43 }
 0x3ec   : > { %3828 = vmatmul.mubr.f32.vlgmr.msra.gmra.mrb[4].mxu1 %v5066_v41 }
 0x43d   : > { %v3758_v9 = vpop.f32.mrb[64].mxu0 }
 0x43e   : > { %v3892_v21 = vmul.f32 %v9594_v58, %v3758_v9  ;;  %v3760_v59 = vpop.f32.mrb[65].mxu0 }
 0x43f   : > { %v3893_v18 = vmul.f32 %v3891_v26, %v3760_v59 }
 0x440   : > { %v3894_v19 = vadd.f32 %v3892_v21, %v3888_v20 }
 0x441   : > { %v3895_v45 = vadd.f32 %v3893_v18, %v3889_v63 }
 0x4bf   : > { %v3829_v55 = vpop.f32.mrb[4].mxu1 }
 0x4c0   : > { %v3898_v54 = vmul.f32 %v9596_v13, %v3829_v55  ;;  %v3831_v51 = vpop.f32.mrb[5].mxu1 }
 0x4c1   : > { %v3899_v14 = vmul.f32 %v3897_v39, %v3831_v51 }
 0x4c2   : > { %v3900_v27 = vadd.f32 %v3898_v54, %v3894_v19 }
 0x4c3   : > { %v3901_v25 = vadd.f32 %v3899_v14, %v3895_v45 }
 0x4c5   : > { %v3904_v12 = vcombine.low %v3900_v27, %v3901_v25 }
 0x4c7   : > { %3906 = vst [vmem:[%s300_s6] sm:$0xff] %v3904_v12 }
 0x4c8   : > { %5080 = shalt.err (!%p5077_p5)
}
 0x4c9   : > { %s5081_s21 = scalar_lea.hbm %s9714_s10, 128  ;;  %s5085_s26 = scalar_lea.hbm %s9765_s4, 256 }
 0x4ca   : > { %p5082_p6 = scmp.ne.s32.totalorder %s9714_s10, %s5081_s21  ;;  %p5086_p10 = scmp.lt.u32.totalorder %s9714_s10, %s9765_s4 }
 0x4cb   : > { %p5087_p11 = scmp.lt.u32.totalorder %s5085_s26, %s5081_s21  ;;  %p5089_p13 = scmp.lt.u32.totalorder %s5081_s21, %s9714_s10 }
 0x4cc   : > { %p5083_p7 = pnand %p5082_p6, %p5215_p4 }
 0x4cd   : > { %p5088_p12 = por %p5087_p11, %p5086_p10 }
 0x4ce   : > { %p5084_p9 = pneg %p5083_p7 }
 0x4cf   : > { %p5090_p0 = por %p5089_p13, %p5088_p12 }
 0x4d1   : > { %p5091_p1 = pnand %p5090_p0, %p5084_p9 }
 0x4d3   : > { %5094 = shalt.err (!%p5091_p1)
}
 0x4d4   : > { %4953 = dma.vmem_to_hbm [thread:$0]  (%p5215_p4), %s9716_s7, 128, %s9714_s10, %s3908_s11  }
 0x4d5 PF: > { %p4959_p2 = scmp.ge.s32.totalorder %s5145_s20, 2  ;;  %s3936_s5 = sand.u32 1, %s5125_s15  }
 0x4d6   : > { %s3937_s6 = scalar_lea.sflag [#allocation3], %s3936_s5 }
 0x4d7   : > { %p4956_p3 = pnand %p4959_p2, %p5222_p8 }
 0x4d9   : > { %5120 = dma.done.wait (!%p4956_p3), %s3937_s6, 128  }
 0x4da   : > { %5122 = vsyncadd (!%p4956_p3), %s3937_s6, 4294967168  ;;  %s17_s20 = sadd.s32 1, %s5145_s20   ;;  %s11148_s15 = smov %s5129_s16 }
 0x4db   : > { %p14_p5 = scmp.ge.s32.totalorder %s17_s20, 4   ;;  %s11149_s16 = smov %s5133_s17 }
 0x4dc   : > { %s11150_s17 = smov %s5228_s28  ;;  %s11151_s18 = smov %s5141_s19 }
 0x4dd   : > { %s11152_s19 = smov %s11154_s23  ;;  %16 = sbr.rel (!%p14_p5) target bundleno = 4 (0x4), region = 80 }
 0x4e4   :  { %3942 = vsyncpa [#allocation3], 1 }
 0x4e5   :  { %3944 = vsyncpa [#allocation3 + $0x1], 1 }

</bundles_post_ra>
